<compile_context>
chip_gen: v7x
topology: tpu7x:2x2x1
jax: 0.10.0
libtpu: 0.0.40
codegen_flags: <defaults>
</compile_context>

<pallas_src>
import numpy as np
import jax
import jax.numpy as jnp
from jax.experimental import pallas as pl
from jax.experimental.pallas import tpu as pltpu

_EPS = 1e-8

# ----- module hyper-parameters (small, TPU-friendly analogue of the defaults) -----
SZ_IN = 128            # sinc filter length       (torch default 1024)
SZ_OUT = 128           # number of sinc filters   (torch default 1024)
HOP = 32               # hop size                 (torch default 384)
FS = 256               # exp_settings['fs']
D_P_LENGTH = 1         # exp_settings['d_p_length']
DICT_SORTING = False   # exp_settings['dict_sorting']
BATCH = 2

INPUT_SIZE = FS * D_P_LENGTH                                   # 256 samples
OUT_LEN = int(np.ceil(INPUT_SIZE / HOP))                       # 8 frames
PAD = int(-INPUT_SIZE / 2 + SZ_IN / 2 - HOP / 2 + OUT_LEN * HOP / 2)   # 48

CONV_K = 5
CONV_DIL = 10
CONV_PAD = 20

# Padded-wave length rounded up to a lane multiple (trailing zeros never read).
WPAD = ((INPUT_SIZE + 2 * PAD + 127) // 128) * 128             # 384
assert (OUT_LEN - 1) * HOP + SZ_IN <= WPAD


def _live_taps():
    """Trace-time pruning: conv_a taps whose receptive field overlaps real samples."""
    taps = []
    for j in range(CONV_K):
        s = j * CONV_DIL - CONV_PAD           # input frame index = output index + s
        o0 = max(0, -s)
        o1 = min(OUT_LEN, OUT_LEN - s)
        if o1 > o0:
            taps.append((j, s, o0, o1))
    return tuple(taps)


LIVE_TAPS = _live_taps()   # for this config: ((2, 0, 0, 8),)
# Taps that can be folded into the dictionary (shift 0, full output range).
FOLD_IDX = tuple(i for i, (j, s, o0, o1) in enumerate(LIVE_TAPS)
                 if s == 0 and o0 == 0 and o1 == OUT_LEN)
REST_IDX = tuple(i for i in range(len(LIVE_TAPS)) if i not in FOLD_IDX)


# ---------------------------------------------------------------------------
# Fused kernel: sinc dictionary (reciprocal-free) + folded conv_a tap +
# strided conv1d (frames @ D') + ReLU.  Single grid step, no VMEM scratch.
# ---------------------------------------------------------------------------
def fused_kernel(f_t_ref, f1_ref, f2_ref, scale_ref, wave_ref, w_ref, out_ref):
    # ---- (1) sinc dictionary, pre-transposed MXU RHS (SZ_IN, SZ_OUT) ----
    # dict[k, n] = (sin(f[k,n]*f1[n]) - sin(f[k,n]*f2[n])) * (2*norm[k]/f[k,n])
    # with the (2*norm/f) factor precomputed in the wrapper (scale_ref).
    f_t = f_t_ref[...]                                   # (SZ_IN, SZ_OUT) f32
    d32 = (jnp.sin(f_t * f1_ref[...]) -
           jnp.sin(f_t * f2_ref[...])) * scale_ref[...]  # (SZ_IN, SZ_OUT) f32
    d16 = d32.astype(jnp.bfloat16)

    # ---- (2) frames assembled in registers (no scratch, no masked stores) ----
    rows = []
    for b in range(BATCH):
        for l in range(OUT_LEN):
            rows.append(wave_ref[pl.ds(b, 1), pl.ds(l * HOP, SZ_IN)])
    frames = jnp.concatenate(rows, axis=0).astype(jnp.bfloat16)   # (B*L, SZ_IN)

    if not REST_IDX:
        # ---- (3) fold the full-range, shift-0 conv_a tap(s) into the dict:
        #          relu(x + x@W) = relu(frames @ (D + D@W))
        d_eff = d16
        if FOLD_IDX:
            w_sum = w_ref[FOLD_IDX[0]]                   # (SZ_OUT, SZ_OUT) bf16
            for i in FOLD_IDX[1:]:
                w_sum = w_sum + w_ref[i]
            d_eff = (d32 + jnp.dot(d16, w_sum,
                                   preferred_element_type=jnp.float32)
                     ).astype(jnp.bfloat16)
        out_ref[...] = jnp.maximum(
            jnp.dot(frames, d_eff, preferred_element_type=jnp.float32), 0.0)
    else:
        # General path (not traced for this configuration): partially-live taps
        # handled on the flat (B*L, C) layout with a sublane roll + mask.
        x = jnp.dot(frames, d16, preferred_element_type=jnp.float32)
        acc = x
        x16 = x.astype(jnp.bfloat16)
        for i, (j, s, o0, o1) in enumerate(LIVE_TAPS):
            w_j = w_ref[i]
            if s == 0 and o0 == 0 and o1 == OUT_LEN:
                acc = acc + jnp.dot(x16, w_j, preferred_element_type=jnp.float32)
            else:
                o_idx = jax.lax.broadcasted_iota(
                    jnp.int32, (BATCH * OUT_LEN, 1), 0) % OUT_LEN
                live = jnp.logical_and(o_idx >= o0, o_idx < o1)
                x_sh = jnp.where(live, jnp.roll(x16, shift=-s, axis=0),
                                 0).astype(jnp.bfloat16)
                acc = acc + jnp.dot(x_sh, w_j, preferred_element_type=jnp.float32)
        out_ref[...] = jnp.maximum(acc, 0.0)


# ---------------------------------------------------------------------------
# Forward pass wrapper (only tiny glue left in XLA: pads / transposes / scale).
# ---------------------------------------------------------------------------
def sinc_analysis_smooth_forward(wave_form, f_matrix, freq_f1, freq_f2,
                                 norm_factor, conv_a_w):
    B, _ = wave_form.shape
    assert B == BATCH

    # self.p == 1, so pow(p) is identity.
    if DICT_SORTING:
        # torch: sort(dim=0) of (N,1,1); f2 indexed by s_indices[0,0,:] (argmin).
        # TODO(synk): DICT_SORTING=True path untested against torch semantics.
        f1_flat = freq_f1.reshape(-1)
        order = jnp.argsort(f1_flat)
        f1_out = f1_flat[order]
        f2_out = jnp.broadcast_to(freq_f2.reshape(-1)[order[0]], (SZ_OUT,))
    else:
        f1_out = freq_f1.reshape(-1)
        f2_out = freq_f2.reshape(-1)

    f_t = jnp.transpose(f_matrix.reshape(SZ_OUT, SZ_IN)).astype(jnp.float32)
    f1_row = f1_out.reshape(1, SZ_OUT).astype(jnp.float32)
    f2_row = f2_out.reshape(1, SZ_OUT).astype(jnp.float32)

    # Reciprocal-free dictionary factor:
    #   2*f1*sin(f*f1)/(f*f1 + eps) ~= 2*sin(f*f1)/f
    # (min |f*f1| ~ 0.2 >> eps=1e-8, relative error < 1e-7).  norm_factor is
    # folded in here as well, removing the lane-sparse column input.
    norm_col = norm_factor.reshape(SZ_IN, 1).astype(jnp.float32)
    dict_scale = (2.0 * norm_col) / f_t                  # (SZ_IN, SZ_OUT) f32

    extra = WPAD - (INPUT_SIZE + 2 * PAD)
    wave_pad = jnp.pad(wave_form.astype(jnp.float32),
                       ((0, 0), (PAD, PAD + extra)))     # (B, WPAD)

    # Conv weights for live taps only, transposed to (C_in, C_out) RHS layout.
    if LIVE_TAPS:
        w_taps = jnp.stack(
            [jnp.transpose(conv_a_w[:, :, j]) for (j, _, _, _) in LIVE_TAPS],
            axis=0).astype(jnp.bfloat16)                 # (n_live, C, O)
    else:
        w_taps = jnp.zeros((1, SZ_OUT, SZ_OUT), jnp.bfloat16)
    n_w = w_taps.shape[0]

    flops = 2 * (B * OUT_LEN) * SZ_IN * SZ_OUT
    if FOLD_IDX:
        flops += 2 * SZ_IN * SZ_OUT * SZ_OUT
    bytes_accessed = int(4 * (f_t.size + f1_row.size + f2_row.size +
                              dict_scale.size + wave_pad.size +
                              B * OUT_LEN * SZ_OUT) + 2 * w_taps.size)

    y_flat = pl.pallas_call(
        fused_kernel,
        out_shape=jax.ShapeDtypeStruct((B * OUT_LEN, SZ_OUT), jnp.float32),
        grid=(1,),
        in_specs=[
            pl.BlockSpec((SZ_IN, SZ_OUT), lambda i: (0, 0)),
            pl.BlockSpec((1, SZ_OUT), lambda i: (0, 0)),
            pl.BlockSpec((1, SZ_OUT), lambda i: (0, 0)),
            pl.BlockSpec((SZ_IN, SZ_OUT), lambda i: (0, 0)),
            pl.BlockSpec((B, WPAD), lambda i: (0, 0)),
            pl.BlockSpec((n_w, SZ_OUT, SZ_OUT), lambda i: (0, 0, 0)),
        ],
        out_specs=pl.BlockSpec((B * OUT_LEN, SZ_OUT), lambda i: (0, 0)),
        compiler_params=pltpu.CompilerParams(
            dimension_semantics=("arbitrary",)),
        cost_estimate=pl.CostEstimate(
            flops=flops,
            transcendentals=2 * SZ_IN * SZ_OUT,
            bytes_accessed=bytes_accessed),
    )(f_t, f1_row, f2_row, dict_scale, wave_pad, w_taps)

    y = y_flat.reshape(B, OUT_LEN, SZ_OUT)
    return jnp.transpose(y, (0, 2, 1))    # back to PyTorch NCL (B, sz_out, L)


# ---------------------------------------------------------------------------
# Deterministic parameter construction (mirrors __init__ / initialize()).
# ---------------------------------------------------------------------------
def to_mel(hz):
    return 2595.0 * np.log10(1.0 + hz / 700.0)


def make_params(key):
    k_noise, k_conv = jax.random.split(key, 2)

    t = np.arange(0, SZ_IN // 2 + 1)
    t = np.hstack((-np.flip(t)[:-1], 0.1, t[1:-1]))
    f_row = (2.0 * np.pi * t).astype(np.float32)
    f_matrix = jnp.asarray(np.broadcast_to(f_row, (SZ_OUT, SZ_IN)).copy())

    mel = jnp.linspace(to_mel(80.0), to_mel(22050.0), SZ_OUT)
    freq_f1 = (700.0 * (10.0 ** (mel / 2595.0) - 1.0) / FS).astype(jnp.float32)
    noise = jax.random.normal(k_noise, (SZ_OUT,), jnp.float32)
    freq_f2 = (700.0 * (10.0 ** ((mel + noise) / 2595.0) - 1.0) / FS).astype(
        jnp.float32)

    norm_factor = jnp.ones((1, 1, SZ_IN), jnp.float32)

    # kaiming_uniform_ on Conv1d weight (out, in, k): bound = sqrt(6 / fan_in).
    fan_in = SZ_OUT * CONV_K
    bound = float(np.sqrt(6.0 / fan_in))
    conv_a_w = jax.random.uniform(
        k_conv, (SZ_OUT, SZ_OUT, CONV_K), jnp.float32, -bound, bound)

    return f_matrix, freq_f1, freq_f2, norm_factor, conv_a_w


# ---------------------------------------------------------------------------
# Pure-JAX reference (full, unpruned conv; exact f32 math, eps kept).
# ---------------------------------------------------------------------------
def reference_forward(wave, f_matrix, f1, f2, norm, w):
    f1c = f1.reshape(SZ_OUT, 1)
    f2c = f2.reshape(SZ_OUT, 1)
    fm = f_matrix.reshape(SZ_OUT, SZ_IN)
    a1 = fm * f1c
    a2 = fm * f2c
    sd = (2.0 * f1c * (jnp.sin(a1) / (a1 + _EPS))
          - 2.0 * f2c * (jnp.sin(a2) / (a2 + _EPS))) * norm.reshape(1, SZ_IN)
    wp = jnp.pad(wave, ((0, 0), (PAD, PAD)))
    idx = jnp.arange(OUT_LEN)[:, None] * HOP + jnp.arange(SZ_IN)[None, :]
    frames = wp[:, idx]
    xc = jnp.einsum('blk,nk->bln', frames, sd)
    xp = jnp.pad(xc, ((0, 0), (CONV_PAD, CONV_PAD), (0, 0)))
    y = xc
    for j in range(CONV_K):
        y = y + jnp.einsum('blc,oc->blo',
                           xp[:, j * CONV_DIL: j * CONV_DIL + OUT_LEN, :],
                           w[:, :, j])
    return jnp.maximum(y, 0.0).transpose(0, 2, 1)


if __name__ == "__main__":
    key = jax.random.PRNGKey(0)
    k_wave, k_params = jax.random.split(key)

    f_matrix, freq_f1, freq_f2, norm_factor, conv_a_w = make_params(k_params)
    wave_form = jax.random.normal(k_wave, (BATCH, INPUT_SIZE), jnp.float32)

    fwd = jax.jit(sinc_analysis_smooth_forward)
    out = fwd(wave_form, f_matrix, freq_f1, freq_f2, norm_factor, conv_a_w)
    out = jax.block_until_ready(out)

    assert out.shape == (BATCH, SZ_OUT, OUT_LEN), out.shape
    assert bool(jnp.all(jnp.isfinite(out)))
    assert bool(jnp.all(out >= 0.0))   # ReLU output

    ref = reference_forward(wave_form, f_matrix, freq_f1, freq_f2,
                            norm_factor, conv_a_w)
    err = float(jnp.max(jnp.abs(out - ref)))
    scale = float(jnp.max(jnp.abs(ref))) + 1e-6
    assert err / scale < 5e-2, (err, scale)

    print("KERNEL_OK")
</pallas_src>

<mosaic_0001>
module attributes {stable_mosaic.version = 11 : i64} {
  func.func @fused_kernel(%arg0: i32, %arg1: memref<128x128xf32, #tpu.memory_space<vmem>>, %arg2: memref<1x128xf32, #tpu.memory_space<vmem>>, %arg3: memref<1x128xf32, #tpu.memory_space<vmem>>, %arg4: memref<128x128xf32, #tpu.memory_space<vmem>>, %arg5: memref<2x384xf32, #tpu.memory_space<vmem>>, %arg6: memref<1x128x128xbf16, #tpu.memory_space<vmem>>, %arg7: memref<16x128xf32, #tpu.memory_space<vmem>>) attributes {dimension_semantics = [#tpu.dimension_semantics<arbitrary>], iteration_bounds = array<i64: 1>, scalar_prefetch = 0 : i64, scratch_operands = 0 : i64, tpu.core_type = #tpu.core_type<tc>, window_params = [{pipeline_mode = #tpu.pipeline_mode<synchronous>, transform_indices = @transform_0, window_bounds = array<i64: 128, 128>}, {pipeline_mode = #tpu.pipeline_mode<synchronous>, transform_indices = @transform_1, window_bounds = array<i64: 1, 128>}, {pipeline_mode = #tpu.pipeline_mode<synchronous>, transform_indices = @transform_2, window_bounds = array<i64: 1, 128>}, {pipeline_mode = #tpu.pipeline_mode<synchronous>, transform_indices = @transform_3, window_bounds = array<i64: 128, 128>}, {pipeline_mode = #tpu.pipeline_mode<synchronous>, transform_indices = @transform_4, window_bounds = array<i64: 2, 384>}, {pipeline_mode = #tpu.pipeline_mode<synchronous>, transform_indices = @transform_5, window_bounds = array<i64: 1, 128, 128>}, {pipeline_mode = #tpu.pipeline_mode<synchronous>, transform_indices = @transform_6, window_bounds = array<i64: 16, 128>}]} {
    %c0 = arith.constant 0 : index
    %c0_0 = arith.constant 0 : index
    %0 = vector.load %arg1[%c0, %c0_0] : memref<128x128xf32, #tpu.memory_space<vmem>>, vector<128x128xf32>
    %c0_1 = arith.constant 0 : index
    %c0_2 = arith.constant 0 : index
    %1 = vector.load %arg2[%c0_1, %c0_2] : memref<1x128xf32, #tpu.memory_space<vmem>>, vector<1x128xf32>
    %2 = vector.broadcast %1 : vector<1x128xf32> to vector<128x128xf32>
    %3 = arith.mulf %0, %2 : vector<128x128xf32>
    %4 = math.sin %3 : vector<128x128xf32>
    %c0_3 = arith.constant 0 : index
    %c0_4 = arith.constant 0 : index
    %5 = vector.load %arg3[%c0_3, %c0_4] : memref<1x128xf32, #tpu.memory_space<vmem>>, vector<1x128xf32>
    %6 = vector.broadcast %5 : vector<1x128xf32> to vector<128x128xf32>
    %7 = arith.mulf %0, %6 : vector<128x128xf32>
    %8 = math.sin %7 : vector<128x128xf32>
    %9 = arith.subf %4, %8 : vector<128x128xf32>
    %c0_5 = arith.constant 0 : index
    %c0_6 = arith.constant 0 : index
    %10 = vector.load %arg4[%c0_5, %c0_6] : memref<128x128xf32, #tpu.memory_space<vmem>>, vector<128x128xf32>
    %11 = arith.mulf %9, %10 : vector<128x128xf32>
    %12 = arith.truncf %11 : vector<128x128xf32> to vector<128x128xbf16>
    %c0_7 = arith.constant 0 : index
    %c0_8 = arith.constant 0 : index
    %13 = vector.load %arg5[%c0_7, %c0_8] : memref<2x384xf32, #tpu.memory_space<vmem>>, vector<1x128xf32>
    %c0_9 = arith.constant 0 : index
    %c32 = arith.constant 32 : index
    %14 = vector.load %arg5[%c0_9, %c32] : memref<2x384xf32, #tpu.memory_space<vmem>>, vector<1x128xf32>
    %c0_10 = arith.constant 0 : index
    %c64 = arith.constant 64 : index
    %15 = vector.load %arg5[%c0_10, %c64] : memref<2x384xf32, #tpu.memory_space<vmem>>, vector<1x128xf32>
    %c0_11 = arith.constant 0 : index
    %c96 = arith.constant 96 : index
    %16 = vector.load %arg5[%c0_11, %c96] : memref<2x384xf32, #tpu.memory_space<vmem>>, vector<1x128xf32>
    %c0_12 = arith.constant 0 : index
    %c128 = arith.constant 128 : index
    %17 = vector.load %arg5[%c0_12, %c128] : memref<2x384xf32, #tpu.memory_space<vmem>>, vector<1x128xf32>
    %c0_13 = arith.constant 0 : index
    %c160 = arith.constant 160 : index
    %18 = vector.load %arg5[%c0_13, %c160] : memref<2x384xf32, #tpu.memory_space<vmem>>, vector<1x128xf32>
    %c0_14 = arith.constant 0 : index
    %c192 = arith.constant 192 : index
    %19 = vector.load %arg5[%c0_14, %c192] : memref<2x384xf32, #tpu.memory_space<vmem>>, vector<1x128xf32>
    %c0_15 = arith.constant 0 : index
    %c224 = arith.constant 224 : index
    %20 = vector.load %arg5[%c0_15, %c224] : memref<2x384xf32, #tpu.memory_space<vmem>>, vector<1x128xf32>
    %c1 = arith.constant 1 : index
    %c0_16 = arith.constant 0 : index
    %21 = vector.load %arg5[%c1, %c0_16] : memref<2x384xf32, #tpu.memory_space<vmem>>, vector<1x128xf32>
    %c1_17 = arith.constant 1 : index
    %c32_18 = arith.constant 32 : index
    %22 = vector.load %arg5[%c1_17, %c32_18] : memref<2x384xf32, #tpu.memory_space<vmem>>, vector<1x128xf32>
    %c1_19 = arith.constant 1 : index
    %c64_20 = arith.constant 64 : index
    %23 = vector.load %arg5[%c1_19, %c64_20] : memref<2x384xf32, #tpu.memory_space<vmem>>, vector<1x128xf32>
    %c1_21 = arith.constant 1 : index
    %c96_22 = arith.constant 96 : index
    %24 = vector.load %arg5[%c1_21, %c96_22] : memref<2x384xf32, #tpu.memory_space<vmem>>, vector<1x128xf32>
    %c1_23 = arith.constant 1 : index
    %c128_24 = arith.constant 128 : index
    %25 = vector.load %arg5[%c1_23, %c128_24] : memref<2x384xf32, #tpu.memory_space<vmem>>, vector<1x128xf32>
    %c1_25 = arith.constant 1 : index
    %c160_26 = arith.constant 160 : index
    %26 = vector.load %arg5[%c1_25, %c160_26] : memref<2x384xf32, #tpu.memory_space<vmem>>, vector<1x128xf32>
    %c1_27 = arith.constant 1 : index
    %c192_28 = arith.constant 192 : index
    %27 = vector.load %arg5[%c1_27, %c192_28] : memref<2x384xf32, #tpu.memory_space<vmem>>, vector<1x128xf32>
    %c1_29 = arith.constant 1 : index
    %c224_30 = arith.constant 224 : index
    %28 = vector.load %arg5[%c1_29, %c224_30] : memref<2x384xf32, #tpu.memory_space<vmem>>, vector<1x128xf32>
    %29 = tpu.concatenate %13, %14, %15, %16, %17, %18, %19, %20, %21, %22, %23, %24, %25, %26, %27, %28 in 0 : vector<1x128xf32>, vector<1x128xf32>, vector<1x128xf32>, vector<1x128xf32>, vector<1x128xf32>, vector<1x128xf32>, vector<1x128xf32>, vector<1x128xf32>, vector<1x128xf32>, vector<1x128xf32>, vector<1x128xf32>, vector<1x128xf32>, vector<1x128xf32>, vector<1x128xf32>, vector<1x128xf32>, vector<1x128xf32> -> vector<16x128xf32>
    %30 = arith.truncf %29 : vector<16x128xf32> to vector<16x128xbf16>
    %c0_31 = arith.constant 0 : index
    %c0_32 = arith.constant 0 : index
    %c0_33 = arith.constant 0 : index
    %31 = vector.load %arg6[%c0_31, %c0_32, %c0_33] : memref<1x128x128xbf16, #tpu.memory_space<vmem>>, vector<1x128x128xbf16>
    %32 = vector.shape_cast %31 : vector<1x128x128xbf16> to vector<128x128xbf16>
    %cst = arith.constant dense<0.000000e+00> : vector<128x128xf32>
    %33 = tpu.matmul %12, %32, %cst {dimension_numbers = #tpu.dot_dimension_numbers<[1], [0], [0], [1], [0, 0, 1, 1], [], []>} : vector<128x128xbf16>, vector<128x128xbf16>, vector<128x128xf32> -> vector<128x128xf32>
    %34 = arith.addf %11, %33 : vector<128x128xf32>
    %35 = arith.truncf %34 : vector<128x128xf32> to vector<128x128xbf16>
    %cst_34 = arith.constant dense<0.000000e+00> : vector<16x128xf32>
    %36 = tpu.matmul %30, %35, %cst_34 {dimension_numbers = #tpu.dot_dimension_numbers<[1], [0], [0], [1], [0, 0, 1, 1], [], []>} : vector<16x128xbf16>, vector<128x128xbf16>, vector<16x128xf32> -> vector<16x128xf32>
    %cst_35 = arith.constant 0.000000e+00 : f32
    %37 = vector.broadcast %cst_35 : f32 to vector<16x128xf32>
    %38 = arith.maximumf %36, %37 : vector<16x128xf32>
    %c0_36 = arith.constant 0 : index
    %c0_37 = arith.constant 0 : index
    %39 = vector.load %arg7[%c0_36, %c0_37] : memref<16x128xf32, #tpu.memory_space<vmem>>, vector<16x128xf32>
    tpu.vector_store %arg7[%c0_36, %c0_37], %38 {strides = array<i32>} : memref<16x128xf32, #tpu.memory_space<vmem>>, vector<16x128xf32>,
    return
  }
  func.func @transform_0(%arg0: i32) -> (i32, i32) {
    %c0_i32 = arith.constant 0 : i32
    %c0_i32_0 = arith.constant 0 : i32
    %c0_i32_1 = arith.constant 0 : i32
    return %c0_i32, %c0_i32_0 : i32, i32
  }
  func.func @transform_1(%arg0: i32) -> (i32, i32) {
    %c0_i32 = arith.constant 0 : i32
    %c0_i32_0 = arith.constant 0 : i32
    %c0_i32_1 = arith.constant 0 : i32
    return %c0_i32, %c0_i32_0 : i32, i32
  }
  func.func @transform_2(%arg0: i32) -> (i32, i32) {
    %c0_i32 = arith.constant 0 : i32
    %c0_i32_0 = arith.constant 0 : i32
    %c0_i32_1 = arith.constant 0 : i32
    return %c0_i32, %c0_i32_0 : i32, i32
  }
  func.func @transform_3(%arg0: i32) -> (i32, i32) {
    %c0_i32 = arith.constant 0 : i32
    %c0_i32_0 = arith.constant 0 : i32
    %c0_i32_1 = arith.constant 0 : i32
    return %c0_i32, %c0_i32_0 : i32, i32
  }
  func.func @transform_4(%arg0: i32) -> (i32, i32) {
    %c0_i32 = arith.constant 0 : i32
    %c0_i32_0 = arith.constant 0 : i32
    %c0_i32_1 = arith.constant 0 : i32
    return %c0_i32, %c0_i32_0 : i32, i32
  }
  func.func @transform_5(%arg0: i32) -> (i32, i32, i32) {
    %c0_i32 = arith.constant 0 : i32
    %c0_i32_0 = arith.constant 0 : i32
    %c0_i32_1 = arith.constant 0 : i32
    %c0_i32_2 = arith.constant 0 : i32
    return %c0_i32, %c0_i32_0, %c0_i32_1 : i32, i32, i32
  }
  func.func @transform_6(%arg0: i32) -> (i32, i32) {
    %c0_i32 = arith.constant 0 : i32
    %c0_i32_0 = arith.constant 0 : i32
    %c0_i32_1 = arith.constant 0 : i32
    return %c0_i32, %c0_i32_0 : i32, i32
  }
}

</mosaic_0001>

<bundles_post_ra>
// kernel: sinc_analysis_smooth_forward.1
= control target key start
LH: loop header
LB: loop body
LE: loop exit
PB: predicated region body
PF: predicated region fallthrough
CT: control target
= control target key end

     0   :  { %s7716_s0 = inlined_call_operand.vmem [shape: f32[128,128], index: 0, kind: input, shape index: {}]   ;;  %s7717_s1 = inlined_call_operand.vmem [shape: f32[1,128], index: 1, kind: input, shape index: {}]   ;;  %s7718_s2 = inlined_call_operand.vmem [shape: f32[1,128], index: 2, kind: input, shape index: {}]   ;;  %s7719_s3 = inlined_call_operand.vmem [shape: f32[128,128], index: 3, kind: input, shape index: {}]   ;;  %s7720_s4 = inlined_call_operand.vmem [shape: f32[2,384], index: 4, kind: input, shape index: {}]   ;;  %s7721_s5 = inlined_call_operand.vmem [shape: bf16[1,128,128], index: 5, kind: input, shape index: {}]   ;;  %s7722_s6 = inlined_call_operand.hbm [shape: f32[16,128], index: 6, kind: output, shape index: {}]  }
   0x1   :  { %v4289_v0 = vld [vmem:[%s7721_s5] sm:$0xff]   ;;  %v4290_v1 = vld [vmem:[%s7721_s5 + $0x8] sm:$0xff]   ;;  %v4291_v2 = vld [vmem:[%s7721_s5 + $0x10] sm:$0xff]  }
   0x2   :  { %4035 = vmatprep.subr.bf16.mxu0 %v4289_v0  ;;  %v4292_v3 = vld [vmem:[%s7721_s5 + $0x18] sm:$0xff]   ;;  %v25_v4 = vld [vmem:[%s7716_s0] sm:$0xff]  ;;  %v4524_v5 = vld [vmem:[%s7716_s0 + $0x8] sm:$0xff] }
   0x3   :  { %4036 = vmatpush3.bf16.msra.mxu0 %v4289_v0  ;;  %v4529_v6 = vld [vmem:[%s7717_s1] ss:$0 sm:$0xff] }
   0x4   :  { %4037 = vmatprep.subr.bf16.mxu0 %v4290_v1  ;;  %v4532_v7 = vmul.f32 %v4529_v6, %v25_v4  ;;  %v4536_v8 = vmul.f32 %v4529_v6, %v4524_v5  ;;  %v4541_v9 = vld [vmem:[%s7718_s2] ss:$0 sm:$0xff] }
   0x5   :  { %v4546_v12 = vmul.f32 %v4541_v9, %v25_v4  ;;  %v4293_v13 = vld [vmem:[%s7721_s5 + $0x20] sm:$0xff]  }
   0x6   :  { %v64_v10 = vand.u32 2147483647, %v4532_v7  ;;  %v67_v11 = vand.u32 2139095040, %v4532_v7  ;;  %v168_v14 = vand.u32 2147483647, %v4536_v8  ;;  %v171_v15 = vand.u32 2139095040, %v4536_v8 }
   0x7   :  { %4038 = vmatpush3.bf16.msra.mxu0 %v4290_v1 }
   0x8   :  { %4039 = vmatprep.subr.bf16.mxu0 %v4291_v2 }
   0xb   :  { %4040 = vmatpush3.bf16.msra.mxu0 %v4291_v2 }
   0xc   :  { %4041 = vmatprep.subr.bf16.mxu0 %v4292_v3 }
   0xd   :  { %11 = vsyncpa [#allocation3], 0  ;;  %v68_v16 = vshrl.u32 %v67_v11, 23  ;;  %v71_v17 = vand.u32 8388607, %v64_v10  ;;  %v172_v18 = vshrl.u32 %v171_v15, 23 }
   0xe   :  { %v175_v19 = vand.u32 8388607, %v168_v14  ;;  %v1754_v21 = vand.u32 2139095040, %v4546_v12  ;;  %v4294_v22 = vld [vmem:[%s7721_s5 + $0x28] sm:$0xff]   ;;  %v4295_v26 = vld [vmem:[%s7721_s5 + $0x30] sm:$0xff]   ;;  %v4296_v46 = vld [vmem:[%s7721_s5 + $0x38] sm:$0xff]  }
   0xf   :  { %4042 = vmatpush3.bf16.msra.mxu0 %v4292_v3  ;;  %v3871_v20 = vadd.s32 4294967169, %v68_v16  ;;  %v3875_v23 = vadd.s32 4294967169, %v172_v18  ;;  %v72_v27 = vor.u32 8388608, %v71_v17  ;;  %v4457_v40 = vmov 683565275   ;;  %s4463_s22 = smov 64  }
  0x10   :  { %4043 = vmatprep.subr.bf16.mxu0 %v4293_v13  ;;  %v1755_v25 = vshrl.u32 %v1754_v21, 23  ;;  %v176_v28 = vor.u32 8388608, %v175_v19  ;;  %v7733_v42 = vmov 2475754826   ;;  %v7731_v44 = vmov 2131351028  }
  0x11   :  { %v74_v24 = vadd.s32 1, %v3871_v20  ;;  %v178_v29 = vadd.s32 1, %v3875_v23  ;;  %v4564_v35 = vshll.u32 %v72_v27, 8  ;;  %v7727_v47 = vmov 2102212464   ;;  %s4464_s23 = smov 96  }
  0x12   :  { %v3936_v30 = vadd.s32 4294967169, %v1755_v25  ;;  %v4568_v37 = vshll.u32 %v176_v28, 8  ;;  %v4461_v49 = vmov 920167782   ;;  %v4462_v57 = vmov 1326507024  }
  0x13   :  { %4044 = vmatpush3.bf16.msra.mxu0 %v4293_v13  ;;  %vm75_vm0 = vcmp.gt.s32.totalorder %v74_v24, 0  ;;  %vm179_vm1 = vcmp.gt.s32.totalorder %v178_v29, 0  ;;  %s4466_s24 = smov 32  }
  0x14   :  { %4045 = vmatprep.subr.bf16.mxu0 %v4294_v22  ;;  %v76_v31 = vsel %vm75_vm0, %v74_v24, 0  ;;  %v180_v34 = vsel %vm179_vm1, %v178_v29, 0  ;;  %v4570_v38 = vadd.s32 1, %v3936_v30 }
  0x15   :  { %v77_v32 = vshrl.u32 %v76_v31, 5  ;;  %v78_v33 = vand.u32 31, %v76_v31  ;;  %v4566_v36 = vand.u32 31, %v180_v34  ;;  %v4580_v51 = vshrl.u32 %v180_v34, 5 }
  0x16   :  { %vm1762_vm11 = vcmp.gt.s32.totalorder %v4570_v38, 0 }
  0x17   :  { %4046 = vmatpush3.bf16.msra.mxu0 %v4294_v22  ;;  %v79_v39 = vsub.s32 32, %v78_v33  ;;  %v81_v41 = vshll.u32 %v4457_v40, %v78_v33  ;;  %v84_v43 = vshll.u32 %v7733_v42, %v78_v33  ;;  %v87_v45 = vshll.u32 %v7731_v44, %v78_v33 }
  0x18   :  { %4047 = vmatprep.subr.bf16.mxu0 %v4295_v26  ;;  %v90_v48 = vshll.u32 %v7727_v47, %v78_v33  ;;  %v93_v50 = vshll.u32 %v4461_v49, %v78_v33  ;;  %vm96_vm2 = vcmp.lt.s32.totalorder %v77_v32, 1  ;;  %vm97_vm3 = vcmp.lt.s32.totalorder %v77_v32, 2 }
  0x19   :  { %v80_v52 = vshrl.u32 %v4457_v40, %v79_v39  ;;  %v82_v53 = vshrl.u32 %v7733_v42, %v79_v39  ;;  %v85_v54 = vshrl.u32 %v7731_v44, %v79_v39  ;;  %v88_v55 = vshrl.u32 %v7727_v47, %v79_v39 }
  0x1a   :  { %v91_v56 = vshrl.u32 %v4461_v49, %v79_v39  ;;  %v94_v58 = vshrl.u32 %v4462_v57, %v79_v39  ;;  %vm99_vm4 = vcmp.lt.s32.totalorder %v77_v32, 4  ;;  %v183_v62 = vsub.s32 32, %v4566_v36 }
  0x1b   :  { %4048 = vmatpush3.bf16.msra.mxu0 %v4295_v26  ;;  %v83_v59 = vor.u32 %v82_v53, %v81_v41  ;;  %v86_v60 = vor.u32 %v85_v54, %v84_v43  ;;  %v89_v61 = vor.u32 %v88_v55, %v87_v45  ;;  %vm98_vm5 = vcmp.lt.s32.totalorder %v77_v32, 3 }
  0x1c   :  { %4049 = vmatprep.subr.bf16.mxu0 %v4296_v46  ;;  %v92_v63 = vor.u32 %v91_v56, %v90_v48  ;;  %v95_v0 = vor.u32 %v94_v58, %v93_v50  ;;  %v185_v1 = vshll.u32 %v4457_v40, %v4566_v36  ;;  %v188_v17 = vshll.u32 %v7733_v42, %v4566_v36 }
  0x1d   :  { %v100_v2 = vsel %vm96_vm2, %v80_v52, %v83_v59  ;;  %v101_v3 = vsel %vm99_vm4, %v89_v61, 2102212464  ;;  %v104_v4 = vsel %vm96_vm2, %v83_v59, %v86_v60  ;;  %v108_v11 = vsel %vm96_vm2, %v86_v60, %v89_v61 }
  0x1e   :  { %v102_v13 = vsel %vm98_vm5, %v86_v60, %v101_v3  ;;  %v105_v15 = vsel %vm99_vm4, %v92_v63, 920167782  ;;  %v109_v16 = vsel %vm99_vm4, %v95_v0, 1326507024  ;;  %v184_v20 = vshrl.u32 %v4457_v40, %v183_v62 }
  0x1f   :  { %4050 = vmatpush3.bf16.msra.mxu0 %v4296_v46  ;;  %v106_v18 = vsel %vm98_vm5, %v89_v61, %v105_v15  ;;  %v110_v19 = vsel %vm98_vm5, %v92_v63, %v109_v16  ;;  %v186_v21 = vshrl.u32 %v7733_v42, %v183_v62  ;;  %v103_v22 = vsel %vm97_vm3, %v100_v2, %v102_v13 }
  0x20   :  { %v107_v23 = vsel %vm97_vm3, %v104_v4, %v106_v18  ;;  %v111_v24 = vsel %vm97_vm3, %v108_v11, %v110_v19  ;;  %v189_v25 = vshrl.u32 %v7731_v44, %v183_v62  ;;  %v191_v33 = vshll.u32 %v7731_v44, %v4566_v36 }
  0x21   :  { %v4606_v26 = vmul.u32.u64.low %v4564_v35, %v111_v24  ;;  %v4607_v27 = vmul.u32.u64.high %v4564_v35, %v111_v24, %v4606_v26  ;;  %v4610_v28 = vmul.u32.u64.low %v4564_v35, %v107_v23  ;;  %v4611_v29 = vmul.u32.u64.high %v4564_v35, %v107_v23, %v4610_v28 }
  0x22   :  { %v187_v30 = vor.u32 %v186_v21, %v185_v1  ;;  %v190_v31 = vor.u32 %v189_v25, %v188_v17  ;;  %v192_v34 = vshrl.u32 %v7727_v47, %v183_v62  ;;  %v194_v32 = vshll.u32 %v7727_v47, %v4566_v36 }
  0x23   :  { %v195_v39 = vshrl.u32 %v4461_v49, %v183_v62  ;;  %v197_v41 = vshll.u32 %v4461_v49, %v4566_v36  ;;  %v198_v43 = vshrl.u32 %v4462_v57, %v183_v62  ;;  %v119_v45 = vmul.u32 %v4564_v35, %v103_v22 }
  0x24   :  { %v193_v46 = vor.u32 %v192_v34, %v191_v33  ;;  %vm200_vm6 = vcmp.lt.s32.totalorder %v4580_v51, 1  ;;  %vm201_vm7 = vcmp.lt.s32.totalorder %v4580_v51, 2  ;;  %vm121_vm8 = vc.u32 %v4607_v27, %v4610_v28 }
  0x25   :  { %v122_v48 = vadd.s32 1, %v4611_v29  ;;  %v196_v50 = vor.u32 %v195_v39, %v194_v32  ;;  %vm202_vm9 = vcmp.lt.s32.totalorder %v4580_v51, 3  ;;  %v199_v52 = vor.u32 %v198_v43, %v197_v41 }
  0x26   :  { %vm203_vm10 = vcmp.lt.s32.totalorder %v4580_v51, 4  ;;  %v204_v36 = vsel %vm200_vm6, %v184_v20, %v187_v30  ;;  %v208_v53 = vsel %vm200_vm6, %v187_v30, %v190_v31  ;;  %v212_v56 = vsel %vm200_vm6, %v190_v31, %v193_v46 }
  0x27   :  { %v123_v35 = vsel %vm121_vm8, %v122_v48, %v4611_v29  ;;  %v205_v54 = vsel %vm203_vm10, %v193_v46, 2102212464  ;;  %v209_v55 = vsel %vm203_vm10, %v196_v50, 920167782  ;;  %v213_v61 = vsel %vm203_vm10, %v199_v52, 1326507024 }
  0x28   :  { %v124_v58 = vadd.s32 %v123_v35, %v119_v45  ;;  %v206_v59 = vsel %vm202_vm9, %v190_v31, %v205_v54  ;;  %v210_v60 = vsel %vm202_vm9, %v193_v46, %v209_v55  ;;  %v214_v0 = vsel %vm202_vm9, %v196_v50, %v213_v61 }
  0x29   :  { %v207_v62 = vsel %vm201_vm7, %v204_v36, %v206_v59  ;;  %v211_v63 = vsel %vm201_vm7, %v208_v53, %v210_v60  ;;  %v215_v2 = vsel %vm201_vm7, %v212_v56, %v214_v0  ;;  %v1763_v15 = vsel %vm1762_vm11, %v4570_v38, 0 }
  0x2a   :  { %v125_v1 = vadd.s32 536870912, %v124_v58  ;;  %v4640_v3 = vmul.u32.u64.low %v4568_v37, %v211_v63  ;;  %v4641_v4 = vmul.u32.u64.high %v4568_v37, %v211_v63, %v4640_v3  ;;  %v1765_v17 = vand.u32 31, %v1763_v15 }
  0x2b   :  { %v4645_v11 = vmul.u32.u64.low %v4568_v37, %v215_v2  ;;  %v4646_v13 = vmul.u32.u64.high %v4568_v37, %v215_v2, %v4645_v11  ;;  %v223_v18 = vmul.u32 %v4568_v37, %v207_v62  ;;  %v1751_v19 = vand.u32 2147483647, %v4546_v12 }
  0x2c   :  { %v4649_v16 = vshrl.u32 %v125_v1, 30  ;;  %v226_v20 = vadd.s32 1, %v4641_v4  ;;  %v1766_v21 = vsub.s32 32, %v1765_v17  ;;  %v4662_v24 = vmul.f32 %v4541_v9, %v4524_v5 }
  0x2d   :  { %vm225_vm12 = vc.u32 %v4646_v13, %v4640_v3  ;;  %v1758_v37 = vand.u32 8388607, %v1751_v19  ;;  %v1764_v26 = vshrl.u32 %v1763_v15, 5  ;;  %v1768_v29 = vshll.u32 %v4457_v40, %v1765_v17 }
  0x2e   :  { %v127_v51 = vshll.u32 %v4649_v16, 30  ;;  %v227_v23 = vsel %vm225_vm12, %v226_v20, %v4641_v4  ;;  %v1771_v30 = vshll.u32 %v7733_v42, %v1765_v17  ;;  %v1769_v33 = vshrl.u32 %v7733_v42, %v1766_v21 }
  0x2f   :  { %v228_v38 = vadd.s32 %v227_v23, %v223_v18  ;;  %v1772_v34 = vshrl.u32 %v7731_v44, %v1766_v21  ;;  %v1774_v32 = vshll.u32 %v7731_v44, %v1765_v17  ;;  %v1775_v39 = vshrl.u32 %v7727_v47, %v1766_v21 }
  0x30   :  { %v4657_v22 = vsub.s32 %v124_v58, %v127_v51  ;;  %v1777_v41 = vshll.u32 %v7727_v47, %v1765_v17  ;;  %v1778_v43 = vshrl.u32 %v4461_v49, %v1766_v21  ;;  %v1858_v46 = vand.u32 2139095040, %v4662_v24 }
  0x31   :  { %v229_v31 = vadd.s32 536870912, %v228_v38  ;;  %v1780_v50 = vshll.u32 %v4461_v49, %v1765_v17  ;;  %v1781_v52 = vshrl.u32 %v4462_v57, %v1766_v21  ;;  %v1759_v53 = vor.u32 8388608, %v1758_v37 }
  0x32   :  { %v130_v25 = vsub.s32 0, %v4657_v22  ;;  %v1770_v35 = vor.u32 %v1769_v33, %v1768_v29  ;;  %v1773_v54 = vor.u32 %v1772_v34, %v1771_v30  ;;  %v1776_v56 = vor.u32 %v1775_v39, %v1774_v32 }
  0x33   :  { %v4676_v45 = vshrl.u32 %v229_v31, 30  ;;  %v1779_v58 = vor.u32 %v1778_v43, %v1777_v41  ;;  %vm1783_vm13 = vcmp.lt.s32.totalorder %v1764_v26, 1  ;;  %v1767_v60 = vshrl.u32 %v4457_v40, %v1766_v21 }
  0x34   :  { %v3872_v5 = vmin.u32 %v130_v25, %v4657_v22  ;;  %vm1786_vm14 = vcmp.lt.s32.totalorder %v1764_v26, 4  ;;  %v1859_v61 = vshrl.u32 %v1858_v46, 23  ;;  %v1782_v62 = vor.u32 %v1781_v52, %v1780_v50 }
  0x35   :  { %v231_v36 = vshll.u32 %v4676_v45, 30  ;;  %vm1785_vm0 = vcmp.lt.s32.totalorder %v1764_v26, 3  ;;  %v1788_v63 = vsel %vm1786_vm14, %v1776_v56, 2102212464  ;;  %vm1784_vm1 = vcmp.lt.s32.totalorder %v1764_v26, 2 }
  0x36   :  { %v132_v48 = vclz %v3872_v5  ;;  %v1791_v2 = vsel %vm1783_vm13, %v1770_v35, %v1773_v54  ;;  %v1792_v11 = vsel %vm1786_vm14, %v1779_v58, 920167782  ;;  %v1799_v15 = vshll.u32 %v1759_v53, 8 }
  0x37   :  { %v4682_v59 = vsub.s32 %v228_v38, %v231_v36  ;;  %v1787_v18 = vsel %vm1783_vm13, %v1767_v60, %v1770_v35  ;;  %v1789_v51 = vsel %vm1785_vm0, %v1773_v54, %v1788_v63  ;;  %v1793_v20 = vsel %vm1785_vm0, %v1776_v56, %v1792_v11 }
  0x38   :  { %v3873_v55 = vadd.s32 4294967294, %v132_v48  ;;  %v1794_v21 = vsel %vm1784_vm1, %v1791_v2, %v1793_v20  ;;  %v1795_v23 = vsel %vm1783_vm13, %v1773_v54, %v1776_v56  ;;  %v1796_v38 = vsel %vm1786_vm14, %v1782_v62, 1326507024 }
  0x39   :  { %v234_v1 = vsub.s32 0, %v4682_v59  ;;  %v120_v37 = vadd.s32 %v4610_v28, %v4607_v27  ;;  %v3940_v29 = vadd.s32 4294967169, %v1859_v61  ;;  %v1790_v33 = vsel %vm1784_vm1, %v1787_v18, %v1789_v51 }
  0x3a   :  { %vm3874_vm15 = vcmp.lt.s32.totalorder %v3873_v55, 0  ;;  %v1797_v34 = vsel %vm1785_vm0, %v1779_v58, %v1796_v38  ;;  %v4701_v39 = vmul.u32.u64.low %v1799_v15, %v1794_v21  ;;  %v4702_v41 = vmul.u32.u64.high %v1799_v15, %v1794_v21, %v4701_v39 }
  0x3b   :  { %v135_v0 = vsel %vm3874_vm15, 0, %v3873_v55  ;;  %v3876_v17 = vmin.u32 %v234_v1, %v4682_v59  ;;  %v1798_v5 = vsel %vm1784_vm1, %v1795_v23, %v1797_v34  ;;  %v1865_v28 = vadd.s32 1, %v3940_v29 }
  0x3c   :  { %v140_v4 = vsub.s32 4294967266, %v135_v0  ;;  %v136_v30 = vsub.s32 32, %v135_v0  ;;  %v4705_v43 = vmul.u32.u64.low %v1799_v15, %v1798_v5  ;;  %v4706_v46 = vmul.u32.u64.high %v1799_v15, %v1798_v5, %v4705_v43 }
  0x3d   :  { %v236_v25 = vclz %v3876_v17  ;;  %v137_v27 = vshll.u32 %v4657_v22, %v135_v0  ;;  %v1806_v36 = vmul.u32 %v1799_v15, %v1790_v33  ;;  %v224_v53 = vadd.s32 %v4640_v3, %v4646_v13  ;;  %v4719_v3 = vld [vmem:[%s7716_s0 + $0x10] sm:$0xff] }
  0x3e   :  { %v141_v31 = vadd.s32 127, %v140_v4  ;;  %v138_v48 = vshrl.u32 %v120_v37, %v136_v30  ;;  %v1809_v54 = vadd.s32 1, %v4702_v41  ;;  %vm1808_vm3 = vc.u32 %v4706_v46, %v4701_v39 }
  0x3f   :  { %v3877_v32 = vadd.s32 4294967294, %v236_v25  ;;  %vm1866_vm4 = vcmp.gt.s32.totalorder %v1865_v28, 0  ;;  %v1855_v56 = vand.u32 2147483647, %v4662_v24  ;;  %vm66_vm5 = vcmp.lt.s32.totalorder %v4532_v7, 0 }
  0x40   :  { %v142_v50 = vshll.u32 %v141_v31, 23  ;;  %v1810_v22 = vsel %vm1808_vm3, %v1809_v54, %v4702_v41  ;;  %v1867_v58 = vsel %vm1866_vm4, %v1865_v28, 0  ;;  %v139_v60 = vor.u32 %v138_v48, %v137_v27 }
  0x41   :  { %vm3878_vm2 = vcmp.lt.s32.totalorder %v3877_v32, 0  ;;  %v1811_v62 = vadd.s32 %v1810_v22, %v1806_v36  ;;  %v1869_v63 = vand.u32 31, %v1867_v58  ;;  %v1862_v11 = vand.u32 8388607, %v1855_v56 }
  0x42   :  { %v239_v52 = vsel %vm3878_vm2, 0, %v3877_v32  ;;  %v143_v61 = vor.u32 4788187, %v142_v50  ;;  %v4727_v15 = vmul.f32 %v4529_v6, %v4719_v3  ;;  %v146_v18 = vcvt.s32.f32 %v139_v60 }
  0x43   :  { %v240_v26 = vsub.s32 32, %v239_v52  ;;  %v244_v35 = vsub.s32 4294967266, %v239_v52  ;;  %v241_v13 = vshll.u32 %v4682_v59, %v239_v52  ;;  %v1812_v2 = vadd.s32 536870912, %v1811_v62 }
  0x44   :  { %v1870_v4 = vsub.s32 32, %v1869_v63  ;;  %v144_v17 = vand.u32 2147483647, %v143_v61  ;;  %v150_v51 = vsub.s32 4, %v4649_v16  ;;  %v4732_v23 = vshrl.u32 %v1867_v58, 5 }
  0x45   :  { %v245_v55 = vadd.s32 127, %v244_v35  ;;  %v242_v0 = vshrl.u32 %v224_v53, %v240_v26  ;;  %v4730_v20 = vshrl.u32 %v1812_v2, 30  ;;  %v1872_v38 = vshll.u32 %v4457_v40, %v1869_v63 }
  0x46   :  { %v1873_v25 = vshrl.u32 %v7733_v42, %v1870_v4  ;;  %v1875_v29 = vshll.u32 %v7733_v42, %v1869_v63  ;;  %v1876_v30 = vshrl.u32 %v7731_v44, %v1870_v4  ;;  %vm170_vm6 = vcmp.lt.s32.totalorder %v4536_v8, 0 }
  0x47   :  { %v246_v1 = vshll.u32 %v245_v55, 23  ;;  %v243_v59 = vor.u32 %v242_v0, %v241_v13  ;;  %v1814_v37 = vshll.u32 %v4730_v20, 30  ;;  %v1878_v31 = vshll.u32 %v7731_v44, %v1869_v63 }
  0x48   :  { %v1879_v33 = vshrl.u32 %v7727_v47, %v1870_v4  ;;  %v1881_v34 = vshll.u32 %v7727_v47, %v1869_v63  ;;  %v1882_v32 = vshrl.u32 %v4461_v49, %v1870_v4  ;;  %vm4746_vm7 = vcmp.le.f32.partialorder %v64_v10, 0.7853982 }
  0x49   :  { %v247_v21 = vor.u32 4788187, %v246_v1  ;;  %v151_v41 = vsel %vm66_vm5, %v150_v51, %v4649_v16  ;;  %v4753_v43 = vsub.s32 %v1811_v62, %v1814_v37  ;;  %v1863_v27 = vor.u32 8388608, %v1862_v11 }
  0x4a   :  { %v1883_v28 = vor.u32 %v1882_v32, %v1881_v34  ;;  %v1884_v48 = vshll.u32 %v4461_v49, %v1869_v63  ;;  %v1885_v50 = vshrl.u32 %v4462_v57, %v1870_v4  ;;  %v275_v52 = vand.u32 2139095040, %v4727_v15 }
  0x4b   :  { %v147_v36 = vmul.f32 %v146_v18, %v144_v17  ;;  %v248_v53 = vand.u32 2147483647, %v247_v21  ;;  %v250_v10 = vcvt.s32.f32 %v243_v59  ;;  %v1817_v26 = vsub.s32 0, %v4753_v43 }
  0x4c   :  { %v1874_v35 = vor.u32 %v1873_v25, %v1872_v38  ;;  %v1877_v54 = vor.u32 %v1876_v30, %v1875_v29  ;;  %v1880_v55 = vor.u32 %v1879_v33, %v1878_v31  ;;  %vm1890_vm8 = vcmp.lt.s32.totalorder %v4732_v23, 4 }
  0x4d   :  { %v254_v16 = vsub.s32 4, %v4676_v45  ;;  %v3937_v22 = vmin.u32 %v1817_v26, %v4753_v43  ;;  %vm1887_vm9 = vcmp.lt.s32.totalorder %v4732_v23, 1  ;;  %vm1889_vm10 = vcmp.lt.s32.totalorder %v4732_v23, 3 }
  0x4e   :  { %v153_v58 = vsel %vm4746_vm7, 0, %v151_v41  ;;  %v1871_v60 = vshrl.u32 %v4457_v40, %v1870_v4  ;;  %v1886_v61 = vor.u32 %v1885_v50, %v1884_v48  ;;  %v1896_v62 = vsel %vm1890_vm8, %v1883_v28, 920167782 }
  0x4f   :  { %v148_v63 = vxor.u32 2147483648, %v147_v36  ;;  %v1819_v13 = vclz %v3937_v22  ;;  %v1892_v0 = vsel %vm1890_vm8, %v1880_v55, 2102212464  ;;  %v276_v1 = vshrl.u32 %v275_v52, 23 }
  0x50   :  { %v251_v2 = vmul.f32 %v250_v10, %v248_v53  ;;  %vm1888_vm11 = vcmp.lt.s32.totalorder %v4732_v23, 2  ;;  %v1895_v11 = vsel %vm1887_vm9, %v1874_v35, %v1877_v54  ;;  %v1897_v17 = vsel %vm1889_vm10, %v1880_v55, %v1896_v62 }
  0x51   :  { %v255_v4 = vsel %vm170_vm6, %v254_v16, %v4676_v45  ;;  %v1807_v18 = vadd.s32 %v4701_v39, %v4706_v46  ;;  %v3938_v51 = vadd.s32 4294967294, %v1819_v13  ;;  %v1903_v59 = vshll.u32 %v1863_v27, 8 }
  0x52   :  { %v1891_v21 = vsel %vm1887_vm9, %v1871_v60, %v1874_v35  ;;  %v1893_v38 = vsel %vm1889_vm10, %v1877_v54, %v1892_v0  ;;  %v1899_v37 = vsel %vm1887_vm9, %v1877_v54, %v1880_v55  ;;  %v1900_v25 = vsel %vm1890_vm8, %v1886_v61, 1326507024 }
  0x53   :  { %vm3939_vm12 = vcmp.lt.s32.totalorder %v3938_v51, 0  ;;  %v1898_v45 = vsel %vm1888_vm11, %v1895_v11, %v1897_v17  ;;  %v1901_v39 = vsel %vm1889_vm10, %v1883_v28, %v1900_v25  ;;  %v3879_v46 = vadd.s32 4294967169, %v276_v1  ;;  %v4803_v28 = vld [vmem:[%s7716_s0 + $0x18] sm:$0xff] }
  0x54   :  { %v149_v29 = vsel %vm66_vm5, %v148_v63, %v147_v36  ;;  %v252_v30 = vxor.u32 2147483648, %v251_v2  ;;  %v1822_v31 = vsel %vm3939_vm12, 0, %v3938_v51  ;;  %v1902_v33 = vsel %vm1888_vm11, %v1899_v37, %v1901_v39 }
  0x55   :  { %v1823_v34 = vsub.s32 32, %v1822_v31  ;;  %v1824_v32 = vshll.u32 %v4753_v43, %v1822_v31  ;;  %v1827_v41 = vsub.s32 4294967266, %v1822_v31  ;;  %v1894_v27 = vsel %vm1888_vm11, %v1891_v21, %v1893_v38 }
  0x56   :  { %v4805_v48 = vmul.u32.u64.low %v1903_v59, %v1902_v33  ;;  %v4806_v50 = vmul.u32.u64.high %v1903_v59, %v1902_v33, %v4805_v48  ;;  %v4808_v52 = vmul.u32.u64.low %v1903_v59, %v1898_v45  ;;  %v4809_v36 = vmul.u32.u64.high %v1903_v59, %v1898_v45, %v4808_v52 }
  0x57   :  { %vm4814_vm13 = vcmp.le.f32.partialorder %v168_v14, 0.7853982  ;;  %v1825_v23 = vshrl.u32 %v1807_v18, %v1823_v34  ;;  %v1828_v53 = vadd.s32 127, %v1827_v41  ;;  %v282_v10 = vadd.s32 1, %v3879_v46 }
  0x58   :  { %v152_v26 = vsel %vm4746_vm7, %v4532_v7, %v149_v29  ;;  %v157_v35 = vadd.s32 3, %v153_v58  ;;  %v257_v54 = vsel %vm4814_vm13, 0, %v255_v4  ;;  %v4825_v55 = vmul.f32 %v4529_v6, %v4803_v28 }
  0x59   :  { %vm1753_vm14 = vcmp.lt.s32.totalorder %v4546_v12, 0  ;;  %v1826_v14 = vor.u32 %v1825_v23, %v1824_v32  ;;  %v1829_v16 = vshll.u32 %v1828_v53, 23  ;;  %v1910_v22 = vmul.u32 %v1903_v59, %v1894_v27 }
  0x5a   :  { %vm283_vm15 = vcmp.gt.s32.totalorder %v282_v10, 0  ;;  %v253_v60 = vsel %vm170_vm6, %v252_v30, %v251_v2  ;;  %vm1912_vm0 = vc.u32 %v4806_v50, %v4808_v52  ;;  %v1913_v5 = vadd.s32 1, %v4809_v36 }
  0x5b   :  { %v272_v58 = vand.u32 2147483647, %v4727_v15  ;;  %4297 = vcosq.f32 %v152_v26  ;;  %v1830_v61 = vor.u32 4788187, %v1829_v16  ;;  %v1833_v6 = vcvt.s32.f32 %v1826_v14 }
  0x5c   :  { %v284_v62 = vsel %vm283_vm15, %v282_v10, 0  ;;  %4299 = vsinq.f32 %v152_v26  ;;  %v261_v63 = vadd.s32 3, %v257_v54  ;;  %v1914_v13 = vsel %vm1912_vm0, %v1913_v5, %v4809_v36 }
  0x5d   :  { %v286_v0 = vand.u32 31, %v284_v62  ;;  %v256_v1 = vsel %vm4814_vm13, %v4536_v8, %v253_v60  ;;  %vm4840_vm1 = vcmp.le.f32.partialorder %v1751_v19, 0.7853982  ;;  %v1831_v11 = vand.u32 2147483647, %v1830_v61 }
  0x5e   :  { %v1837_v17 = vsub.s32 4, %v4730_v20  ;;  %v1915_v4 = vadd.s32 %v1914_v13, %v1910_v22  ;;  %v279_v18 = vand.u32 8388607, %v272_v58  ;;  %v4847_v51 = vshrl.u32 %v284_v62, 5 }
  0x5f   :  { %v287_v59 = vsub.s32 32, %v286_v0  ;;  %v289_v21 = vshll.u32 %v4457_v40, %v286_v0  ;;  %v1834_v38 = vmul.f32 %v1833_v6, %v1831_v11  ;;  %v292_v25 = vshll.u32 %v7733_v42, %v286_v0 }
  0x60   :  { %v1916_v37 = vadd.s32 536870912, %v1915_v4  ;;  %v295_v19 = vshll.u32 %v7731_v44, %v286_v0  ;;  %v298_v29 = vshll.u32 %v7727_v47, %v286_v0  ;;  %v301_v34 = vshll.u32 %v4461_v49, %v286_v0 }
  0x61   :  { %v290_v45 = vshrl.u32 %v7733_v42, %v287_v59  ;;  %v293_v39 = vshrl.u32 %v7731_v44, %v287_v59  ;;  %v296_v46 = vshrl.u32 %v7727_v47, %v287_v59  ;;  %v1835_v30 = vxor.u32 2147483648, %v1834_v38 }
  0x62   :  { %v4856_v31 = vshrl.u32 %v1916_v37, 30  ;;  %v299_v33 = vshrl.u32 %v4461_v49, %v287_v59  ;;  %v4860_v32 = vand.u32 3, %v157_v35  ;;  %v4862_v41 = vand.u32 3, %v261_v63 }
  0x63   :  { %v1838_v27 = vsel %vm1753_vm14, %v1837_v17, %v4730_v20  ;;  %v302_v48 = vshrl.u32 %v4462_v57, %v287_v59  ;;  %4301 = vcosq.f32 %v256_v1  ;;  %v291_v43 = vor.u32 %v290_v45, %v289_v21 }
  0x64   :  { %v1918_v36 = vshll.u32 %v4856_v31, 30  ;;  %v294_v23 = vor.u32 %v293_v39, %v292_v25  ;;  %v280_v53 = vor.u32 8388608, %v279_v18  ;;  %v300_v10 = vor.u32 %v299_v33, %v298_v29 }
  0x65   :  { %v303_v26 = vor.u32 %v302_v48, %v301_v34  ;;  %vm304_vm2 = vcmp.lt.s32.totalorder %v4847_v51, 1  ;;  %v4298_v35 = vpop.eup %4297  ;;  %4303 = vsinq.f32 %v256_v1  ;;  %v1836_v54 = vsel %vm1753_vm14, %v1835_v30, %v1834_v38 }
  0x66   :  { %v4872_v14 = vsub.s32 %v1915_v4, %v1918_v36  ;;  %v297_v20 = vor.u32 %v296_v46, %v295_v19  ;;  %v4300_v16 = vpop.eup %4299  ;;  %v288_v22 = vshrl.u32 %v4457_v40, %v287_v59  ;;  %vm306_vm3 = vcmp.lt.s32.totalorder %v4847_v51, 3 }
  0x67   :  { %vm307_vm4 = vcmp.lt.s32.totalorder %v4847_v51, 4  ;;  %v379_v60 = vand.u32 2139095040, %v4825_v55  ;;  %vm160_vm5 = vcmp.eq.s32.totalorder %v4860_v32, 0  ;;  %vm305_vm6 = vcmp.lt.s32.totalorder %v4847_v51, 2 }
  0x68   :  { %v1921_v5 = vsub.s32 0, %v4872_v14  ;;  %v309_v61 = vsel %vm307_vm4, %v297_v20, 2102212464  ;;  %v312_v6 = vsel %vm304_vm2, %v291_v43, %v294_v23  ;;  %v1839_v62 = vsel %vm4840_vm1, %v4546_v12, %v1836_v54 }
  0x69   :  { %v313_v63 = vsel %vm307_vm4, %v300_v10, 920167782  ;;  %v317_v13 = vsel %vm307_vm4, %v303_v26, 1326507024  ;;  %v320_v0 = vshll.u32 %v280_v53, 8  ;;  %vm163_vm7 = vcmp.eq.s32.totalorder %v4860_v32, 2 }
  0x6a   :  { %v3941_v1 = vmin.u32 %v1921_v5, %v4872_v14  ;;  %v314_v11 = vsel %vm306_vm3, %v297_v20, %v313_v63  ;;  %v316_v17 = vsel %vm304_vm2, %v294_v23, %v297_v20  ;;  %v308_v4 = vsel %vm304_vm2, %v288_v22, %v291_v43 }
  0x6b   :  { %v310_v18 = vsel %vm306_vm3, %v294_v23, %v309_v61  ;;  %v315_v59 = vsel %vm305_vm6, %v312_v6, %v314_v11  ;;  %v318_v21 = vsel %vm306_vm3, %v300_v10, %v317_v13  ;;  %vm159_vm8 = vcmp.lt.s32.totalorder %v4860_v32, 2 }
  0x6c   :  { %v164_v38 = vxor.u32 2147483648, %v4298_v35  ;;  %vm267_vm9 = vcmp.eq.s32.totalorder %v4862_v41, 2  ;;  %v1840_v37 = vsel %vm4840_vm1, 0, %v1838_v27  ;;  %4305 = vcosq.f32 %v1839_v62 }
  0x6d   :  { %vm1857_vm10 = vcmp.lt.s32.totalorder %v4662_v24, 0  ;;  %v1923_v25 = vclz %v3941_v1  ;;  %vm264_vm11 = vcmp.eq.s32.totalorder %v4862_v41, 0  ;;  %v319_v19 = vsel %vm305_vm6, %v316_v17, %v318_v21  ;;  %v4302_v29 = vpop.eup %4301 }
  0x6e   :  { %v4908_v45 = vmul.u32.u64.low %v320_v0, %v315_v59  ;;  %v4909_v39 = vmul.u32.u64.high %v320_v0, %v315_v59, %v4908_v45  ;;  %v380_v46 = vshrl.u32 %v379_v60, 23  ;;  %v311_v2 = vsel %vm305_vm6, %v308_v4, %v310_v18 }
  0x6f   :  { %v3942_v30 = vadd.s32 4294967294, %v1923_v25  ;;  %v4914_v33 = vmul.u32.u64.low %v320_v0, %v319_v19  ;;  %v4915_v34 = vmul.u32.u64.high %v320_v0, %v319_v19, %v4914_v33  ;;  %v161_v27 = vxor.u32 2147483648, %v4300_v16  ;;  %v4304_v23 = vpop.eup %4303 }
  0x70   :  { %v1844_v48 = vadd.s32 3, %v1840_v37  ;;  %v376_v36 = vand.u32 2147483647, %v4825_v55  ;;  %v3883_v43 = vadd.s32 4294967169, %v380_v46  ;;  %4307 = vsinq.f32 %v1839_v62 }
  0x71   :  { %v1911_v53 = vadd.s32 %v4808_v52, %v4806_v50  ;;  %vm3943_vm12 = vcmp.lt.s32.totalorder %v3942_v30, 0  ;;  %v1941_v10 = vsub.s32 4, %v4856_v31  ;;  %v327_v54 = vmul.u32 %v320_v0, %v311_v2 }
  0x72   :  { %v1926_v26 = vsel %vm3943_vm12, 0, %v3942_v30  ;;  %v330_v51 = vadd.s32 1, %v4909_v39  ;;  %v386_v20 = vadd.s32 1, %v3883_v43  ;;  %v165_v22 = vsel %vm163_vm7, %v164_v38, %v4300_v16 }
  0x73   :  { %v1927_v60 = vsub.s32 32, %v1926_v26  ;;  %v1928_v5 = vshll.u32 %v4872_v14, %v1926_v26  ;;  %v1931_v61 = vsub.s32 4294967266, %v1926_v26  ;;  %v162_v6 = vsel %vm160_vm5, %v4298_v35, %v161_v27 }
  0x74   :  { %v268_v62 = vxor.u32 2147483648, %v4302_v29  ;;  %vm329_vm13 = vc.u32 %v4915_v34, %v4908_v45  ;;  %vm387_vm14 = vcmp.gt.s32.totalorder %v386_v20, 0  ;;  %v265_v50 = vxor.u32 2147483648, %v4304_v23 }
  0x75   :  { %v1929_v52 = vshrl.u32 %v1911_v53, %v1927_v60  ;;  %v1932_v63 = vadd.s32 127, %v1931_v61  ;;  %v331_v13 = vsel %vm329_vm13, %v330_v51, %v4909_v39  ;;  %v4933_v16 = vsel %vm1857_vm10, %v1941_v10, %v4856_v31 }
  0x76   :  { %v332_v14 = vadd.s32 %v331_v13, %v327_v54  ;;  %v383_v0 = vand.u32 8388607, %v376_v36  ;;  %v388_v35 = vsel %vm387_vm14, %v386_v20, 0  ;;  %v4937_v1 = vpop.eup %4305  ;;  %v4939_v11 = vand.u32 3, %v1844_v48 }
  0x77   :  { %vm4943_vm15 = vcmp.le.f32.partialorder %v1855_v56, 0.7853982  ;;  %v1930_v4 = vor.u32 %v1929_v52, %v1928_v5  ;;  %v1933_v18 = vshll.u32 %v1932_v63, 23  ;;  %v4949_v31 = vsel %vm159_vm8, %v162_v6, %v165_v22 }
  0x78   :  { %v4953_v59 = vsel %vm267_vm9, %v268_v62, %v4304_v23  ;;  %v333_v21 = vadd.s32 536870912, %v332_v14  ;;  %v390_v38 = vand.u32 31, %v388_v35  ;;  %v4957_v37 = vsel %vm264_vm11, %v4302_v29, %v265_v50 }
  0x79   :  { %v1934_v56 = vor.u32 4788187, %v1933_v18  ;;  %v1937_v25 = vcvt.s32.f32 %v1930_v4  ;;  %v1944_v19 = vsel %vm4943_vm15, 0, %v4933_v16  ;;  %v1851_v32 = vxor.u32 2147483648, %v4937_v1 }
  0x7a   :  { %v4963_v39 = vshrl.u32 %v333_v21, 30  ;;  %v384_v46 = vor.u32 8388608, %v383_v0  ;;  %v391_v30 = vsub.s32 32, %v390_v38  ;;  %v4308_v2 = vpop.eup %4307  ;;  %vm1850_vm0 = vcmp.eq.s32.totalorder %v4939_v11, 2 }
  0x7b   :  { %v1935_v33 = vand.u32 2147483647, %v1934_v56  ;;  %v389_v27 = vshrl.u32 %v388_v35, 5  ;;  %v393_v29 = vshll.u32 %v4457_v40, %v390_v38  ;;  %v396_v48 = vshll.u32 %v7733_v42, %v390_v38 }
  0x7c   :  { %vm1847_vm1 = vcmp.eq.s32.totalorder %v4939_v11, 0  ;;  %v335_v43 = vshll.u32 %v4963_v39, 30  ;;  %v394_v23 = vshrl.u32 %v7733_v42, %v391_v30  ;;  %v399_v53 = vshll.u32 %v7731_v44, %v390_v38 }
  0x7d   :  { %v402_v10 = vshll.u32 %v7727_v47, %v390_v38  ;;  %v1938_v26 = vmul.f32 %v1937_v25, %v1935_v33  ;;  %v397_v54 = vshrl.u32 %v7731_v44, %v391_v30  ;;  %v400_v51 = vshrl.u32 %v7727_v47, %v391_v30 }
  0x7e   :  { %v403_v20 = vshrl.u32 %v4461_v49, %v391_v30  ;;  %vm263_vm2 = vcmp.lt.s32.totalorder %v4862_v41, 2  ;;  %v1848_v22 = vxor.u32 2147483648, %v4308_v2  ;;  %v4977_v60 = vsub.s32 %v332_v14, %v335_v43 }
  0x7f   :  { %v405_v5 = vshll.u32 %v4461_v49, %v390_v38  ;;  %v4980_v61 = vshll.u32 %v384_v46, 8  ;;  %vm1846_vm3 = vcmp.lt.s32.totalorder %v4939_v11, 2  ;;  %v1939_v6 = vxor.u32 2147483648, %v1938_v26 }
  0x80   :  { %v395_v62 = vor.u32 %v394_v23, %v393_v29  ;;  %v398_v50 = vor.u32 %v397_v54, %v396_v48  ;;  %vm408_vm4 = vcmp.lt.s32.totalorder %v389_v27, 1  ;;  %v338_v52 = vsub.s32 0, %v4977_v60 }
  0x81   :  { %v404_v63 = vor.u32 %v403_v20, %v402_v10  ;;  %v406_v13 = vshrl.u32 %v4462_v57, %v391_v30  ;;  %vm409_vm5 = vcmp.lt.s32.totalorder %v389_v27, 2  ;;  %vm156_vm6 = vweird.f32 %v4532_v7 }
  0x82   :  { %vm260_vm7 = vweird.f32 %v4536_v8  ;;  %v1940_v16 = vsel %vm1857_vm10, %v1939_v6, %v1938_v26  ;;  %v392_v14 = vshrl.u32 %v4457_v40, %v391_v30  ;;  %v401_v0 = vor.u32 %v400_v51, %v399_v53  ;;  %v5047_v8 = vld [vmem:[%s7718_s2] ss:$0 sm:$0xff] }
  0x83   :  { %vm411_vm8 = vcmp.lt.s32.totalorder %v389_v27, 4  ;;  %v1943_v35 = vsel %vm4943_vm15, %v4662_v24, %v1940_v16  ;;  %v3880_v4 = vmin.u32 %v338_v52, %v4977_v60  ;;  %v407_v18 = vor.u32 %v406_v13, %v405_v5 }
  0x84   :  { %vm410_vm9 = vcmp.lt.s32.totalorder %v389_v27, 3  ;;  %4309 = vcosq.f32 %v1943_v35  ;;  %v413_v21 = vsel %vm411_vm8, %v401_v0, 2102212464  ;;  %v416_v38 = vsel %vm408_vm4, %v395_v62, %v398_v50 }
  0x85   :  { %v417_v56 = vsel %vm411_vm8, %v404_v63, 920167782  ;;  %4311 = vsinq.f32 %v1943_v35  ;;  %v1948_v25 = vadd.s32 3, %v1944_v19  ;;  %v340_v46 = vclz %v3880_v4 }
  0x86   :  { %v4999_v30 = vmul.f32 %v4541_v9, %v4719_v3  ;;  %v412_v17 = vsel %vm408_vm4, %v392_v14, %v395_v62  ;;  %v414_v33 = vsel %vm410_vm9, %v398_v50, %v413_v21  ;;  %v418_v29 = vsel %vm410_vm9, %v401_v0, %v417_v56  ;;  %v3431_v56 = vld [vmem:[%s7719_s3] sm:$0xff] }
  0x87   :  { %v420_v48 = vsel %vm408_vm4, %v398_v50, %v401_v0  ;;  %v1852_v43 = vsel %vm1850_vm0, %v1851_v32, %v4308_v2  ;;  %v3881_v23 = vadd.s32 4294967294, %v340_v46  ;;  %v419_v53 = vsel %vm409_vm5, %v416_v38, %v418_v29 }
  0x88   :  { %v421_v19 = vsel %vm411_vm8, %v407_v18, 1326507024  ;;  %v1849_v9 = vsel %vm1847_vm1, %v4937_v1, %v1848_v22  ;;  %v5014_v10 = vmul.u32.u64.low %v4980_v61, %v419_v53  ;;  %v5015_v26 = vmul.u32.u64.high %v4980_v61, %v419_v53, %v5014_v10 }
  0x89   :  { %v422_v3 = vsel %vm410_vm9, %v404_v63, %v421_v19  ;;  %v1949_v54 = vand.u32 3, %v1948_v25  ;;  %vm3882_vm10 = vcmp.lt.s32.totalorder %v3881_v23, 0  ;;  %v415_v32 = vsel %vm409_vm5, %v412_v17, %v414_v33 }
  0x8a   :  { %v423_v2 = vsel %vm409_vm5, %v420_v48, %v422_v3  ;;  %v270_v51 = vsel %vm263_vm2, %v4957_v37, %v4953_v59  ;;  %v1962_v22 = vand.u32 2139095040, %v4999_v30  ;;  %vm1843_vm11 = vweird.f32 %v4546_v12 }
  0x8b   :  { %v5025_v1 = vmul.u32.u64.low %v4980_v61, %v423_v2  ;;  %v5026_v20 = vmul.u32.u64.high %v4980_v61, %v423_v2, %v5025_v1  ;;  %v1853_v5 = vsel %vm1846_vm3, %v1849_v9, %v1852_v43  ;;  %v343_v6 = vsel %vm3882_vm10, 0, %v3881_v23 }
  0x8c   :  { %vm1947_vm12 = vweird.f32 %v4662_v24  ;;  %v431_v27 = vmul.u32 %v4980_v61, %v415_v32  ;;  %v434_v62 = vadd.s32 1, %v5015_v26  ;;  %v1963_v41 = vshrl.u32 %v1962_v22, 23 }
  0x8d   :  { %v167_v59 = vsel %vm156_vm6, nan, %v4949_v31  ;;  %v271_v37 = vsel %vm260_vm7, nan, %v270_v51  ;;  %vm1950_vm13 = vcmp.lt.s32.totalorder %v1949_v54, 2  ;;  %vm1954_vm14 = vcmp.eq.s32.totalorder %v1949_v54, 2 }
  0x8e   :  { %v4310_v12 = vpop.eup %4309  ;;  %v1854_v11 = vsel %vm1843_vm11, nan, %v1853_v5  ;;  %v348_v50 = vsub.s32 4294967266, %v343_v6  ;;  %vm433_vm15 = vc.u32 %v5026_v20, %v5014_v10  ;;  %v3944_v52 = vadd.s32 4294967169, %v1963_v41 }
  0x8f   :  { %v4312_v61 = vpop.eup %4311  ;;  %vm1951_vm0 = vcmp.eq.s32.totalorder %v1949_v54, 0  ;;  %v1955_v63 = vxor.u32 2147483648, %v4310_v12  ;;  %v435_v13 = vsel %vm433_vm15, %v434_v62, %v5015_v26  ;;  %v1959_v7 = vand.u32 2147483647, %v4999_v30 }
  0x90   :  { %v1952_v31 = vxor.u32 2147483648, %v4312_v61  ;;  %v436_v16 = vadd.s32 %v435_v13, %v431_v27  ;;  %v5051_v14 = vmul.f32 %v5047_v8, %v4803_v28  ;;  %v1969_v0 = vadd.s32 1, %v3944_v52 }
  0x91   :  { %v1956_v35 = vsel %vm1954_vm14, %v1955_v63, %v4312_v61  ;;  %v3415_v4 = vsub.f32 %v167_v59, %v1854_v11  ;;  %v328_v18 = vadd.s32 %v4908_v45, %v4915_v34  ;;  %v344_v21 = vsub.s32 32, %v343_v6  ;;  %v3432_v45 = vld [vmem:[%s7719_s3 + $0x8] sm:$0xff] }
  0x92   :  { %v1953_v38 = vsel %vm1951_vm0, %v4310_v12, %v1952_v31  ;;  %v349_v25 = vadd.s32 127, %v348_v50  ;;  %v437_v46 = vadd.s32 536870912, %v436_v16  ;;  %vm1970_vm1 = vcmp.gt.s32.totalorder %v1969_v0, 0 }
  0x93   :  { %v1957_v17 = vsel %vm1950_vm13, %v1953_v38, %v1956_v35  ;;  %v1966_v28 = vand.u32 8388607, %v1959_v7  ;;  %v1971_v33 = vsel %vm1970_vm1, %v1969_v0, 0  ;;  %v5069_v23 = vmul.f32 %v3431_v56, %v3415_v4 }
  0x94   :  { %v1958_v29 = vsel %vm1947_vm12, nan, %v1957_v17  ;;  %v5067_v34 = vshrl.u32 %v437_v46, 30  ;;  %v1973_v48 = vand.u32 31, %v1971_v33  ;;  %v345_v53 = vshll.u32 %v4977_v60, %v343_v6 }
  0x95   :  { %v3416_v43 = vsub.f32 %v271_v37, %v1958_v29  ;;  %v346_v19 = vshrl.u32 %v328_v18, %v344_v21  ;;  %v350_v9 = vshll.u32 %v349_v25, 23  ;;  %v2066_v24 = vand.u32 2139095040, %v5051_v14 }
  0x96   :  { %v439_v3 = vshll.u32 %v5067_v34, 30  ;;  %v1974_v26 = vsub.s32 32, %v1973_v48  ;;  %v1967_v32 = vor.u32 8388608, %v1966_v28  ;;  %v1976_v51 = vshll.u32 %v4457_v40, %v1973_v48 }
  0x97   :  { %v5074_v54 = vmul.f32 %v3432_v45, %v3416_v43  ;;  %v1979_v22 = vshll.u32 %v7733_v42, %v1973_v48  ;;  %v1972_v5 = vshrl.u32 %v1971_v33, 5  ;;  %v1982_v27 = vshll.u32 %v7731_v44, %v1973_v48 }
  0x98   :  { %v5076_v2 = vsub.s32 %v436_v16, %v439_v3  ;;  %v1977_v1 = vshrl.u32 %v7733_v42, %v1974_v26  ;;  %v1980_v6 = vshrl.u32 %v7731_v44, %v1974_v26  ;;  %v347_v62 = vor.u32 %v346_v19, %v345_v53 }
  0x99   :  { %v3463_v60 = vpack.c.bf16 %v5074_v54, %v5069_v23  ;;  %v351_v41 = vor.u32 4788187, %v350_v9  ;;  %v2067_v37 = vshrl.u32 %v2066_v24, 23  ;;  %v1975_v12 = vshrl.u32 %v4457_v40, %v1974_v26 }
  0x9a   :  { %v442_v59 = vsub.s32 0, %v5076_v2  ;;  %v1983_v11 = vshrl.u32 %v7727_v47, %v1974_v26  ;;  %v1985_v50 = vshll.u32 %v7727_v47, %v1973_v48  ;;  %v5089_v52 = vshll.u32 %v1967_v32, 8 }
  0x9b   :  { %4051 = vmatprep.mubr.bf16.mxu0 %v3463_v60  ;;  %v1978_v63 = vor.u32 %v1977_v1, %v1976_v51  ;;  %v1981_v13 = vor.u32 %v1980_v6, %v1979_v22  ;;  %v1986_v31 = vshrl.u32 %v4461_v49, %v1974_v26  ;;  %v1988_v0 = vshll.u32 %v4461_v49, %v1973_v48 }
  0x9c   :  { %v3884_v61 = vmin.u32 %v442_v59, %v5076_v2  ;;  %v1984_v16 = vor.u32 %v1983_v11, %v1982_v27  ;;  %v1989_v35 = vshrl.u32 %v4462_v57, %v1974_v26  ;;  %vm1991_vm2 = vcmp.lt.s32.totalorder %v1972_v5, 1 }
  0x9d   :  { %v352_v4 = vand.u32 2147483647, %v351_v41  ;;  %v354_v18 = vcvt.s32.f32 %v347_v62  ;;  %v3948_v38 = vadd.s32 4294967169, %v2067_v37  ;;  %v1987_v56 = vor.u32 %v1986_v31, %v1985_v50 }
  0x9e   :  { %v444_v21 = vclz %v3884_v61  ;;  %v1990_v25 = vor.u32 %v1989_v35, %v1988_v0  ;;  %vm1992_vm3 = vcmp.lt.s32.totalorder %v1972_v5, 2  ;;  %vm1993_vm4 = vcmp.lt.s32.totalorder %v1972_v5, 3 }
  0x9f   :  { %vm1994_vm5 = vcmp.lt.s32.totalorder %v1972_v5, 4  ;;  %v1995_v17 = vsel %vm1991_vm2, %v1975_v12, %v1978_v63  ;;  %v1999_v28 = vsel %vm1991_vm2, %v1978_v63, %v1981_v13  ;;  %v2003_v45 = vsel %vm1991_vm2, %v1981_v13, %v1984_v16 }
  0xa0   :  { %v3885_v46 = vadd.s32 4294967294, %v444_v21  ;;  %v1996_v33 = vsel %vm1994_vm5, %v1984_v16, 2102212464  ;;  %v2000_v29 = vsel %vm1994_vm5, %v1987_v56, 920167782  ;;  %v355_v9 = vmul.f32 %v354_v18, %v352_v4 }
  0xa1   :  { %v2004_v43 = vsel %vm1994_vm5, %v1990_v25, 1326507024  ;;  %v1997_v48 = vsel %vm1993_vm4, %v1981_v13, %v1996_v33  ;;  %v2001_v53 = vsel %vm1993_vm4, %v1984_v16, %v2000_v29  ;;  %v432_v32 = vadd.s32 %v5014_v10, %v5026_v20  ;;  %v5114_v20 = vld [vmem:[%s7716_s0 + $0x20] sm:$0xff] }
  0xa2   :  { %vm3886_vm6 = vcmp.lt.s32.totalorder %v3885_v46, 0  ;;  %v2005_v19 = vsel %vm1993_vm4, %v1987_v56, %v2004_v43  ;;  %v2002_v26 = vsel %vm1992_vm3, %v1999_v28, %v2001_v53  ;;  %v1998_v22 = vsel %vm1992_vm3, %v1995_v17, %v1997_v48 }
  0xa3   :  { %v447_v3 = vsel %vm3886_vm6, 0, %v3885_v46  ;;  %v2006_v24 = vsel %vm1992_vm3, %v2003_v45, %v2005_v19  ;;  %v5105_v27 = vmul.u32.u64.low %v5089_v52, %v2002_v26  ;;  %v5106_v62 = vmul.u32.u64.high %v5089_v52, %v2002_v26, %v5105_v27 }
  0xa4   :  { %v448_v51 = vsub.s32 32, %v447_v3  ;;  %v452_v1 = vsub.s32 4294967266, %v447_v3  ;;  %v5101_v60 = vmul.u32.u64.low %v5089_v52, %v2006_v24  ;;  %v5102_v6 = vmul.u32.u64.high %v5089_v52, %v2006_v24, %v5101_v60 }
  0xa5   :  { %v2073_v59 = vadd.s32 1, %v3948_v38  ;;  %v356_v37 = vxor.u32 2147483648, %v355_v9  ;;  %v358_v12 = vsub.s32 4, %v4963_v39  ;;  %v2063_v10 = vand.u32 2147483647, %v5051_v14 }
  0xa6   :  { %v453_v41 = vadd.s32 127, %v452_v1  ;;  %v449_v5 = vshll.u32 %v5076_v2, %v447_v3  ;;  %v450_v11 = vshrl.u32 %v432_v32, %v448_v51  ;;  %v2014_v50 = vmul.u32 %v5089_v52, %v1998_v22  ;;  %v5132_v52 = vld [vmem:[%s7717_s1] ss:$0 sm:$0xff] }
  0xa7   :  { %vm2074_vm7 = vcmp.gt.s32.totalorder %v2073_v59, 0  ;;  %vm274_vm8 = vcmp.lt.s32.totalorder %v4727_v15, 0  ;;  %vm2016_vm9 = vc.u32 %v5102_v6, %v5105_v27  ;;  %v2017_v63 = vadd.s32 1, %v5106_v62 }
  0xa8   :  { %v454_v61 = vshll.u32 %v453_v41, 23  ;;  %vm5124_vm10 = vcmp.le.f32.partialorder %v272_v58, 0.7853982  ;;  %vm378_vm11 = vcmp.lt.s32.totalorder %v4825_v55, 0  ;;  %v2075_v2 = vsel %vm2074_vm7, %v2073_v59, 0 }
  0xa9   :  { %v5136_v31 = vmul.f32 %v5132_v52, %v5114_v20  ;;  %v359_v16 = vsel %vm274_vm8, %v358_v12, %v4963_v39  ;;  %v2018_v0 = vsel %vm2016_vm9, %v2017_v63, %v5106_v62  ;;  %v2070_v58 = vand.u32 8388607, %v2063_v10 }
  0xaa   :  { %v2077_v35 = vand.u32 31, %v2075_v2  ;;  %v357_v4 = vsel %vm274_vm8, %v356_v37, %v355_v9  ;;  %vm5144_vm12 = vcmp.le.f32.partialorder %v376_v36, 0.7853982  ;;  %v451_v21 = vor.u32 %v450_v11, %v449_v5 }
  0xab   :  { %v462_v38 = vsub.s32 4, %v5067_v34  ;;  %v2019_v56 = vadd.s32 %v2018_v0, %v2014_v50  ;;  %v455_v25 = vor.u32 4788187, %v454_v61  ;;  %v2076_v46 = vshrl.u32 %v2075_v2, 5 }
  0xac   :  { %v2078_v39 = vsub.s32 32, %v2077_v35  ;;  %v2080_v17 = vshll.u32 %v4457_v40, %v2077_v35  ;;  %v2083_v33 = vshll.u32 %v7733_v42, %v2077_v35  ;;  %v2086_v29 = vshll.u32 %v7731_v44, %v2077_v35 }
  0xad   :  { %v2020_v28 = vadd.s32 536870912, %v2019_v56  ;;  %v2089_v45 = vshll.u32 %v7727_v47, %v2077_v35  ;;  %v2092_v53 = vshll.u32 %v4461_v49, %v2077_v35  ;;  %v361_v19 = vsel %vm5124_vm10, 0, %v359_v16 }
  0xae   :  { %v2081_v36 = vshrl.u32 %v7733_v42, %v2078_v39  ;;  %v2084_v43 = vshrl.u32 %v7731_v44, %v2078_v39  ;;  %v2087_v48 = vshrl.u32 %v7727_v47, %v2078_v39  ;;  %v2090_v3 = vshrl.u32 %v4461_v49, %v2078_v39 }
  0xaf   :  { %v2021_v9 = vshrl.u32 %v2020_v28, 30  ;;  %v2093_v26 = vshrl.u32 %v4462_v57, %v2078_v39  ;;  %v456_v24 = vand.u32 2147483647, %v455_v25  ;;  %v458_v32 = vcvt.s32.f32 %v451_v21  ;;  %v5182_v28 = vld [vmem:[%s7716_s0 + $0x28] sm:$0xff] }
  0xb0   :  { %v463_v51 = vsel %vm378_vm11, %v462_v38, %v5067_v34  ;;  %v2071_v1 = vor.u32 8388608, %v2070_v58  ;;  %v360_v22 = vsel %vm5124_vm10, %v4727_v15, %v357_v4  ;;  %v2082_v62 = vor.u32 %v2081_v36, %v2080_v17 }
  0xb1   :  { %v2022_v60 = vshll.u32 %v2021_v9, 30  ;;  %v2085_v41 = vor.u32 %v2084_v43, %v2083_v33  ;;  %v2088_v59 = vor.u32 %v2087_v48, %v2086_v29  ;;  %v2091_v37 = vor.u32 %v2090_v3, %v2089_v45 }
  0xb2   :  { %v2094_v12 = vor.u32 %v2093_v26, %v2092_v53  ;;  %vm2095_vm13 = vcmp.lt.s32.totalorder %v2076_v46, 1  ;;  %v365_v5 = vadd.s32 3, %v361_v19  ;;  %v2079_v50 = vshrl.u32 %v4457_v40, %v2078_v39 }
  0xb3   :  { %v5167_v11 = vsub.s32 %v2019_v56, %v2022_v60  ;;  %vm2098_vm14 = vcmp.lt.s32.totalorder %v2076_v46, 4  ;;  %4313 = vcosq.f32 %v360_v22  ;;  %v459_v34 = vmul.f32 %v458_v32, %v456_v24 }
  0xb4   :  { %v465_v61 = vsel %vm5144_vm12, 0, %v463_v51  ;;  %vm2097_vm15 = vcmp.lt.s32.totalorder %v2076_v46, 3  ;;  %vm2096_vm0 = vcmp.lt.s32.totalorder %v2076_v46, 2  ;;  %v2100_v13 = vsel %vm2098_vm14, %v2088_v59, 2102212464 }
  0xb5   :  { %v2025_v63 = vsub.s32 0, %v5167_v11  ;;  %v2103_v2 = vsel %vm2095_vm13, %v2082_v62, %v2085_v41  ;;  %v2104_v16 = vsel %vm2098_vm14, %v2091_v37, 920167782  ;;  %v2107_v0 = vsel %vm2095_vm13, %v2085_v41, %v2088_v59 }
  0xb6   :  { %v2108_v58 = vsel %vm2098_vm14, %v2094_v12, 1326507024  ;;  %v2111_v35 = vshll.u32 %v2071_v1, 8  ;;  %v2099_v21 = vsel %vm2095_vm13, %v2079_v50, %v2082_v62  ;;  %v2105_v38 = vsel %vm2097_vm15, %v2088_v59, %v2104_v16 }
  0xb7   :  { %v3945_v4 = vmin.u32 %v2025_v63, %v5167_v11  ;;  %v2109_v56 = vsel %vm2097_vm15, %v2091_v37, %v2108_v58  ;;  %v2101_v25 = vsel %vm2097_vm15, %v2085_v41, %v2100_v13  ;;  %v2106_v39 = vsel %vm2096_vm0, %v2103_v2, %v2105_v38 }
  0xb8   :  { %v2110_v17 = vsel %vm2096_vm0, %v2107_v0, %v2109_v56  ;;  %v483_v33 = vand.u32 2139095040, %v5136_v31  ;;  %4315 = vsinq.f32 %v360_v22  ;;  %v460_v29 = vxor.u32 2147483648, %v459_v34 }
  0xb9   :  { %v2027_v45 = vclz %v3945_v4  ;;  %v2045_v36 = vsub.s32 4, %v2021_v9  ;;  %v5185_v43 = vmul.u32.u64.low %v2111_v35, %v2110_v17  ;;  %v5186_v48 = vmul.u32.u64.high %v2111_v35, %v2110_v17, %v5185_v43 }
  0xba   :  { %v5188_v53 = vmul.u32.u64.low %v2111_v35, %v2106_v39  ;;  %v5189_v19 = vmul.u32.u64.high %v2111_v35, %v2106_v39, %v5188_v53  ;;  %v2102_v26 = vsel %vm2096_vm0, %v2099_v21, %v2101_v25  ;;  %v5195_v24 = vmul.f32 %v5132_v52, %v5182_v28 }
  0xbb   :  { %v3946_v3 = vadd.s32 4294967294, %v2027_v45  ;;  %v484_v32 = vshrl.u32 %v483_v33, 23  ;;  %v5197_v51 = vand.u32 3, %v365_v5  ;;  %v469_v1 = vadd.s32 3, %v465_v61 }
  0xbc   :  { %vm5201_vm1 = vcmp.le.f32.partialorder %v1959_v7, 0.7853982  ;;  %vm1961_vm2 = vcmp.lt.s32.totalorder %v4999_v30, 0  ;;  %v2015_v46 = vadd.s32 %v5105_v27, %v5102_v6  ;;  %v461_v59 = vsel %vm378_vm11, %v460_v29, %v459_v34 }
  0xbd   :  { %vm3947_vm3 = vcmp.lt.s32.totalorder %v3946_v3, 0  ;;  %v2046_v60 = vsel %vm1961_vm2, %v2045_v36, %v2021_v9  ;;  %v3887_v62 = vadd.s32 4294967169, %v484_v32  ;;  %v5210_v41 = vpop.eup %4313  ;;  %v2118_v7 = vmul.u32 %v2111_v35, %v2102_v26 }
  0xbe   :  { %v2030_v37 = vsel %vm3947_vm3, 0, %v3946_v3  ;;  %v480_v12 = vand.u32 2147483647, %v5136_v31  ;;  %vm2120_vm4 = vc.u32 %v5186_v48, %v5188_v53  ;;  %v2048_v6 = vsel %vm5201_vm1, 0, %v2046_v60 }
  0xbf   :  { %v2031_v5 = vsub.s32 32, %v2030_v37  ;;  %v2032_v50 = vshll.u32 %v5167_v11, %v2030_v37  ;;  %v2035_v61 = vsub.s32 4294967266, %v2030_v37  ;;  %v2121_v27 = vadd.s32 1, %v5189_v19 }
  0xc0   :  { %v490_v9 = vadd.s32 1, %v3887_v62  ;;  %v587_v63 = vand.u32 2139095040, %v5195_v24  ;;  %vm371_vm5 = vcmp.eq.s32.totalorder %v5197_v51, 2  ;;  %v372_v2 = vxor.u32 2147483648, %v5210_v41 }
  0xc1   :  { %v2033_v34 = vshrl.u32 %v2015_v46, %v2031_v5  ;;  %v2036_v13 = vadd.s32 127, %v2035_v61  ;;  %v464_v11 = vsel %vm5144_vm12, %v4825_v55, %v461_v59  ;;  %v2122_v16 = vsel %vm2120_vm4, %v2121_v27, %v5189_v19 }
  0xc2   :  { %vm491_vm6 = vcmp.gt.s32.totalorder %v490_v9, 0  ;;  %v5228_v0 = vpop.eup %4315  ;;  %v2052_v4 = vadd.s32 3, %v2048_v6  ;;  %v2123_v21 = vadd.s32 %v2122_v16, %v2118_v7  ;;  %v5230_v38 = vand.u32 3, %v469_v1 }
  0xc3   :  { %v2034_v58 = vor.u32 %v2033_v34, %v2032_v50  ;;  %v2037_v35 = vshll.u32 %v2036_v13, 23  ;;  %v487_v56 = vand.u32 8388607, %v480_v12  ;;  %v492_v25 = vsel %vm491_vm6, %v490_v9, 0 }
  0xc4   :  { %v588_v39 = vshrl.u32 %v587_v63, 23  ;;  %4317 = vcosq.f32 %v464_v11  ;;  %v2124_v33 = vadd.s32 536870912, %v2123_v21  ;;  %v369_v29 = vxor.u32 2147483648, %v5228_v0 }
  0xc5   :  { %v2038_v17 = vor.u32 4788187, %v2037_v35  ;;  %v2041_v18 = vcvt.s32.f32 %v2034_v58  ;;  %v5238_v45 = vsel %vm371_vm5, %v372_v2, %v5228_v0  ;;  %4319 = vsinq.f32 %v464_v11 }
  0xc6   :  { %v494_v36 = vand.u32 31, %v492_v25  ;;  %v5240_v19 = vand.u32 3, %v2052_v4  ;;  %v5242_v3 = vshrl.u32 %v2124_v33, 30  ;;  %v584_v26 = vand.u32 2147483647, %v5195_v24 }
  0xc7   :  { %v2039_v43 = vand.u32 2147483647, %v2038_v17  ;;  %v488_v32 = vor.u32 8388608, %v487_v56  ;;  %v3891_v60 = vadd.s32 4294967169, %v588_v39  ;;  %v493_v63 = vshrl.u32 %v492_v25, 5 }
  0xc8   :  { %v495_v1 = vsub.s32 32, %v494_v36  ;;  %v497_v46 = vshll.u32 %v4457_v40, %v494_v36  ;;  %v2126_v59 = vshll.u32 %v5242_v3, 30  ;;  %v500_v37 = vshll.u32 %v7733_v42, %v494_v36 }
  0xc9   :  { %v2042_v62 = vmul.f32 %v2041_v18, %v2039_v43  ;;  %v503_v7 = vshll.u32 %v7731_v44, %v494_v36  ;;  %v506_v6 = vshll.u32 %v7727_v47, %v494_v36  ;;  %vm368_vm7 = vcmp.eq.s32.totalorder %v5197_v51, 0 }
  0xca   :  { %v498_v5 = vshrl.u32 %v7733_v42, %v495_v1  ;;  %v501_v50 = vshrl.u32 %v7731_v44, %v495_v1  ;;  %v504_v61 = vshrl.u32 %v7727_v47, %v495_v1  ;;  %v5253_v9 = vsub.s32 %v2123_v21, %v2126_v59 }
  0xcb   :  { %v2043_v27 = vxor.u32 2147483648, %v2042_v62  ;;  %v507_v34 = vshrl.u32 %v4461_v49, %v495_v1  ;;  %v2119_v13 = vadd.s32 %v5188_v53, %v5186_v48  ;;  %v496_v2 = vshrl.u32 %v4457_v40, %v495_v1 }
  0xcc   :  { %v499_v11 = vor.u32 %v498_v5, %v497_v46  ;;  %v5260_v16 = vshll.u32 %v488_v32, 8  ;;  %v2129_v35 = vsub.s32 0, %v5253_v9  ;;  %v502_v4 = vor.u32 %v501_v50, %v500_v37 }
  0xcd   :  { %v2044_v58 = vsel %vm1961_vm2, %v2043_v27, %v2042_v62  ;;  %v505_v21 = vor.u32 %v504_v61, %v503_v7  ;;  %v508_v25 = vor.u32 %v507_v34, %v506_v6  ;;  %v509_v39 = vshll.u32 %v4461_v49, %v494_v36 }
  0xce   :  { %v2047_v56 = vsel %vm5201_vm1, %v4999_v30, %v2044_v58  ;;  %v510_v48 = vshrl.u32 %v4462_v57, %v495_v1  ;;  %v5270_v53 = vpop.eup %4317  ;;  %v3949_v17 = vmin.u32 %v2129_v35, %v5253_v9  ;;  %vm512_vm8 = vcmp.lt.s32.totalorder %v493_v63, 1 }
  0xcf   :  { %vm515_vm9 = vcmp.lt.s32.totalorder %v493_v63, 4  ;;  %v594_v18 = vadd.s32 1, %v3891_v60  ;;  %v4320_v33 = vpop.eup %4319  ;;  %4321 = vcosq.f32 %v2047_v56  ;;  %vm514_vm10 = vcmp.lt.s32.totalorder %v493_v63, 3 }
  0xd0   :  { %v511_v43 = vor.u32 %v510_v48, %v509_v39  ;;  %v517_v32 = vsel %vm515_vm9, %v505_v21, 2102212464  ;;  %vm472_vm11 = vcmp.eq.s32.totalorder %v5230_v38, 0  ;;  %vm475_vm12 = vcmp.eq.s32.totalorder %v5230_v38, 2 }
  0xd1   :  { %4323 = vsinq.f32 %v2047_v56  ;;  %vm2065_vm13 = vcmp.lt.s32.totalorder %v5051_v14, 0  ;;  %v2131_v22 = vclz %v3949_v17  ;;  %vm513_vm14 = vcmp.lt.s32.totalorder %v493_v63, 2 }
  0xd2   :  { %v516_v36 = vsel %vm512_vm8, %v496_v2, %v499_v11  ;;  %v518_v1 = vsel %vm514_vm10, %v502_v4, %v517_v32  ;;  %v520_v46 = vsel %vm512_vm8, %v499_v11, %v502_v4  ;;  %v521_v60 = vsel %vm515_vm9, %v508_v25, 920167782 }
  0xd3   :  { %v524_v62 = vsel %vm512_vm8, %v502_v4, %v505_v21  ;;  %v3950_v59 = vadd.s32 4294967294, %v2131_v22  ;;  %v2149_v37 = vsub.s32 4, %v5242_v3  ;;  %v522_v7 = vsel %vm514_vm10, %v505_v21, %v521_v60 }
  0xd4   :  { %v525_v5 = vsel %vm515_vm9, %v511_v43, 1326507024  ;;  %vm5287_vm15 = vcmp.le.f32.partialorder %v2063_v10, 0.7853982  ;;  %v519_v61 = vsel %vm513_vm14, %v516_v36, %v518_v1  ;;  %v523_v6 = vsel %vm513_vm14, %v520_v46, %v522_v7 }
  0xd5   :  { %v526_v27 = vsel %vm514_vm10, %v508_v25, %v525_v5  ;;  %vm595_vm0 = vcmp.gt.s32.totalorder %v594_v18, 0  ;;  %vm3951_vm1 = vcmp.lt.s32.totalorder %v3950_v59, 0  ;;  %v5309_v21 = vsel %vm368_vm7, %v5210_v41, %v369_v29 }
  0xd6   :  { %v527_v34 = vsel %vm513_vm14, %v524_v62, %v526_v27  ;;  %v5296_v2 = vmul.u32.u64.low %v5260_v16, %v523_v6  ;;  %v5297_v11 = vmul.u32.u64.high %v5260_v16, %v523_v6, %v5296_v2  ;;  %v2134_v58 = vsel %vm3951_vm1, 0, %v3950_v59 }
  0xd7   :  { %v5301_v10 = vmul.u32.u64.low %v5260_v16, %v527_v34  ;;  %v5302_v35 = vmul.u32.u64.high %v5260_v16, %v527_v34, %v5301_v10  ;;  %v596_v4 = vsel %vm595_vm0, %v594_v18, 0  ;;  %v2135_v63 = vsub.s32 32, %v2134_v58 }
  0xd8   :  { %v2136_v56 = vshll.u32 %v5253_v9, %v2134_v58  ;;  %v2139_v25 = vsub.s32 4294967266, %v2134_v58  ;;  %v473_v39 = vxor.u32 2147483648, %v4320_v33  ;;  %v476_v48 = vxor.u32 2147483648, %v5270_v53 }
  0xd9   :  { %v535_v17 = vmul.u32 %v5260_v16, %v519_v61  ;;  %v598_v43 = vand.u32 31, %v596_v4  ;;  %v2137_v32 = vshrl.u32 %v2119_v13, %v2135_v63  ;;  %v538_v18 = vadd.s32 1, %v5297_v11  ;;  %v4322_v36 = vpop.eup %4321 }
  0xda   :  { %v2140_v22 = vadd.s32 127, %v2139_v25  ;;  %v591_v0 = vand.u32 8388607, %v584_v26  ;;  %vm2055_vm2 = vcmp.eq.s32.totalorder %v5240_v19, 0  ;;  %vm2058_vm3 = vcmp.eq.s32.totalorder %v5240_v19, 2 }
  0xdb   :  { %v5322_v41 = vsel %vm2065_vm13, %v2149_v37, %v5242_v3  ;;  %vm537_vm4 = vc.u32 %v5302_v35, %v5296_v2  ;;  %v4324_v29 = vpop.eup %4323  ;;  %v2138_v9 = vor.u32 %v2137_v32, %v2136_v56  ;;  %v599_v1 = vsub.s32 32, %v598_v43 }
  0xdc   :  { %v2141_v13 = vshll.u32 %v2140_v22, 23  ;;  %v539_v16 = vsel %vm537_vm4, %v538_v18, %v5297_v11  ;;  %v5330_v46 = vsel %vm472_vm11, %v5270_v53, %v473_v39  ;;  %v5334_v60 = vsel %vm475_vm12, %v476_v48, %v4320_v33 }
  0xdd   :  { %v540_v3 = vadd.s32 %v539_v16, %v535_v17  ;;  %v5338_v62 = vmul.f32 %v5047_v8, %v5114_v20  ;;  %v2145_v37 = vcvt.s32.f32 %v2138_v9  ;;  %v2152_v7 = vsel %vm5287_vm15, 0, %v5322_v41 }
  0xde   :  { %v2142_v59 = vor.u32 4788187, %v2141_v13  ;;  %v592_v5 = vor.u32 8388608, %v591_v0  ;;  %v2056_v61 = vxor.u32 2147483648, %v4324_v29  ;;  %v2059_v6 = vxor.u32 2147483648, %v4322_v36 }
  0xdf   :  { %v541_v53 = vadd.s32 536870912, %v540_v3  ;;  %v597_v27 = vshrl.u32 %v596_v4, 5  ;;  %vm367_vm5 = vcmp.lt.s32.totalorder %v5197_v51, 2  ;;  %vm471_vm6 = vcmp.lt.s32.totalorder %v5230_v38, 2 }
  0xe0   :  { %vm2054_vm7 = vcmp.lt.s32.totalorder %v5240_v19, 2  ;;  %v2143_v33 = vand.u32 2147483647, %v2142_v59  ;;  %v601_v20 = vshll.u32 %v4457_v40, %v598_v43  ;;  %v602_v34 = vshrl.u32 %v7733_v42, %v599_v1 }
  0xe1   :  { %v604_v11 = vshll.u32 %v7733_v42, %v598_v43  ;;  %v5349_v58 = vshrl.u32 %v541_v53, 30  ;;  %v605_v10 = vshrl.u32 %v7731_v44, %v599_v1  ;;  %v607_v63 = vshll.u32 %v7731_v44, %v598_v43 }
  0xe2   :  { %v608_v4 = vshrl.u32 %v7727_v47, %v599_v1  ;;  %v2146_v56 = vmul.f32 %v2145_v37, %v2143_v33  ;;  %v610_v25 = vshll.u32 %v7727_v47, %v598_v43  ;;  %v611_v39 = vshrl.u32 %v4461_v49, %v599_v1 }
  0xe3   :  { %v613_v48 = vshll.u32 %v4461_v49, %v598_v43  ;;  %v543_v17 = vshll.u32 %v5349_v58, 30  ;;  %v600_v32 = vshrl.u32 %v4457_v40, %v599_v1  ;;  %vm616_vm8 = vcmp.lt.s32.totalorder %v597_v27, 1 }
  0xe4   :  { %v5359_v22 = vshll.u32 %v592_v5, 8  ;;  %vm364_vm9 = vweird.f32 %v4727_v15  ;;  %v2147_v18 = vxor.u32 2147483648, %v2146_v56  ;;  %v603_v0 = vor.u32 %v602_v34, %v601_v20 }
  0xe5   :  { %v612_v41 = vor.u32 %v611_v39, %v610_v25  ;;  %v614_v9 = vshrl.u32 %v4462_v57, %v599_v1  ;;  %vm2051_vm10 = vweird.f32 %v4999_v30  ;;  %v5364_v13 = vsub.s32 %v540_v3, %v543_v17 }
  0xe6   :  { %v606_v16 = vor.u32 %v605_v10, %v604_v11  ;;  %v609_v43 = vor.u32 %v608_v4, %v607_v63  ;;  %vm619_vm11 = vcmp.lt.s32.totalorder %v597_v27, 4  ;;  %vm468_vm12 = vweird.f32 %v4825_v55 }
  0xe7   :  { %v2057_v59 = vsel %vm2055_vm2, %v4322_v36, %v2056_v61  ;;  %v2060_v37 = vsel %vm2058_vm3, %v2059_v6, %v4324_v29  ;;  %v2148_v5 = vsel %vm2065_vm13, %v2147_v18, %v2146_v56  ;;  %v615_v53 = vor.u32 %v614_v9, %v613_v48 }
  0xe8   :  { %v2151_v1 = vsel %vm5287_vm15, %v5051_v14, %v2148_v5  ;;  %v546_v3 = vsub.s32 0, %v5364_v13  ;;  %vm618_vm14 = vcmp.lt.s32.totalorder %v597_v27, 3  ;;  %v621_v33 = vsel %vm619_vm11, %v609_v43, 2102212464 }
  0xe9   :  { %4325 = vcosq.f32 %v2151_v1  ;;  %vm617_vm0 = vcmp.lt.s32.totalorder %v597_v27, 2  ;;  %v620_v36 = vsel %vm616_vm8, %v600_v32, %v603_v0  ;;  %v625_v61 = vsel %vm619_vm11, %v612_v41, 920167782 }
  0xea   :  { %4327 = vsinq.f32 %v2151_v1  ;;  %v3888_v29 = vmin.u32 %v546_v3, %v5364_v13  ;;  %v622_v6 = vsel %vm618_vm14, %v606_v16, %v621_v33  ;;  %v624_v20 = vsel %vm616_vm8, %v603_v0, %v606_v16 }
  0xeb   :  { %v2156_v50 = vadd.s32 3, %v2152_v7  ;;  %v626_v34 = vsel %vm618_vm14, %v609_v43, %v625_v61  ;;  %v628_v11 = vsel %vm616_vm8, %v606_v16, %v609_v43  ;;  %v629_v10 = vsel %vm619_vm11, %v615_v53, 1326507024 }
  0xec   :  { %v374_v63 = vsel %vm367_vm5, %v5309_v21, %v5238_v45  ;;  %v478_v4 = vsel %vm471_vm6, %v5330_v46, %v5334_v60  ;;  %v2061_v56 = vsel %vm2054_vm7, %v2057_v59, %v2060_v37  ;;  %v548_v7 = vclz %v3888_v29 }
  0xed   :  { %v623_v25 = vsel %vm617_vm0, %v620_v36, %v622_v6  ;;  %v627_v39 = vsel %vm617_vm0, %v624_v20, %v626_v34  ;;  %v630_v48 = vsel %vm618_vm14, %v612_v41, %v629_v10  ;;  %v2170_v17 = vand.u32 2139095040, %v5338_v62 }
  0xee   :  { %v3889_v32 = vadd.s32 4294967294, %v548_v7  ;;  %v631_v51 = vsel %vm617_vm0, %v628_v11, %v630_v48  ;;  %v5402_v45 = vmul.u32.u64.low %v5359_v22, %v627_v39  ;;  %v5403_v21 = vmul.u32.u64.high %v5359_v22, %v627_v39, %v5402_v45 }
  0xef   :  { %v2157_v38 = vand.u32 3, %v2156_v50  ;;  %v5407_v19 = vmul.u32.u64.low %v5359_v22, %v631_v51  ;;  %v5408_v46 = vmul.u32.u64.high %v5359_v22, %v631_v51, %v5407_v19  ;;  %v2171_v60 = vshrl.u32 %v2170_v17, 23 }
  0xf0   :  { %v375_v18 = vsel %vm364_vm9, nan, %v374_v63  ;;  %vm2155_vm13 = vweird.f32 %v5051_v14  ;;  %vm3890_vm15 = vcmp.lt.s32.totalorder %v3889_v32, 0  ;;  %v2062_v27 = vsel %vm2051_vm10, nan, %v2061_v56 }
  0xf1   :  { %v551_v0 = vsel %vm3890_vm15, 0, %v3889_v32  ;;  %v639_v41 = vmul.u32 %v5359_v22, %v623_v25  ;;  %v3952_v9 = vadd.s32 4294967169, %v2171_v60  ;;  %v479_v16 = vsel %vm468_vm12, nan, %v478_v4  ;;  %v3434_v4 = vld [vmem:[%s7719_s3 + $0x18] sm:$0xff] }
  0xf2   :  { %v642_v43 = vadd.s32 1, %v5403_v21  ;;  %v5421_v59 = vmul.f32 %v5047_v8, %v5182_v28  ;;  %v2167_v15 = vand.u32 2147483647, %v5338_v62  ;;  %vm2162_vm1 = vcmp.eq.s32.totalorder %v2157_v38, 2  ;;  %v3433_v8 = vld [vmem:[%s7719_s3 + $0x10] sm:$0xff] }
  0xf3   :  { %v4326_v37 = vpop.eup %4325  ;;  %v556_v5 = vsub.s32 4294967266, %v551_v0  ;;  %vm641_vm2 = vc.u32 %v5408_v46, %v5402_v45  ;;  %v2177_v30 = vadd.s32 1, %v3952_v9  ;;  %vm2159_vm3 = vcmp.eq.s32.totalorder %v2157_v38, 0 }
  0xf4   :  { %v4328_v22 = vpop.eup %4327  ;;  %v2163_v53 = vxor.u32 2147483648, %v4326_v37  ;;  %v3417_v55 = vsub.f32 %v375_v18, %v2062_v27  ;;  %v643_v1 = vsel %vm641_vm2, %v642_v43, %v5403_v21  ;;  %vm2158_vm4 = vcmp.lt.s32.totalorder %v2157_v38, 2 }
  0xf5   :  { %v2160_v3 = vxor.u32 2147483648, %v4328_v22  ;;  %v644_v28 = vadd.s32 %v643_v1, %v639_v41  ;;  %vm2178_vm5 = vcmp.gt.s32.totalorder %v2177_v30, 0  ;;  %v536_v36 = vadd.s32 %v5296_v2, %v5302_v35 }
  0xf6   :  { %v2164_v33 = vsel %vm2162_vm1, %v2163_v53, %v4328_v22  ;;  %v552_v61 = vsub.s32 32, %v551_v0  ;;  %v2179_v29 = vsel %vm2178_vm5, %v2177_v30, 0  ;;  %v557_v20 = vadd.s32 127, %v556_v5 }
  0xf7   :  { %v2161_v6 = vsel %vm2159_vm3, %v4326_v37, %v2160_v3  ;;  %v645_v50 = vadd.s32 536870912, %v644_v28  ;;  %v2181_v34 = vand.u32 31, %v2179_v29  ;;  %v5432_v10 = vmul.f32 %v3433_v8, %v3417_v55 }
  0xf8   :  { %v2165_v11 = vsel %vm2158_vm4, %v2161_v6, %v2164_v33  ;;  %v2174_v2 = vand.u32 8388607, %v2167_v15  ;;  %v553_v25 = vshll.u32 %v5364_v13, %v551_v0  ;;  %v554_v39 = vshrl.u32 %v536_v36, %v552_v61 }
  0xf9   :  { %v2166_v63 = vsel %vm2155_vm13, nan, %v2165_v11  ;;  %v5439_v56 = vshrl.u32 %v645_v50, 30  ;;  %v2182_v35 = vsub.s32 32, %v2181_v34  ;;  %v2274_v48 = vand.u32 2139095040, %v5421_v59 }
  0xfa   :  { %v3418_v7 = vsub.f32 %v479_v16, %v2166_v63  ;;  %v558_v17 = vshll.u32 %v557_v20, 23  ;;  %v2180_v32 = vshrl.u32 %v2179_v29, 5  ;;  %v2184_v51 = vshll.u32 %v4457_v40, %v2181_v34 }
  0xfb   :  { %v647_v14 = vshll.u32 %v5439_v56, 30  ;;  %v2185_v38 = vshrl.u32 %v7733_v42, %v2182_v35  ;;  %v2187_v19 = vshll.u32 %v7733_v42, %v2181_v34  ;;  %v2188_v60 = vshrl.u32 %v7731_v44, %v2182_v35 }
  0xfc   :  { %v5447_v21 = vmul.f32 %v3434_v4, %v3418_v7  ;;  %v2190_v13 = vshll.u32 %v7731_v44, %v2181_v34  ;;  %v2191_v27 = vshrl.u32 %v7727_v47, %v2182_v35  ;;  %v2193_v0 = vshll.u32 %v7727_v47, %v2181_v34 }
  0xfd   :  { %v5452_v18 = vsub.s32 %v644_v28, %v647_v14  ;;  %v2175_v9 = vor.u32 8388608, %v2174_v2  ;;  %v2275_v16 = vshrl.u32 %v2274_v48, 23  ;;  %v555_v43 = vor.u32 %v554_v39, %v553_v25 }
  0xfe   :  { %v3464_v41 = vpack.c.bf16 %v5447_v21, %v5432_v10  ;;  %v559_v37 = vor.u32 4788187, %v558_v17  ;;  %v2194_v30 = vshrl.u32 %v4461_v49, %v2182_v35  ;;  %v2186_v22 = vor.u32 %v2185_v38, %v2184_v51 }
  0xff   :  { %v650_v5 = vsub.s32 0, %v5452_v18  ;;  %v2189_v53 = vor.u32 %v2188_v60, %v2187_v19  ;;  %v2196_v55 = vshll.u32 %v4461_v49, %v2181_v34  ;;  %v2197_v1 = vshrl.u32 %v4462_v57, %v2182_v35 }
 0x100   :  { %4052 = vmatmul.mubr.bf16.vlgmr.msra.gmra.mrb[0].mxu0 %v3464_v41  ;;  %v2192_v8 = vor.u32 %v2191_v27, %v2190_v13  ;;  %v2195_v28 = vor.u32 %v2194_v30, %v2193_v0  ;;  %vm2199_vm6 = vcmp.lt.s32.totalorder %v2180_v32, 1  ;;  %v2183_v33 = vshrl.u32 %v4457_v40, %v2182_v35 }
 0x101   :  { %v3892_v3 = vmin.u32 %v650_v5, %v5452_v18  ;;  %v2198_v36 = vor.u32 %v2197_v1, %v2196_v55  ;;  %v2215_v61 = vshll.u32 %v2175_v9, 8  ;;  %v560_v29 = vand.u32 2147483647, %v559_v37 }
 0x102   :  { %v562_v6 = vcvt.s32.f32 %v555_v43  ;;  %vm2201_vm7 = vcmp.lt.s32.totalorder %v2180_v32, 3  ;;  %vm2200_vm8 = vcmp.lt.s32.totalorder %v2180_v32, 2  ;;  %vm2202_vm9 = vcmp.lt.s32.totalorder %v2180_v32, 4 }
 0x103   :  { %v652_v20 = vclz %v3892_v3  ;;  %v2207_v50 = vsel %vm2199_vm6, %v2186_v22, %v2189_v53  ;;  %v3956_v34 = vadd.s32 4294967169, %v2275_v16  ;;  %v2204_v63 = vsel %vm2202_vm9, %v2192_v8, 2102212464 }
 0x104   :  { %v2208_v4 = vsel %vm2202_vm9, %v2195_v28, 920167782  ;;  %v2211_v2 = vsel %vm2199_vm6, %v2189_v53, %v2192_v8  ;;  %v2203_v7 = vsel %vm2199_vm6, %v2183_v33, %v2186_v22  ;;  %v2205_v35 = vsel %vm2201_vm7, %v2189_v53, %v2204_v63 }
 0x105   :  { %v3893_v11 = vadd.s32 4294967294, %v652_v20  ;;  %v2209_v25 = vsel %vm2201_vm7, %v2192_v8, %v2208_v4  ;;  %v2212_v39 = vsel %vm2202_vm9, %v2198_v36, 1326507024  ;;  %v563_v48 = vmul.f32 %v562_v6, %v560_v29 }
 0x106   :  { %v2210_v17 = vsel %vm2200_vm8, %v2207_v50, %v2209_v25  ;;  %v2213_v14 = vsel %vm2201_vm7, %v2195_v28, %v2212_v39  ;;  %v640_v13 = vadd.s32 %v5402_v45, %v5408_v46  ;;  %v2206_v41 = vsel %vm2200_vm8, %v2203_v7, %v2205_v35 }
 0x107   :  { %vm3894_vm10 = vcmp.lt.s32.totalorder %v3893_v11, 0  ;;  %v2214_v38 = vsel %vm2200_vm8, %v2211_v2, %v2213_v14  ;;  %v5473_v19 = vmul.u32.u64.low %v2215_v61, %v2210_v17  ;;  %v5474_v60 = vmul.u32.u64.high %v2215_v61, %v2210_v17, %v5473_v19 }
 0x108   :  { %v655_v51 = vsel %vm3894_vm10, 0, %v3893_v11  ;;  %v5480_v9 = vmul.u32.u64.low %v2215_v61, %v2214_v38  ;;  %v5481_v16 = vmul.u32.u64.high %v2215_v61, %v2214_v38, %v5480_v9  ;;  %v2281_v43 = vadd.s32 1, %v3956_v34 }
 0x109   :  { %v656_v27 = vsub.s32 32, %v655_v51  ;;  %v660_v0 = vsub.s32 4294967266, %v655_v51  ;;  %vm482_vm11 = vcmp.lt.s32.totalorder %v5136_v31, 0  ;;  %v566_v37 = vsub.s32 4, %v5349_v58 }
 0x10a   :  { %v564_v30 = vxor.u32 2147483648, %v563_v48  ;;  %v2222_v22 = vmul.u32 %v2215_v61, %v2206_v41  ;;  %v2225_v53 = vadd.s32 1, %v5474_v60  ;;  %vm2282_vm12 = vcmp.gt.s32.totalorder %v2281_v43, 0 }
 0x10b   :  { %v661_v5 = vadd.s32 127, %v660_v0  ;;  %v657_v45 = vshll.u32 %v5452_v18, %v655_v51  ;;  %v658_v46 = vshrl.u32 %v640_v13, %v656_v27  ;;  %v2271_v32 = vand.u32 2147483647, %v5421_v59 }
 0x10c   :  { %v2283_v55 = vsel %vm2282_vm12, %v2281_v43, 0  ;;  %vm2224_vm14 = vc.u32 %v5481_v16, %v5473_v19  ;;  %vm5492_vm0 = vcmp.le.f32.partialorder %v480_v12, 0.7853982  ;;  %v565_v28 = vsel %vm482_vm11, %v564_v30, %v563_v48 }
 0x10d   :  { %v662_v1 = vshll.u32 %v661_v5, 23  ;;  %v2226_v8 = vsel %vm2224_vm14, %v2225_v53, %v5474_v60  ;;  %vm586_vm13 = vcmp.lt.s32.totalorder %v5195_v24, 0  ;;  %v2285_v33 = vand.u32 31, %v2283_v55  ;;  %v5528_v5 = vld [vmem:[%s7716_s0 + $0x30] sm:$0xff] }
 0x10e   :  { %v2227_v18 = vadd.s32 %v2226_v8, %v2222_v22  ;;  %v567_v36 = vsel %vm482_vm11, %v566_v37, %v5349_v58  ;;  %v659_v61 = vor.u32 %v658_v46, %v657_v45  ;;  %v670_v29 = vsub.s32 4, %v5439_v56 }
 0x10f   :  { %v2278_v12 = vand.u32 8388607, %v2271_v32  ;;  %v663_v6 = vor.u32 4788187, %v662_v1  ;;  %v2284_v50 = vshrl.u32 %v2283_v55, 5  ;;  %v2286_v34 = vsub.s32 32, %v2285_v33 }
 0x110   :  { %v2228_v20 = vadd.s32 536870912, %v2227_v18  ;;  %v568_v11 = vsel %vm5492_vm0, %v5136_v31, %v565_v28  ;;  %v2288_v63 = vshll.u32 %v4457_v40, %v2285_v33  ;;  %v2291_v4 = vshll.u32 %v7733_v42, %v2285_v33 }
 0x111   :  { %v2297_v58 = vshll.u32 %v7727_v47, %v2285_v33  ;;  %v2289_v7 = vshrl.u32 %v7733_v42, %v2286_v34  ;;  %v2292_v35 = vshrl.u32 %v7731_v44, %v2286_v34  ;;  %v2294_v25 = vshll.u32 %v7731_v44, %v2285_v33 }
 0x112   :  { %v5512_v2 = vshrl.u32 %v2228_v20, 30  ;;  %v2279_v39 = vor.u32 8388608, %v2278_v12  ;;  %v2295_v48 = vshrl.u32 %v7727_v47, %v2286_v34  ;;  %v2298_v17 = vshrl.u32 %v4461_v49, %v2286_v34 }
 0x113   :  { %v2300_v14 = vshll.u32 %v4461_v49, %v2285_v33  ;;  %v664_v51 = vand.u32 2147483647, %v663_v6  ;;  %v666_v38 = vcvt.s32.f32 %v659_v61  ;;  %vm2303_vm15 = vcmp.lt.s32.totalorder %v2284_v50, 1 }
 0x114   :  { %v2230_v60 = vshll.u32 %v5512_v2, 30  ;;  %v2290_v13 = vor.u32 %v2289_v7, %v2288_v63  ;;  %v2293_v27 = vor.u32 %v2292_v35, %v2291_v4  ;;  %v2299_v0 = vor.u32 %v2298_v17, %v2297_v58 }
 0x115   :  { %v2301_v41 = vshrl.u32 %v4462_v57, %v2286_v34  ;;  %v2287_v43 = vshrl.u32 %v4457_v40, %v2286_v34  ;;  %v2296_v37 = vor.u32 %v2295_v48, %v2294_v25  ;;  %vm2306_vm1 = vcmp.lt.s32.totalorder %v2284_v50, 4 }
 0x116   :  { %v5522_v9 = vsub.s32 %v2227_v18, %v2230_v60  ;;  %v569_v30 = vsel %vm5492_vm0, 0, %v567_v36  ;;  %v671_v22 = vsel %vm586_vm13, %v670_v29, %v5439_v56  ;;  %vm2305_vm2 = vcmp.lt.s32.totalorder %v2284_v50, 3 }
 0x117   :  { %v2302_v53 = vor.u32 %v2301_v41, %v2300_v14  ;;  %4329 = vcosq.f32 %v568_v11  ;;  %vm2304_vm3 = vcmp.lt.s32.totalorder %v2284_v50, 2  ;;  %v2308_v46 = vsel %vm2306_vm1, %v2296_v37, 2102212464 }
 0x118   :  { %v2233_v45 = vsub.s32 0, %v5522_v9  ;;  %v2311_v55 = vsel %vm2303_vm15, %v2290_v13, %v2293_v27  ;;  %v2312_v1 = vsel %vm2306_vm1, %v2299_v0, 920167782  ;;  %v2319_v8 = vshll.u32 %v2279_v39, 8 }
 0x119   :  { %v5541_v3 = vmul.f32 %v5132_v52, %v5528_v5  ;;  %v667_v28 = vmul.f32 %v666_v38, %v664_v51  ;;  %v2307_v18 = vsel %vm2303_vm15, %v2287_v43, %v2290_v13  ;;  %v2313_v33 = vsel %vm2305_vm2, %v2296_v37, %v2312_v1 }
 0x11a   :  { %v3953_v56 = vmin.u32 %v2233_v45, %v5522_v9  ;;  %v2309_v36 = vsel %vm2305_vm2, %v2293_v27, %v2308_v46  ;;  %v2314_v61 = vsel %vm2304_vm3, %v2311_v55, %v2313_v33  ;;  %v2315_v29 = vsel %vm2303_vm15, %v2293_v27, %v2296_v37 }
 0x11b   :  { %v2316_v12 = vsel %vm2306_vm1, %v2302_v53, 1326507024  ;;  %4331 = vsinq.f32 %v568_v11  ;;  %v573_v6 = vadd.s32 3, %v569_v30  ;;  %vm5552_vm4 = vcmp.le.f32.partialorder %v584_v26, 0.7853982 }
 0x11c   :  { %v2235_v20 = vclz %v3953_v56  ;;  %v673_v34 = vsel %vm5552_vm4, 0, %v671_v22  ;;  %v2317_v63 = vsel %vm2305_vm2, %v2299_v0, %v2316_v12  ;;  %vm5565_vm5 = vcmp.le.f32.partialorder %v2167_v15, 0.7853982 }
 0x11d   :  { %v5559_v4 = vmul.u32.u64.low %v2319_v8, %v2314_v61  ;;  %v5560_v58 = vmul.u32.u64.high %v2319_v8, %v2314_v61, %v5559_v4  ;;  %v2310_v7 = vsel %vm2304_vm3, %v2307_v18, %v2309_v36  ;;  %v2318_v35 = vsel %vm2304_vm3, %v2315_v29, %v2317_v63  ;;  %v5613_v29 = vld [vmem:[%s7717_s1] ss:$0 sm:$0xff] }
 0x11e   :  { %v3954_v26 = vadd.s32 4294967294, %v2235_v20  ;;  %v691_v25 = vand.u32 2139095040, %v5541_v3  ;;  %v668_v39 = vxor.u32 2147483648, %v667_v28  ;;  %v2253_v48 = vsub.s32 4, %v5512_v2 }
 0x11f   :  { %v5573_v17 = vmul.u32.u64.low %v2319_v8, %v2318_v35  ;;  %v5574_v14 = vmul.u32.u64.high %v2319_v8, %v2318_v35, %v5573_v17  ;;  %v5576_v51 = vand.u32 3, %v573_v6  ;;  %v2223_v15 = vadd.s32 %v5473_v19, %v5481_v16 }
 0x120   :  { %vm3955_vm6 = vcmp.lt.s32.totalorder %v3954_v26, 0  ;;  %v692_v38 = vshrl.u32 %v691_v25, 23  ;;  %v677_v60 = vadd.s32 3, %v673_v34  ;;  %v2326_v27 = vmul.u32 %v2319_v8, %v2310_v7 }
 0x121   :  { %v2238_v13 = vsel %vm3955_vm6, 0, %v3954_v26  ;;  %v2329_v50 = vadd.s32 1, %v5560_v58  ;;  %v5581_v0 = vpop.eup %4329  ;;  %vm2169_vm7 = vcmp.lt.s32.totalorder %v5338_v62, 0  ;;  %v669_v30 = vsel %vm586_vm13, %v668_v39, %v667_v28 }
 0x122   :  { %v2239_v41 = vsub.s32 32, %v2238_v13  ;;  %v2240_v43 = vshll.u32 %v5522_v9, %v2238_v13  ;;  %v2243_v37 = vsub.s32 4294967266, %v2238_v13  ;;  %v2254_v19 = vsel %vm2169_vm7, %v2253_v48, %v5512_v2  ;;  %v5596_v9 = vld [vmem:[%s7716_s0 + $0x38] sm:$0xff] }
 0x123   :  { %vm2328_vm8 = vc.u32 %v5574_v14, %v5559_v4  ;;  %v3895_v16 = vadd.s32 4294967169, %v692_v38  ;;  %v688_v46 = vand.u32 2147483647, %v5541_v3  ;;  %vm579_vm9 = vcmp.eq.s32.totalorder %v5576_v51, 2 }
 0x124   :  { %v2241_v22 = vshrl.u32 %v2223_v15, %v2239_v41  ;;  %v2244_v53 = vadd.s32 127, %v2243_v37  ;;  %v2330_v45 = vsel %vm2328_vm8, %v2329_v50, %v5560_v58  ;;  %v5600_v55 = vand.u32 3, %v677_v60 }
 0x125   :  { %v2331_v2 = vadd.s32 %v2330_v45, %v2326_v27  ;;  %v698_v1 = vadd.s32 1, %v3895_v16  ;;  %v5602_v8 = vpop.eup %4331  ;;  %v580_v28 = vxor.u32 2147483648, %v5581_v0  ;;  %v672_v56 = vsel %vm5552_vm4, %v5195_v24, %v669_v30 }
 0x126   :  { %v2242_v18 = vor.u32 %v2241_v22, %v2240_v43  ;;  %v2245_v33 = vshll.u32 %v2244_v53, 23  ;;  %v2256_v36 = vsel %vm5565_vm5, 0, %v2254_v19  ;;  %v5617_v12 = vmul.f32 %v5613_v29, %v5596_v9 }
 0x127   :  { %v2332_v61 = vadd.s32 536870912, %v2331_v2  ;;  %vm699_vm10 = vcmp.gt.s32.totalorder %v698_v1, 0  ;;  %v695_v52 = vand.u32 8388607, %v688_v46  ;;  %v577_v63 = vxor.u32 2147483648, %v5602_v8 }
 0x128   :  { %v2246_v6 = vor.u32 4788187, %v2245_v33  ;;  %v2249_v20 = vcvt.s32.f32 %v2242_v18  ;;  %v700_v34 = vsel %vm699_vm10, %v698_v1, 0  ;;  %4333 = vcosq.f32 %v672_v56 }
 0x129   :  { %v5622_v58 = vshrl.u32 %v2332_v61, 30  ;;  %v702_v26 = vand.u32 31, %v700_v34  ;;  %v5627_v7 = vsel %vm579_vm9, %v580_v28, %v5602_v8  ;;  %4335 = vsinq.f32 %v672_v56 }
 0x12a   :  { %v2247_v35 = vand.u32 2147483647, %v2246_v6  ;;  %v5629_v25 = vadd.s32 3, %v2256_v36  ;;  %v792_v17 = vand.u32 2147483647, %v5617_v12  ;;  %v795_v15 = vand.u32 2139095040, %v5617_v12 }
 0x12b   :  { %v2334_v39 = vshll.u32 %v5622_v58, 30  ;;  %v703_v48 = vsub.s32 32, %v702_v26  ;;  %v696_v60 = vor.u32 8388608, %v695_v52  ;;  %v701_v13 = vshrl.u32 %v700_v34, 5 }
 0x12c   :  { %v2250_v38 = vmul.f32 %v2249_v20, %v2247_v35  ;;  %v705_v27 = vshll.u32 %v4457_v40, %v702_v26  ;;  %v708_v43 = vshll.u32 %v7733_v42, %v702_v26  ;;  %v711_v37 = vshll.u32 %v7731_v44, %v702_v26 }
 0x12d   :  { %v5635_v50 = vsub.s32 %v2331_v2, %v2334_v39  ;;  %v706_v41 = vshrl.u32 %v7733_v42, %v703_v48  ;;  %v709_v19 = vshrl.u32 %v7731_v44, %v703_v48  ;;  %v712_v16 = vshrl.u32 %v7727_v47, %v703_v48 }
 0x12e   :  { %v2251_v30 = vxor.u32 2147483648, %v2250_v38  ;;  %v714_v22 = vshll.u32 %v7727_v47, %v702_v26  ;;  %v2327_v53 = vadd.s32 %v5559_v4, %v5574_v14  ;;  %v715_v2 = vshrl.u32 %v4461_v49, %v703_v48 }
 0x12f   :  { %v2337_v45 = vsub.s32 0, %v5635_v50  ;;  %v796_v1 = vshrl.u32 %v795_v15, 23  ;;  %vm576_vm11 = vcmp.eq.s32.totalorder %v5576_v51, 0  ;;  %v704_v56 = vshrl.u32 %v4457_v40, %v703_v48 }
 0x130   :  { %v2252_v28 = vsel %vm2169_vm7, %v2251_v30, %v2250_v38  ;;  %v717_v18 = vshll.u32 %v4461_v49, %v702_v26  ;;  %v5652_v33 = vshll.u32 %v696_v60, 8  ;;  %v707_v36 = vor.u32 %v706_v41, %v705_v27 }
 0x131   :  { %v2255_v4 = vsel %vm5565_vm5, %v5338_v62, %v2252_v28  ;;  %v3957_v14 = vmin.u32 %v2337_v45, %v5635_v50  ;;  %v710_v61 = vor.u32 %v709_v19, %v708_v43  ;;  %v713_v6 = vor.u32 %v712_v16, %v711_v37 }
 0x132   :  { %v716_v20 = vor.u32 %v715_v2, %v714_v22  ;;  %v718_v52 = vshrl.u32 %v4462_v57, %v703_v48  ;;  %vm720_vm12 = vcmp.lt.s32.totalorder %v701_v13, 1  ;;  %v5659_v34 = vpop.eup %4333  ;;  %vm575_vm14 = vcmp.lt.s32.totalorder %v5576_v51, 2 }
 0x133   :  { %4337 = vcosq.f32 %v2255_v4  ;;  %vm2273_vm0 = vcmp.lt.s32.totalorder %v5421_v59, 0  ;;  %v2339_v26 = vclz %v3957_v14  ;;  %v2357_v11 = vsub.s32 4, %v5622_v58  ;;  %v5664_v39 = vpop.eup %4335 }
 0x134   :  { %v3899_v35 = vadd.s32 4294967169, %v796_v1  ;;  %v719_v15 = vor.u32 %v718_v52, %v717_v18  ;;  %vm721_vm13 = vcmp.lt.s32.totalorder %v701_v13, 2  ;;  %vm722_vm15 = vcmp.lt.s32.totalorder %v701_v13, 3 }
 0x135   :  { %vm723_vm1 = vcmp.lt.s32.totalorder %v701_v13, 4  ;;  %v3958_v38 = vadd.s32 4294967294, %v2339_v26  ;;  %v724_v48 = vsel %vm720_vm12, %v704_v56, %v707_v36  ;;  %v728_v27 = vsel %vm720_vm12, %v707_v36, %v710_v61 }
 0x136   :  { %v725_v60 = vsel %vm723_vm1, %v713_v6, 2102212464  ;;  %vm5670_vm2 = vcmp.le.f32.partialorder %v2271_v32, 0.7853982  ;;  %v729_v37 = vsel %vm723_vm1, %v716_v20, 920167782  ;;  %v732_v30 = vsel %vm720_vm12, %v710_v61, %v713_v6 }
 0x137   :  { %v726_v43 = vsel %vm722_vm15, %v710_v61, %v725_v60  ;;  %v733_v19 = vsel %vm723_vm1, %v719_v15, 1326507024  ;;  %4339 = vsinq.f32 %v2255_v4  ;;  %vm3959_vm3 = vcmp.lt.s32.totalorder %v3958_v38, 0 }
 0x138   :  { %v730_v16 = vsel %vm722_vm15, %v713_v6, %v729_v37  ;;  %v734_v22 = vsel %vm722_vm15, %v716_v20, %v733_v19  ;;  %v2342_v45 = vsel %vm3959_vm3, 0, %v3958_v38  ;;  %v727_v2 = vsel %vm721_vm13, %v724_v48, %v726_v43 }
 0x139   :  { %v731_v1 = vsel %vm721_vm13, %v728_v27, %v730_v16  ;;  %v735_v28 = vsel %vm721_vm13, %v732_v30, %v734_v22  ;;  %v2343_v32 = vsub.s32 32, %v2342_v45  ;;  %v2344_v56 = vshll.u32 %v5635_v50, %v2342_v45 }
 0x13a   :  { %v2347_v18 = vsub.s32 4294967266, %v2342_v45  ;;  %v802_v14 = vadd.s32 1, %v3899_v35  ;;  %v5680_v36 = vmul.u32.u64.low %v5652_v33, %v735_v28  ;;  %v5681_v61 = vmul.u32.u64.high %v5652_v33, %v735_v28, %v5680_v36 }
 0x13b   :  { %v5684_v4 = vmul.u32.u64.low %v5652_v33, %v731_v1  ;;  %v5685_v6 = vmul.u32.u64.high %v5652_v33, %v731_v1, %v5684_v4  ;;  %v578_v13 = vsel %vm576_vm11, %v5581_v0, %v577_v63  ;;  %v2345_v20 = vshrl.u32 %v2327_v53, %v2343_v32 }
 0x13c   :  { %v2348_v52 = vadd.s32 127, %v2347_v18  ;;  %vm803_vm4 = vcmp.gt.s32.totalorder %v802_v14, 0  ;;  %vm683_vm5 = vcmp.eq.s32.totalorder %v5600_v55, 2  ;;  %v5695_v50 = vand.u32 3, %v5629_v25 }
 0x13d   :  { %v2358_v26 = vsel %vm2273_vm0, %v2357_v11, %v5622_v58  ;;  %v804_v35 = vsel %vm803_vm4, %v802_v14, 0  ;;  %v4338_v15 = vpop.eup %4337  ;;  %v684_v8 = vxor.u32 2147483648, %v5659_v34  ;;  %v2346_v38 = vor.u32 %v2345_v20, %v2344_v56 }
 0x13e   :  { %v2349_v48 = vshll.u32 %v2348_v52, 23  ;;  %v743_v0 = vmul.u32 %v5652_v33, %v727_v2  ;;  %v5705_v63 = vsel %vm575_vm14, %v578_v13, %v5627_v7  ;;  %vm745_vm6 = vc.u32 %v5681_v61, %v5684_v4 }
 0x13f   :  { %v746_v25 = vadd.s32 1, %v5685_v6  ;;  %v799_v58 = vand.u32 8388607, %v792_v17  ;;  %v2353_v11 = vcvt.s32.f32 %v2346_v38  ;;  %v2360_v60 = vsel %vm5670_vm2, 0, %v2358_v26 }
 0x140   :  { %v2350_v53 = vor.u32 4788187, %v2349_v48  ;;  %v806_v27 = vand.u32 31, %v804_v35  ;;  %v681_v33 = vxor.u32 2147483648, %v5664_v39  ;;  %vm2263_vm7 = vcmp.eq.s32.totalorder %v5695_v50, 0 }
 0x141   :  { %vm2266_vm8 = vcmp.eq.s32.totalorder %v5695_v50, 2  ;;  %v747_v51 = vsel %vm745_vm6, %v746_v25, %v5685_v6  ;;  %v4340_v7 = vpop.eup %4339  ;;  %v5721_v43 = vsel %vm683_vm5, %v684_v8, %v5664_v39  ;;  %v2364_v16 = vadd.s32 3, %v2360_v60 }
 0x142   :  { %v2351_v37 = vand.u32 2147483647, %v2350_v53  ;;  %v748_v30 = vadd.s32 %v747_v51, %v743_v0  ;;  %v807_v19 = vsub.s32 32, %v806_v27  ;;  %v800_v22 = vor.u32 8388608, %v799_v58 }
 0x143   :  { %v5723_v45 = vshrl.u32 %v804_v35, 5  ;;  %v809_v2 = vshll.u32 %v4457_v40, %v806_v27  ;;  %vm2262_vm9 = vcmp.lt.s32.totalorder %v5695_v50, 2  ;;  %v812_v32 = vshll.u32 %v7733_v42, %v806_v27 }
 0x144   :  { %v2354_v1 = vmul.f32 %v2353_v11, %v2351_v37  ;;  %v749_v28 = vadd.s32 536870912, %v748_v30  ;;  %v815_v56 = vshll.u32 %v7731_v44, %v806_v27  ;;  %vm680_vm10 = vcmp.eq.s32.totalorder %v5600_v55, 0 }
 0x145   :  { %v810_v18 = vshrl.u32 %v7733_v42, %v807_v19  ;;  %v813_v14 = vshrl.u32 %v7731_v44, %v807_v19  ;;  %v816_v36 = vshrl.u32 %v7727_v47, %v807_v19  ;;  %v818_v6 = vshll.u32 %v7727_v47, %v806_v27 }
 0x146   :  { %v2267_v13 = vxor.u32 2147483648, %v4338_v15  ;;  %v2355_v20 = vxor.u32 2147483648, %v2354_v1  ;;  %v5734_v52 = vshrl.u32 %v749_v28, 30  ;;  %v819_v26 = vshrl.u32 %v4461_v49, %v807_v19 }
 0x147   :  { %vm572_vm11 = vweird.f32 %v5136_v31  ;;  %vm2259_vm12 = vweird.f32 %v5338_v62  ;;  %v2264_v35 = vxor.u32 2147483648, %v4340_v7  ;;  %v821_v8 = vshll.u32 %v4461_v49, %v806_v27 }
 0x148   :  { %vm824_vm14 = vcmp.lt.s32.totalorder %v5723_v45, 1  ;;  %v5741_v38 = vshll.u32 %v800_v22, 8  ;;  %vm679_vm13 = vcmp.lt.s32.totalorder %v5600_v55, 2  ;;  %v2356_v48 = vsel %vm2273_vm0, %v2355_v20, %v2354_v1 }
 0x149   :  { %v751_v0 = vshll.u32 %v5734_v52, 30  ;;  %v811_v25 = vor.u32 %v810_v18, %v809_v2  ;;  %v814_v58 = vor.u32 %v813_v14, %v812_v32  ;;  %v2359_v53 = vsel %vm5670_vm2, %v5421_v59, %v2356_v48  ;;  %v5775_v14 = vld [vmem:[%s7718_s2] ss:$0 sm:$0xff] }
 0x14a   :  { %v817_v11 = vor.u32 %v816_v36, %v815_v56  ;;  %v820_v60 = vor.u32 %v819_v26, %v818_v6  ;;  %v822_v27 = vshrl.u32 %v4462_v57, %v807_v19  ;;  %v2268_v51 = vsel %vm2266_vm8, %v2267_v13, %v4340_v7 }
 0x14b   :  { %4341 = vcosq.f32 %v2359_v53  ;;  %v5753_v37 = vsub.s32 %v748_v30, %v751_v0  ;;  %vm827_vm0 = vcmp.lt.s32.totalorder %v5723_v45, 4  ;;  %v2265_v22 = vsel %vm2263_vm7, %v4338_v15, %v2264_v35 }
 0x14c   :  { %4343 = vsinq.f32 %v2359_v53  ;;  %v823_v2 = vor.u32 %v822_v27, %v821_v8  ;;  %vm826_vm15 = vcmp.lt.s32.totalorder %v5723_v45, 3  ;;  %v808_v1 = vshrl.u32 %v4457_v40, %v807_v19 }
 0x14d   :  { %v754_v41 = vsub.s32 0, %v5753_v37  ;;  %vm825_vm1 = vcmp.lt.s32.totalorder %v5723_v45, 2  ;;  %v832_v7 = vsel %vm824_vm14, %v811_v25, %v814_v58  ;;  %vm676_vm2 = vweird.f32 %v5195_v24 }
 0x14e   :  { %v829_v30 = vsel %vm827_vm0, %v817_v11, 2102212464  ;;  %v833_v28 = vsel %vm827_vm0, %v820_v60, 920167782  ;;  %v836_v15 = vsel %vm824_vm14, %v814_v58, %v817_v11  ;;  %v837_v32 = vsel %vm827_vm0, %v823_v2, 1326507024 }
 0x14f   :  { %v3896_v56 = vmin.u32 %v754_v41, %v5753_v37  ;;  %v834_v18 = vsel %vm826_vm15, %v817_v11, %v833_v28  ;;  %v838_v19 = vsel %vm826_vm15, %v820_v60, %v837_v32  ;;  %v5779_v36 = vmul.f32 %v5775_v14, %v5528_v5 }
 0x150   :  { %v2269_v6 = vsel %vm2262_vm9, %v2265_v22, %v2268_v51  ;;  %vm2363_vm3 = vweird.f32 %v5421_v59  ;;  %v2365_v13 = vand.u32 3, %v2364_v16  ;;  %v835_v20 = vsel %vm825_vm1, %v832_v7, %v834_v18 }
 0x151   :  { %v839_v26 = vsel %vm825_vm1, %v836_v15, %v838_v19  ;;  %v682_v35 = vsel %vm680_vm10, %v5659_v34, %v681_v33  ;;  %v756_v5 = vclz %v3896_v56  ;;  %v828_v50 = vsel %vm824_vm14, %v808_v1, %v811_v25  ;;  %v3436_v19 = vld [vmem:[%s7719_s3 + $0x28] sm:$0xff] }
 0x152   :  { %v830_v8 = vsel %vm826_vm15, %v814_v58, %v829_v30  ;;  %v5798_v16 = vmul.u32.u64.low %v5741_v38, %v839_v26  ;;  %v5799_v48 = vmul.u32.u64.high %v5741_v38, %v839_v26, %v5798_v16  ;;  %v583_v34 = vsel %vm572_vm11, nan, %v5705_v63 }
 0x153   :  { %v5802_v0 = vmul.u32.u64.low %v5741_v38, %v835_v20  ;;  %v5803_v53 = vmul.u32.u64.high %v5741_v38, %v835_v20, %v5802_v0  ;;  %v2270_v39 = vsel %vm2259_vm12, nan, %v2269_v6  ;;  %v3897_v33 = vadd.s32 4294967294, %v756_v5 }
 0x154   :  { %v2378_v25 = vand.u32 2139095040, %v5779_v36  ;;  %v686_v58 = vsel %vm679_vm13, %v682_v35, %v5721_v43  ;;  %vm2366_vm4 = vcmp.lt.s32.totalorder %v2365_v13, 2  ;;  %vm2367_vm5 = vcmp.eq.s32.totalorder %v2365_v13, 0 }
 0x155   :  { %v831_v11 = vsel %vm825_vm1, %v828_v50, %v830_v8  ;;  %v4342_v60 = vpop.eup %4341  ;;  %vm2370_vm6 = vcmp.eq.s32.totalorder %v2365_v13, 2  ;;  %vm3898_vm7 = vcmp.lt.s32.totalorder %v3897_v33, 0  ;;  %v5819_v31 = vmul.f32 %v5775_v14, %v5596_v9  ;;  %v3435_v9 = vld [vmem:[%s7719_s3 + $0x20] sm:$0xff] }
 0x156   :  { %v2379_v62 = vshrl.u32 %v2378_v25, 23  ;;  %v4344_v63 = vpop.eup %4343  ;;  %v2371_v27 = vxor.u32 2147483648, %v4342_v60  ;;  %v3419_v51 = vsub.f32 %v583_v34, %v2270_v39  ;;  %v744_v55 = vadd.s32 %v5684_v4, %v5681_v61 }
 0x157   :  { %v759_v43 = vsel %vm3898_vm7, 0, %v3897_v33  ;;  %v2368_v22 = vxor.u32 2147483648, %v4344_v63  ;;  %v847_v45 = vmul.u32 %v5741_v38, %v831_v11  ;;  %vm849_vm8 = vc.u32 %v5799_v48, %v5802_v0 }
 0x158   :  { %v764_v2 = vsub.s32 4294967266, %v759_v43  ;;  %v2372_v41 = vsel %vm2370_vm6, %v2371_v27, %v4344_v63  ;;  %v760_v1 = vsub.s32 32, %v759_v43  ;;  %v850_v7 = vadd.s32 1, %v5803_v53 }
 0x159   :  { %v3960_v30 = vadd.s32 4294967169, %v2379_v62  ;;  %v687_v61 = vsel %vm676_vm2, nan, %v686_v58  ;;  %v2369_v4 = vsel %vm2367_vm5, %v4342_v60, %v2368_v22  ;;  %v2375_v32 = vand.u32 2147483647, %v5779_v36 }
 0x15a   :  { %v765_v28 = vadd.s32 127, %v764_v2  ;;  %v2373_v38 = vsel %vm2366_vm4, %v2369_v4, %v2372_v41  ;;  %v851_v15 = vsel %vm849_vm8, %v850_v7, %v5803_v53  ;;  %v5841_v6 = vmul.f32 %v3435_v9, %v3419_v51 }
 0x15b   :  { %v2385_v56 = vadd.s32 1, %v3960_v30  ;;  %v2374_v18 = vsel %vm2363_vm3, nan, %v2373_v38  ;;  %v852_v24 = vadd.s32 %v851_v15, %v847_v45  ;;  %v2482_v20 = vand.u32 2139095040, %v5819_v31 }
 0x15c   :  { %v3420_v26 = vsub.f32 %v687_v61, %v2374_v18  ;;  %v761_v13 = vshll.u32 %v5753_v37, %v759_v43  ;;  %v762_v35 = vshrl.u32 %v744_v55, %v760_v1  ;;  %v766_v5 = vshll.u32 %v765_v28, 23 }
 0x15d   :  { %vm2386_vm9 = vcmp.gt.s32.totalorder %v2385_v56, 0  ;;  %v853_v50 = vadd.s32 536870912, %v852_v24  ;;  %vm690_vm10 = vcmp.lt.s32.totalorder %v5541_v3, 0  ;;  %v774_v53 = vsub.s32 4, %v5734_v52 }
 0x15e   :  { %v2387_v8 = vsel %vm2386_vm9, %v2385_v56, 0  ;;  %v5845_v16 = vmul.f32 %v3436_v19, %v3420_v26  ;;  %v2483_v39 = vshrl.u32 %v2482_v20, 23  ;;  %v763_v25 = vor.u32 %v762_v35, %v761_v13 }
 0x15f   :  { %v2389_v59 = vand.u32 31, %v2387_v8  ;;  %v5849_v34 = vshrl.u32 %v853_v50, 30  ;;  %v2382_v37 = vand.u32 8388607, %v2375_v32  ;;  %v767_v11 = vor.u32 4788187, %v766_v5 }
 0x160   :  { %v3465_v33 = vpack.c.bf16 %v5845_v16, %v5841_v6  ;;  %v2388_v2 = vshrl.u32 %v2387_v8, 5  ;;  %v3964_v41 = vadd.s32 4294967169, %v2483_v39  ;;  %vm5867_vm11 = vcmp.le.f32.partialorder %v688_v46, 0.7853982 }
 0x161   :  { %v2390_v58 = vsub.s32 32, %v2389_v59  ;;  %v855_v60 = vshll.u32 %v5849_v34, 30  ;;  %v2392_v62 = vshll.u32 %v4457_v40, %v2389_v59  ;;  %v2395_v63 = vshll.u32 %v7733_v42, %v2389_v59 }
 0x162   :  { %4055 = vmatprep.mubr.bf16.mxu0 %v3465_v33  ;;  %v2398_v55 = vshll.u32 %v7731_v44, %v2389_v59  ;;  %v2401_v45 = vshll.u32 %v7727_v47, %v2389_v59  ;;  %v770_v1 = vcvt.s32.f32 %v763_v25  ;;  %v775_v7 = vsel %vm690_vm10, %v774_v53, %v5734_v52 }
 0x163   :  { %v2393_v27 = vshrl.u32 %v7733_v42, %v2390_v58  ;;  %v2396_v51 = vshrl.u32 %v7731_v44, %v2390_v58  ;;  %v2399_v43 = vshrl.u32 %v7727_v47, %v2390_v58  ;;  %v5862_v22 = vsub.s32 %v852_v24, %v855_v60 }
 0x164   :  { %v2383_v30 = vor.u32 8388608, %v2382_v37  ;;  %v768_v61 = vand.u32 2147483647, %v767_v11  ;;  %v2402_v38 = vshrl.u32 %v4461_v49, %v2390_v58  ;;  %v2404_v18 = vshll.u32 %v4461_v49, %v2389_v59 }
 0x165   :  { %v858_v4 = vsub.s32 0, %v5862_v22  ;;  %v2394_v28 = vor.u32 %v2393_v27, %v2392_v62  ;;  %v2397_v15 = vor.u32 %v2396_v51, %v2395_v63  ;;  %v2400_v56 = vor.u32 %v2399_v43, %v2398_v55 }
 0x166   :  { %v2405_v46 = vshrl.u32 %v4462_v57, %v2390_v58  ;;  %v2403_v24 = vor.u32 %v2402_v38, %v2401_v45  ;;  %vm2407_vm12 = vcmp.lt.s32.totalorder %v2388_v2, 1  ;;  %v2489_v20 = vadd.s32 1, %v3964_v41 }
 0x167   :  { %v3900_v19 = vmin.u32 %v858_v4, %v5862_v22  ;;  %v777_v52 = vsel %vm5867_vm11, 0, %v775_v7  ;;  %v2391_v26 = vshrl.u32 %v4457_v40, %v2390_v58  ;;  %v2479_v35 = vand.u32 2147483647, %v5819_v31 }
 0x168   :  { %v2406_v13 = vor.u32 %v2405_v46, %v2404_v18  ;;  %v771_v5 = vmul.f32 %v770_v1, %v768_v61  ;;  %vm2409_vm14 = vcmp.lt.s32.totalorder %v2388_v2, 3  ;;  %v2423_v8 = vshll.u32 %v2383_v30, 8 }
 0x169   :  { %v860_v50 = vclz %v3900_v19  ;;  %vm2408_vm13 = vcmp.lt.s32.totalorder %v2388_v2, 2  ;;  %vm2410_vm0 = vcmp.lt.s32.totalorder %v2388_v2, 4  ;;  %v2415_v59 = vsel %vm2407_vm12, %v2394_v28, %v2397_v15 }
 0x16a   :  { %v2419_v53 = vsel %vm2407_vm12, %v2397_v15, %v2400_v56  ;;  %v2412_v33 = vsel %vm2410_vm0, %v2400_v56, 2102212464  ;;  %v2416_v25 = vsel %vm2410_vm0, %v2403_v24, 920167782  ;;  %vm2490_vm15 = vcmp.gt.s32.totalorder %v2489_v20, 0 }
 0x16b   :  { %v3901_v39 = vadd.s32 4294967294, %v860_v50  ;;  %v2411_v37 = vsel %vm2407_vm12, %v2391_v26, %v2394_v28  ;;  %v2413_v58 = vsel %vm2409_vm14, %v2397_v15, %v2412_v33  ;;  %v2417_v11 = vsel %vm2409_vm14, %v2400_v56, %v2416_v25 }
 0x16c   :  { %v2420_v60 = vsel %vm2410_vm0, %v2406_v13, 1326507024  ;;  %v2418_v62 = vsel %vm2408_vm13, %v2415_v59, %v2417_v11  ;;  %v2491_v27 = vsel %vm2490_vm15, %v2489_v20, 0  ;;  %v772_v41 = vxor.u32 2147483648, %v771_v5 }
 0x16d   :  { %vm3902_vm1 = vcmp.lt.s32.totalorder %v3901_v39, 0  ;;  %v2421_v63 = vsel %vm2409_vm14, %v2403_v24, %v2420_v60  ;;  %v5891_v43 = vmul.u32.u64.low %v2423_v8, %v2418_v62  ;;  %v5892_v45 = vmul.u32.u64.high %v2423_v8, %v2418_v62, %v5891_v43 }
 0x16e   :  { %v863_v51 = vsel %vm3902_vm1, 0, %v3901_v39  ;;  %v2422_v55 = vsel %vm2408_vm13, %v2419_v53, %v2421_v63  ;;  %v848_v1 = vadd.s32 %v5802_v0, %v5799_v48  ;;  %v2414_v30 = vsel %vm2408_vm13, %v2411_v37, %v2413_v58 }
 0x16f   :  { %v868_v7 = vsub.s32 4294967266, %v863_v51  ;;  %v864_v61 = vsub.s32 32, %v863_v51  ;;  %v5898_v4 = vmul.u32.u64.low %v2423_v8, %v2422_v55  ;;  %v5899_v28 = vmul.u32.u64.high %v2423_v8, %v2422_v55, %v5898_v4 }
 0x170   :  { %v2493_v38 = vand.u32 31, %v2491_v27  ;;  %v2486_v56 = vand.u32 8388607, %v2479_v35  ;;  %v2430_v18 = vmul.u32 %v2423_v8, %v2414_v30  ;;  %v2433_v46 = vadd.s32 1, %v5892_v45  ;;  %v5932_v4 = vld [vmem:[%s7716_s0 + $0x40] sm:$0xff] }
 0x171   :  { %v869_v15 = vadd.s32 127, %v868_v7  ;;  %v773_v24 = vsel %vm690_vm10, %v772_v41, %v771_v5  ;;  %v781_v48 = vadd.s32 3, %v777_v52  ;;  %v865_v0 = vshll.u32 %v5862_v22, %v863_v51 }
 0x172   :  { %v2494_v19 = vsub.s32 32, %v2493_v38  ;;  %v866_v2 = vshrl.u32 %v848_v1, %v864_v61  ;;  %vm2432_vm2 = vc.u32 %v5899_v28, %v5891_v43  ;;  %v2487_v13 = vor.u32 8388608, %v2486_v56 }
 0x173   :  { %v870_v20 = vshll.u32 %v869_v15, 23  ;;  %v2434_v26 = vsel %vm2432_vm2, %v2433_v46, %v5892_v45  ;;  %v2496_v50 = vshll.u32 %v4457_v40, %v2493_v38  ;;  %v2499_v8 = vshll.u32 %v7733_v42, %v2493_v38 }
 0x174   :  { %v2435_v59 = vadd.s32 %v2434_v26, %v2430_v18  ;;  %v2492_v53 = vshrl.u32 %v2491_v27, 5  ;;  %v2497_v39 = vshrl.u32 %v7733_v42, %v2494_v19  ;;  %v2500_v52 = vshrl.u32 %v7731_v44, %v2494_v19 }
 0x175   :  { %v776_v22 = vsel %vm5867_vm11, %v5541_v3, %v773_v24  ;;  %v878_v5 = vsub.s32 4, %v5849_v34  ;;  %v2502_v33 = vshll.u32 %v7731_v44, %v2493_v38  ;;  %v2503_v25 = vshrl.u32 %v7727_v47, %v2494_v19 }
 0x176   :  { %v867_v37 = vor.u32 %v866_v2, %v865_v0  ;;  %v871_v58 = vor.u32 4788187, %v870_v20  ;;  %v2436_v11 = vadd.s32 536870912, %v2435_v59  ;;  %v2505_v60 = vshll.u32 %v7727_v47, %v2493_v38 }
 0x177   :  { %v2498_v62 = vor.u32 %v2497_v39, %v2496_v50  ;;  %v2501_v63 = vor.u32 %v2500_v52, %v2499_v8  ;;  %v2506_v27 = vshrl.u32 %v4461_v49, %v2494_v19  ;;  %v2508_v51 = vshll.u32 %v4461_v49, %v2493_v38 }
 0x178   :  { %4345 = vcosq.f32 %v776_v22  ;;  %v5923_v9 = vshrl.u32 %v2436_v11, 30  ;;  %v2509_v55 = vshrl.u32 %v4462_v57, %v2494_v19  ;;  %vm2511_vm3 = vcmp.lt.s32.totalorder %v2492_v53, 1 }
 0x179   :  { %v2504_v45 = vor.u32 %v2503_v25, %v2502_v33  ;;  %v2507_v41 = vor.u32 %v2506_v27, %v2505_v60  ;;  %vm2514_vm4 = vcmp.lt.s32.totalorder %v2492_v53, 4  ;;  %v5926_v1 = vshll.u32 %v2487_v13, 8 }
 0x17a   :  { %v872_v7 = vand.u32 2147483647, %v871_v58  ;;  %v874_v30 = vcvt.s32.f32 %v867_v37  ;;  %v2438_v61 = vshll.u32 %v5923_v9, 30  ;;  %vm2513_vm5 = vcmp.lt.s32.totalorder %v2492_v53, 3 }
 0x17b   :  { %v2510_v38 = vor.u32 %v2509_v55, %v2508_v51  ;;  %vm2512_vm6 = vcmp.lt.s32.totalorder %v2492_v53, 2  ;;  %v2519_v15 = vsel %vm2511_vm3, %v2498_v62, %v2501_v63  ;;  %v2520_v56 = vsel %vm2514_vm4, %v2507_v41, 920167782 }
 0x17c   :  { %4347 = vsinq.f32 %v776_v22  ;;  %vm794_vm7 = vcmp.lt.s32.totalorder %v5617_v12, 0  ;;  %v5937_v18 = vsub.s32 %v2435_v59, %v2438_v61  ;;  %v2495_v46 = vshrl.u32 %v4457_v40, %v2494_v19 }
 0x17d   :  { %v5940_v24 = vand.u32 3, %v781_v48  ;;  %v2516_v0 = vsel %vm2514_vm4, %v2504_v45, 2102212464  ;;  %v2521_v2 = vsel %vm2513_vm5, %v2504_v45, %v2520_v56  ;;  %v5946_v20 = vmul.f32 %v5613_v29, %v5932_v4 }
 0x17e   :  { %v875_v26 = vmul.f32 %v874_v30, %v872_v7  ;;  %v879_v13 = vsel %vm794_vm7, %v878_v5, %v5849_v34  ;;  %v2441_v50 = vsub.s32 0, %v5937_v18  ;;  %v2522_v8 = vsel %vm2512_vm6, %v2519_v15, %v2521_v2 }
 0x17f   :  { %v2523_v19 = vsel %vm2511_vm3, %v2501_v63, %v2504_v45  ;;  %v2524_v48 = vsel %vm2514_vm4, %v2510_v38, 1326507024  ;;  %v5956_v59 = vmul.u32.u64.low %v5926_v1, %v2522_v8  ;;  %v5957_v39 = vmul.u32.u64.high %v5926_v1, %v2522_v8, %v5956_v59 }
 0x180   :  { %v3961_v52 = vmin.u32 %v2441_v50, %v5937_v18  ;;  %v2515_v22 = vsel %vm2511_vm3, %v2495_v46, %v2498_v62  ;;  %v2517_v33 = vsel %vm2513_vm5, %v2501_v63, %v2516_v0  ;;  %v2525_v34 = vsel %vm2513_vm5, %v2507_v41, %v2524_v48  ;;  %v6000_v0 = vld [vmem:[%s7716_s0 + $0x48] sm:$0xff] }
 0x181   :  { %vm5966_vm8 = vcmp.le.f32.partialorder %v792_v17, 0.7853982  ;;  %v2526_v25 = vsel %vm2512_vm6, %v2523_v19, %v2525_v34  ;;  %v899_v37 = vand.u32 2139095040, %v5946_v20  ;;  %v876_v11 = vxor.u32 2147483648, %v875_v26 }
 0x182   :  { %v4346_v58 = vpop.eup %4345  ;;  %v881_v60 = vsel %vm5966_vm8, 0, %v879_v13  ;;  %vm2377_vm9 = vcmp.lt.s32.totalorder %v5779_v36, 0  ;;  %v2443_v62 = vclz %v3961_v52  ;;  %v2518_v63 = vsel %vm2512_vm6, %v2515_v22, %v2517_v33 }
 0x183   :  { %v5977_v27 = vmul.u32.u64.low %v5926_v1, %v2526_v25  ;;  %v5978_v17 = vmul.u32.u64.high %v5926_v1, %v2526_v25, %v5977_v27  ;;  %v900_v51 = vshrl.u32 %v899_v37, 23  ;;  %vm784_vm10 = vcmp.eq.s32.totalorder %v5940_v24, 0 }
 0x184   :  { %vm5983_vm11 = vcmp.le.f32.partialorder %v2375_v32, 0.7853982  ;;  %v3962_v45 = vadd.s32 4294967294, %v2443_v62  ;;  %v2461_v41 = vsub.s32 4, %v5923_v9  ;;  %vm787_vm12 = vcmp.eq.s32.totalorder %v5940_v24, 2 }
 0x185   :  { %v885_v53 = vadd.s32 3, %v881_v60  ;;  %v2537_v7 = vadd.s32 1, %v5957_v39  ;;  %v3903_v30 = vadd.s32 4294967169, %v900_v51  ;;  %v877_v38 = vsel %vm794_vm7, %v876_v11, %v875_v26 }
 0x186   :  { %v4348_v61 = vpop.eup %4347  ;;  %v2431_v15 = vadd.s32 %v5891_v43, %v5899_v28  ;;  %vm3963_vm14 = vcmp.lt.s32.totalorder %v3962_v45, 0  ;;  %v2534_v32 = vmul.u32 %v5926_v1, %v2518_v63  ;;  %v788_v56 = vxor.u32 2147483648, %v4346_v58 }
 0x187   :  { %v2446_v46 = vsel %vm3963_vm14, 0, %v3962_v45  ;;  %vm2536_vm13 = vc.u32 %v5978_v17, %v5956_v59  ;;  %v906_v2 = vadd.s32 1, %v3903_v30  ;;  %v2462_v43 = vsel %vm2377_vm9, %v2461_v41, %v5923_v9 }
 0x188   :  { %v2447_v13 = vsub.s32 32, %v2446_v46  ;;  %v2448_v26 = vshll.u32 %v5937_v18, %v2446_v46  ;;  %v2451_v50 = vsub.s32 4294967266, %v2446_v46  ;;  %v785_v28 = vxor.u32 2147483648, %v4348_v61 }
 0x189   :  { %v880_v1 = vsel %vm5966_vm8, %v5617_v12, %v877_v38  ;;  %v2538_v8 = vsel %vm2536_vm13, %v2537_v7, %v5957_v39  ;;  %vm907_vm0 = vcmp.gt.s32.totalorder %v906_v2, 0  ;;  %v6012_v22 = vmul.f32 %v5613_v29, %v6000_v0 }
 0x18a   :  { %v2449_v19 = vshrl.u32 %v2431_v15, %v2447_v13  ;;  %v2452_v48 = vadd.s32 127, %v2451_v50  ;;  %v2539_v52 = vadd.s32 %v2538_v8, %v2534_v32  ;;  %v6014_v18 = vand.u32 3, %v885_v53 }
 0x18b   :  { %v2464_v9 = vsel %vm5983_vm11, 0, %v2462_v43  ;;  %v896_v33 = vand.u32 2147483647, %v5946_v20  ;;  %v908_v34 = vsel %vm907_vm0, %v906_v2, 0  ;;  %4349 = vcosq.f32 %v880_v1 }
 0x18c   :  { %v2450_v5 = vor.u32 %v2449_v19, %v2448_v26  ;;  %v2453_v25 = vshll.u32 %v2452_v48, 23  ;;  %v2540_v39 = vadd.s32 536870912, %v2539_v52  ;;  %v6021_v37 = vsel %vm784_vm10, %v4346_v58, %v785_v28 }
 0x18d   :  { %v6025_v29 = vsel %vm787_vm12, %v788_v56, %v4348_v61  ;;  %4351 = vsinq.f32 %v880_v1  ;;  %v910_v11 = vand.u32 31, %v908_v34  ;;  %v6027_v63 = vadd.s32 3, %v2464_v9 }
 0x18e   :  { %v2454_v60 = vor.u32 4788187, %v2453_v25  ;;  %v2457_v62 = vcvt.s32.f32 %v2450_v5  ;;  %v6029_v27 = vshrl.u32 %v2540_v39, 30  ;;  %v903_v51 = vand.u32 8388607, %v896_v33 }
 0x18f   :  { %v909_v45 = vshrl.u32 %v908_v34, 5  ;;  %v911_v41 = vsub.s32 32, %v910_v11  ;;  %v1003_v58 = vand.u32 2139095040, %v6012_v22  ;;  %v913_v30 = vshll.u32 %v4457_v40, %v910_v11 }
 0x190   :  { %v2455_v53 = vand.u32 2147483647, %v2454_v60  ;;  %v2542_v7 = vshll.u32 %v6029_v27, 30  ;;  %v916_v61 = vshll.u32 %v7733_v42, %v910_v11  ;;  %v919_v32 = vshll.u32 %v7731_v44, %v910_v11 }
 0x191   :  { %v914_v38 = vshrl.u32 %v7733_v42, %v911_v41  ;;  %v917_v15 = vshrl.u32 %v7731_v44, %v911_v41  ;;  %v920_v56 = vshrl.u32 %v7727_v47, %v911_v41  ;;  %v922_v13 = vshll.u32 %v7727_v47, %v910_v11 }
 0x192   :  { %v2458_v46 = vmul.f32 %v2457_v62, %v2455_v53  ;;  %v6041_v2 = vsub.s32 %v2539_v52, %v2542_v7  ;;  %v923_v26 = vshrl.u32 %v4461_v49, %v911_v41  ;;  %v2535_v50 = vadd.s32 %v5956_v59, %v5978_v17 }
 0x193   :  { %v904_v43 = vor.u32 8388608, %v903_v51  ;;  %v1000_v28 = vand.u32 2147483647, %v6012_v22  ;;  %v1004_v1 = vshrl.u32 %v1003_v58, 23  ;;  %v912_v48 = vshrl.u32 %v4457_v40, %v911_v41 }
 0x194   :  { %v2459_v8 = vxor.u32 2147483648, %v2458_v46  ;;  %v2545_v19 = vsub.s32 0, %v6041_v2  ;;  %v915_v9 = vor.u32 %v914_v38, %v913_v30  ;;  %v918_v34 = vor.u32 %v917_v15, %v916_v61 }
 0x195   :  { %v921_v52 = vor.u32 %v920_v56, %v919_v32  ;;  %v925_v5 = vshll.u32 %v4461_v49, %v910_v11  ;;  %v926_v25 = vshrl.u32 %v4462_v57, %v911_v41  ;;  %v6052_v39 = vpop.eup %4349  ;;  %v924_v60 = vor.u32 %v923_v26, %v922_v13 }
 0x196   :  { %v2460_v59 = vsel %vm2377_vm9, %v2459_v8, %v2458_v46  ;;  %v3965_v17 = vmin.u32 %v2545_v19, %v6041_v2  ;;  %vm928_vm15 = vcmp.lt.s32.totalorder %v909_v45, 1  ;;  %vm931_vm1 = vcmp.lt.s32.totalorder %v909_v45, 4 }
 0x197   :  { %v6057_v62 = vpop.eup %4351  ;;  %v2463_v51 = vsel %vm5983_vm11, %v5779_v36, %v2460_v59  ;;  %v927_v58 = vor.u32 %v926_v25, %v925_v5  ;;  %v3907_v11 = vadd.s32 4294967169, %v1004_v1  ;;  %vm929_vm2 = vcmp.lt.s32.totalorder %v909_v45, 2 }
 0x198   :  { %v2547_v53 = vclz %v3965_v17  ;;  %vm930_vm3 = vcmp.lt.s32.totalorder %v909_v45, 3  ;;  %v944_v41 = vshll.u32 %v904_v43, 8  ;;  %vm783_vm4 = vcmp.lt.s32.totalorder %v5940_v24, 2 }
 0x199   :  { %4353 = vcosq.f32 %v2463_v51  ;;  %v932_v7 = vsel %vm928_vm15, %v912_v48, %v915_v9  ;;  %v933_v30 = vsel %vm931_vm1, %v921_v52, 2102212464  ;;  %v936_v61 = vsel %vm928_vm15, %v915_v9, %v918_v34 }
 0x19a   :  { %v3966_v38 = vadd.s32 4294967294, %v2547_v53  ;;  %v934_v55 = vsel %vm930_vm3, %v918_v34, %v933_v30  ;;  %v937_v15 = vsel %vm931_vm1, %v924_v60, 920167782  ;;  %v940_v32 = vsel %vm928_vm15, %v918_v34, %v921_v52 }
 0x19b   :  { %4355 = vsinq.f32 %v2463_v51  ;;  %v938_v56 = vsel %vm930_vm3, %v921_v52, %v937_v15  ;;  %v941_v46 = vsel %vm931_vm1, %v927_v58, 1326507024  ;;  %v1010_v13 = vadd.s32 1, %v3907_v11 }
 0x19c   :  { %vm3967_vm5 = vcmp.lt.s32.totalorder %v3966_v38, 0  ;;  %v935_v26 = vsel %vm929_vm2, %v932_v7, %v934_v55  ;;  %v939_v43 = vsel %vm929_vm2, %v936_v61, %v938_v56  ;;  %v942_v1 = vsel %vm930_vm3, %v924_v60, %v941_v46 }
 0x19d   :  { %v2550_v8 = vsel %vm3967_vm5, 0, %v3966_v38  ;;  %v943_v19 = vsel %vm929_vm2, %v940_v32, %v942_v1  ;;  %v6075_v48 = vmul.u32.u64.low %v944_v41, %v939_v43  ;;  %v6076_v9 = vmul.u32.u64.high %v944_v41, %v939_v43, %v6075_v48 }
 0x19e   :  { %v2551_v34 = vsub.s32 32, %v2550_v8  ;;  %v2552_v52 = vshll.u32 %v6041_v2, %v2550_v8  ;;  %v2555_v5 = vsub.s32 4294967266, %v2550_v8  ;;  %vm1011_vm6 = vcmp.gt.s32.totalorder %v1010_v13, 0 }
 0x19f   :  { %v2565_v25 = vsub.s32 4, %v6029_v27  ;;  %v6081_v59 = vmul.u32.u64.low %v944_v41, %v943_v19  ;;  %v6082_v17 = vmul.u32.u64.high %v944_v41, %v943_v19, %v6081_v59  ;;  %v1012_v51 = vsel %vm1011_vm6, %v1010_v13, 0 }
 0x1a0   :  { %v6085_v60 = vand.u32 3, %v6027_v63  ;;  %v2553_v45 = vshrl.u32 %v2535_v50, %v2551_v34  ;;  %v2556_v58 = vadd.s32 127, %v2555_v5  ;;  %v1014_v11 = vand.u32 31, %v1012_v51 }
 0x1a1   :  { %v892_v53 = vxor.u32 2147483648, %v6052_v39  ;;  %v951_v7 = vmul.u32 %v944_v41, %v935_v26  ;;  %v954_v30 = vadd.s32 1, %v6076_v9  ;;  %v1007_v2 = vand.u32 8388607, %v1000_v28 }
 0x1a2   :  { %vm891_vm7 = vcmp.eq.s32.totalorder %v6014_v18, 2  ;;  %vm2481_vm8 = vcmp.lt.s32.totalorder %v5819_v31, 0  ;;  %v2554_v61 = vor.u32 %v2553_v45, %v2552_v52  ;;  %v2557_v38 = vshll.u32 %v2556_v58, 23 }
 0x1a3   :  { %v6093_v55 = vpop.eup %4353  ;;  %vm6097_vm9 = vcmp.le.f32.partialorder %v2479_v35, 0.7853982  ;;  %v2566_v50 = vsel %vm2481_vm8, %v2565_v25, %v6029_v27  ;;  %vm953_vm10 = vc.u32 %v6082_v17, %v6075_v48  ;;  %v1015_v41 = vsub.s32 32, %v1014_v11 }
 0x1a4   :  { %v6110_v15 = vsel %vm783_vm4, %v6021_v37, %v6025_v29  ;;  %v2558_v32 = vor.u32 4788187, %v2557_v38  ;;  %v2561_v56 = vcvt.s32.f32 %v2554_v61  ;;  %v955_v35 = vsel %vm953_vm10, %v954_v30, %v6076_v9 }
 0x1a5   :  { %v4356_v46 = vpop.eup %4355  ;;  %v889_v13 = vxor.u32 2147483648, %v6057_v62  ;;  %v6115_v26 = vsel %vm891_vm7, %v892_v53, %v6057_v62  ;;  %vm2471_vm11 = vcmp.eq.s32.totalorder %v6085_v60, 0  ;;  %vm2474_vm12 = vcmp.eq.s32.totalorder %v6085_v60, 2 }
 0x1a6   :  { %v956_v27 = vadd.s32 %v955_v35, %v951_v7  ;;  %v1008_v43 = vor.u32 8388608, %v1007_v2  ;;  %v2559_v1 = vand.u32 2147483647, %v2558_v32  ;;  %v2568_v24 = vsel %vm6097_vm9, 0, %v2566_v50 }
 0x1a7   :  { %v6121_v37 = vshrl.u32 %v1012_v51, 5  ;;  %v1017_v29 = vshll.u32 %v4457_v40, %v1014_v11  ;;  %v1018_v19 = vshrl.u32 %v7733_v42, %v1015_v41  ;;  %v1020_v9 = vshll.u32 %v7733_v42, %v1014_v11 }
 0x1a8   :  { %v957_v8 = vadd.s32 536870912, %v956_v27  ;;  %v1021_v34 = vshrl.u32 %v7731_v44, %v1015_v41  ;;  %vm888_vm14 = vcmp.eq.s32.totalorder %v6014_v18, 0  ;;  %vm2470_vm13 = vcmp.lt.s32.totalorder %v6085_v60, 2 }
 0x1a9   :  { %v2562_v52 = vmul.f32 %v2561_v56, %v2559_v1  ;;  %v1023_v5 = vshll.u32 %v7731_v44, %v1014_v11  ;;  %v1024_v25 = vshrl.u32 %v7727_v47, %v1015_v41  ;;  %v1026_v59 = vshll.u32 %v7727_v47, %v1014_v11 }
 0x1aa   :  { %v2572_v51 = vadd.s32 3, %v2568_v24  ;;  %v6132_v45 = vshrl.u32 %v957_v8, 30  ;;  %v1027_v58 = vshrl.u32 %v4461_v49, %v1015_v41  ;;  %v6135_v53 = vshll.u32 %v1008_v43, 8 }
 0x1ab   :  { %v2475_v7 = vxor.u32 2147483648, %v6093_v55  ;;  %v2563_v30 = vxor.u32 2147483648, %v2562_v52  ;;  %v1029_v2 = vshll.u32 %v4461_v49, %v1014_v11  ;;  %v1030_v61 = vshrl.u32 %v4462_v57, %v1015_v41 }
 0x1ac   :  { %vm887_vm0 = vcmp.lt.s32.totalorder %v6014_v18, 2  ;;  %v2472_v38 = vxor.u32 2147483648, %v4356_v46  ;;  %v959_v50 = vshll.u32 %v6132_v45, 30  ;;  %v1019_v32 = vor.u32 %v1018_v19, %v1017_v29 }
 0x1ad   :  { %v1022_v56 = vor.u32 %v1021_v34, %v1020_v9  ;;  %vm780_vm15 = vweird.f32 %v5541_v3  ;;  %vm2467_vm1 = vweird.f32 %v5779_v36  ;;  %v2564_v35 = vsel %vm2481_vm8, %v2563_v30, %v2562_v52 }
 0x1ae   :  { %v1025_v43 = vor.u32 %v1024_v25, %v1023_v5  ;;  %v1028_v1 = vor.u32 %v1027_v58, %v1026_v59  ;;  %vm1032_vm2 = vcmp.lt.s32.totalorder %v6121_v37, 1  ;;  %v2567_v11 = vsel %vm6097_vm9, %v5819_v31, %v2564_v35 }
 0x1af   :  { %v6150_v24 = vsub.s32 %v956_v27, %v959_v50  ;;  %v1031_v8 = vor.u32 %v1030_v61, %v1029_v2  ;;  %vm1035_vm3 = vcmp.lt.s32.totalorder %v6121_v37, 4  ;;  %4357 = vcosq.f32 %v2567_v11 }
 0x1b0   :  { %v1016_v29 = vshrl.u32 %v4457_v40, %v1015_v41  ;;  %vm1034_vm4 = vcmp.lt.s32.totalorder %v6121_v37, 3  ;;  %v6157_v19 = vmul.f32 %v5775_v14, %v5932_v4  ;;  %4359 = vsinq.f32 %v2567_v11 }
 0x1b1   :  { %v962_v9 = vsub.s32 0, %v6150_v24  ;;  %vm1033_vm5 = vcmp.lt.s32.totalorder %v6121_v37, 2  ;;  %v1037_v63 = vsel %vm1035_vm3, %v1025_v43, 2102212464  ;;  %v2473_v27 = vsel %vm2471_vm11, %v6093_v55, %v2472_v38 }
 0x1b2   :  { %v2476_v41 = vsel %vm2474_vm12, %v2475_v7, %v4356_v46  ;;  %v1040_v34 = vsel %vm1032_vm2, %v1019_v32, %v1022_v56  ;;  %v1041_v4 = vsel %vm1035_vm3, %v1028_v1, 920167782  ;;  %v1044_v25 = vsel %vm1032_vm2, %v1022_v56, %v1025_v43 }
 0x1b3   :  { %v3904_v52 = vmin.u32 %v962_v9, %v6150_v24  ;;  %v1042_v5 = vsel %vm1034_vm4, %v1025_v43, %v1041_v4  ;;  %v1045_v55 = vsel %vm1035_vm3, %v1031_v8, 1326507024  ;;  %v1036_v46 = vsel %vm1032_vm2, %v1016_v29, %v1019_v32 }
 0x1b4   :  { %v1038_v59 = vsel %vm1034_vm4, %v1022_v56, %v1037_v63  ;;  %v1043_v58 = vsel %vm1033_vm5, %v1040_v34, %v1042_v5  ;;  %v1046_v7 = vsel %vm1034_vm4, %v1028_v1, %v1045_v55  ;;  %v890_v30 = vsel %vm888_vm14, %v6052_v39, %v889_v13 }
 0x1b5   :  { %v2477_v2 = vsel %vm2470_vm13, %v2473_v27, %v2476_v41  ;;  %v2573_v61 = vand.u32 3, %v2572_v51  ;;  %v964_v38 = vclz %v3904_v52  ;;  %v1047_v50 = vsel %vm1033_vm5, %v1044_v25, %v1046_v7 }
 0x1b6   :  { %v6197_v32 = vmul.u32.u64.low %v6135_v53, %v1043_v58  ;;  %v6198_v56 = vmul.u32.u64.high %v6135_v53, %v1043_v58, %v6197_v32  ;;  %v2586_v35 = vand.u32 2139095040, %v6157_v19  ;;  %v1039_v43 = vsel %vm1033_vm5, %v1036_v46, %v1038_v59 }
 0x1b7   :  { %v3905_v62 = vadd.s32 4294967294, %v964_v38  ;;  %v6205_v39 = vmul.u32.u64.low %v6135_v53, %v1047_v50  ;;  %v6206_v60 = vmul.u32.u64.high %v6135_v53, %v1047_v50, %v6205_v39  ;;  %vm884_vm6 = vweird.f32 %v5617_v12  ;;  %v3437_v12 = vld [vmem:[%s7719_s3 + $0x30] sm:$0xff] }
 0x1b8   :  { %v894_v13 = vsel %vm887_vm0, %v890_v30, %v6115_v26  ;;  %vm2571_vm7 = vweird.f32 %v5819_v31  ;;  %v2587_v51 = vshrl.u32 %v2586_v35, 23  ;;  %v791_v1 = vsel %vm780_vm15, nan, %v6110_v15  ;;  %v3438_v30 = vld [vmem:[%s7719_s3 + $0x38] sm:$0xff] }
 0x1b9   :  { %v2478_v37 = vsel %vm2467_vm1, nan, %v2477_v2  ;;  %vm2578_vm8 = vcmp.eq.s32.totalorder %v2573_v61, 2  ;;  %vm3906_vm9 = vcmp.lt.s32.totalorder %v3905_v62, 0  ;;  %v4358_v11 = vpop.eup %4357  ;;  %v1055_v29 = vmul.u32 %v6135_v53, %v1039_v43 }
 0x1ba   :  { %v967_v8 = vsel %vm3906_vm9, 0, %v3905_v62  ;;  %v1058_v9 = vadd.s32 1, %v6198_v56  ;;  %v3968_v18 = vadd.s32 4294967169, %v2587_v51  ;;  %v4360_v26 = vpop.eup %4359  ;;  %v895_v63 = vsel %vm884_vm6, nan, %v894_v13 }
 0x1bb   :  { %vm2575_vm10 = vcmp.eq.s32.totalorder %v2573_v61, 0  ;;  %v2579_v27 = vxor.u32 2147483648, %v4358_v11  ;;  %v972_v3 = vsub.s32 4294967266, %v967_v8  ;;  %vm2574_vm11 = vcmp.lt.s32.totalorder %v2573_v61, 2 }
 0x1bc   :  { %v2576_v15 = vxor.u32 2147483648, %v4360_v26  ;;  %vm1057_vm12 = vc.u32 %v6206_v60, %v6197_v32  ;;  %v2593_v36 = vadd.s32 1, %v3968_v18  ;;  %v3421_v34 = vsub.f32 %v791_v1, %v2478_v37 }
 0x1bd   :  { %v2580_v41 = vsel %vm2578_vm8, %v2579_v27, %v4360_v26  ;;  %v1059_v53 = vsel %vm1057_vm12, %v1058_v9, %v6198_v56  ;;  %v2583_v4 = vand.u32 2147483647, %v6157_v19  ;;  %v952_v5 = vadd.s32 %v6075_v48, %v6082_v17 }
 0x1be   :  { %v2577_v52 = vsel %vm2575_vm10, %v4358_v11, %v2576_v15  ;;  %v1060_v25 = vadd.s32 %v1059_v53, %v1055_v29  ;;  %vm2594_vm14 = vcmp.gt.s32.totalorder %v2593_v36, 0  ;;  %v968_v46 = vsub.s32 32, %v967_v8 }
 0x1bf   :  { %v2581_v55 = vsel %vm2574_vm11, %v2577_v52, %v2580_v41  ;;  %v973_v59 = vadd.s32 127, %v972_v3  ;;  %v2595_v58 = vsel %vm2594_vm14, %v2593_v36, 0  ;;  %v6237_v50 = vmul.f32 %v3437_v12, %v3421_v34 }
 0x1c0   :  { %v2582_v7 = vsel %vm2571_vm7, nan, %v2581_v55  ;;  %v1061_v2 = vadd.s32 536870912, %v1060_v25  ;;  %v2597_v61 = vand.u32 31, %v2595_v58  ;;  %v6243_v48 = vmul.f32 %v5775_v14, %v6000_v0 }
 0x1c1   :  { %v3422_v38 = vsub.f32 %v895_v63, %v2582_v7  ;;  %v2590_v17 = vand.u32 8388607, %v2583_v4  ;;  %v969_v62 = vshll.u32 %v6150_v24, %v967_v8  ;;  %v970_v43 = vshrl.u32 %v952_v5, %v968_v46 }
 0x1c2   :  { %v6239_v56 = vshrl.u32 %v1061_v2, 30  ;;  %v2598_v31 = vsub.s32 32, %v2597_v61  ;;  %v974_v39 = vshll.u32 %v973_v59, 23  ;;  %v2596_v51 = vshrl.u32 %v2595_v58, 5 }
 0x1c3   :  { %v6247_v35 = vmul.f32 %v3438_v30, %v3422_v38  ;;  %v2600_v1 = vshll.u32 %v4457_v40, %v2597_v61  ;;  %v2603_v37 = vshll.u32 %v7733_v42, %v2597_v61  ;;  %v2609_v29 = vshll.u32 %v7727_v47, %v2597_v61 }
 0x1c4   :  { %v1063_v13 = vshll.u32 %v6239_v56, 30  ;;  %v2601_v0 = vshrl.u32 %v7733_v42, %v2598_v31  ;;  %v2604_v11 = vshrl.u32 %v7731_v44, %v2598_v31  ;;  %v2606_v24 = vshll.u32 %v7731_v44, %v2597_v61 }
 0x1c5   :  { %v3466_v14 = vpack.c.bf16 %v6247_v35, %v6237_v50  ;;  %v2607_v8 = vshrl.u32 %v7727_v47, %v2598_v31  ;;  %v2610_v18 = vshrl.u32 %v4461_v49, %v2598_v31  ;;  %v2591_v26 = vor.u32 8388608, %v2590_v17 }
 0x1c6   :  { %v6258_v9 = vsub.s32 %v1060_v25, %v1063_v13  ;;  %v2690_v63 = vand.u32 2139095040, %v6243_v48  ;;  %v971_v27 = vor.u32 %v970_v43, %v969_v62  ;;  %v975_v3 = vor.u32 4788187, %v974_v39 }
 0x1c7   :  { %4056 = vmatmul.mubr.bf16.gmra.mrb[4].mxu0 %v3466_v14  ;;  %v2612_v36 = vshll.u32 %v4461_v49, %v2597_v61  ;;  %v2602_v41 = vor.u32 %v2601_v0, %v2600_v1  ;;  %v2605_v34 = vor.u32 %v2604_v11, %v2603_v37  ;;  %v2611_v53 = vor.u32 %v2610_v18, %v2609_v29 }
 0x1c8   :  { %v1066_v15 = vsub.s32 0, %v6258_v9  ;;  %v2613_v52 = vshrl.u32 %v4462_v57, %v2598_v31  ;;  %v2599_v5 = vshrl.u32 %v4457_v40, %v2598_v31  ;;  %v2608_v25 = vor.u32 %v2607_v8, %v2606_v24 }
 0x1c9   :  { %vm2615_vm13 = vcmp.lt.s32.totalorder %v2596_v51, 1  ;;  %vm2617_vm0 = vcmp.lt.s32.totalorder %v2596_v51, 3  ;;  %vm2618_vm15 = vcmp.lt.s32.totalorder %v2596_v51, 4  ;;  %v2691_v46 = vshrl.u32 %v2690_v63, 23 }
 0x1ca   :  { %v3908_v12 = vmin.u32 %v1066_v15, %v6258_v9  ;;  %v2614_v55 = vor.u32 %v2613_v52, %v2612_v36  ;;  %v978_v59 = vcvt.s32.f32 %v971_v27  ;;  %vm2616_vm1 = vcmp.lt.s32.totalorder %v2596_v51, 2 }
 0x1cb   :  { %v2631_v7 = vshll.u32 %v2591_v26, 8  ;;  %v976_v30 = vand.u32 2147483647, %v975_v3  ;;  %v2620_v2 = vsel %vm2618_vm15, %v2608_v25, 2102212464  ;;  %v2623_v61 = vsel %vm2615_vm13, %v2602_v41, %v2605_v34 }
 0x1cc   :  { %v1068_v58 = vclz %v3908_v12  ;;  %v2624_v38 = vsel %vm2618_vm15, %v2611_v53, 920167782  ;;  %v2619_v31 = vsel %vm2615_vm13, %v2599_v5, %v2602_v41  ;;  %v2627_v43 = vsel %vm2615_vm13, %v2605_v34, %v2608_v25 }
 0x1cd   :  { %v2625_v62 = vsel %vm2617_vm0, %v2608_v25, %v2624_v38  ;;  %v2621_v39 = vsel %vm2617_vm0, %v2605_v34, %v2620_v2  ;;  %v2628_v1 = vsel %vm2618_vm15, %v2614_v55, 1326507024  ;;  %v3972_v37 = vadd.s32 4294967169, %v2691_v46  ;;  %v6383_v55 = vld [vmem:[%s7716_s0 + $0x58] sm:$0xff] }
 0x1ce   :  { %v3909_v17 = vadd.s32 4294967294, %v1068_v58  ;;  %v2626_v13 = vsel %vm2616_vm1, %v2623_v61, %v2625_v62  ;;  %v2629_v14 = vsel %vm2617_vm0, %v2611_v53, %v2628_v1  ;;  %v979_v29 = vmul.f32 %v978_v59, %v976_v30 }
 0x1cf   :  { %v6279_v0 = vmul.u32.u64.low %v2631_v7, %v2626_v13  ;;  %v6280_v11 = vmul.u32.u64.high %v2631_v7, %v2626_v13, %v6279_v0  ;;  %v2630_v8 = vsel %vm2616_vm1, %v2627_v43, %v2629_v14  ;;  %v2622_v26 = vsel %vm2616_vm1, %v2619_v31, %v2621_v39 }
 0x1d0   :  { %vm3910_vm2 = vcmp.lt.s32.totalorder %v3909_v17, 0  ;;  %v2697_v63 = vadd.s32 1, %v3972_v37  ;;  %v6285_v27 = vmul.u32.u64.low %v2631_v7, %v2630_v8  ;;  %v6286_v3 = vmul.u32.u64.high %v2631_v7, %v2630_v8, %v6285_v27 }
 0x1d1   :  { %v1071_v24 = vsel %vm3910_vm2, 0, %v3909_v17  ;;  %vm898_vm3 = vcmp.lt.s32.totalorder %v5946_v20, 0  ;;  %v2641_v15 = vadd.s32 1, %v6280_v11  ;;  %v980_v36 = vxor.u32 2147483648, %v979_v29 }
 0x1d2   :  { %v1076_v18 = vsub.s32 4294967266, %v1071_v24  ;;  %vm2698_vm4 = vcmp.gt.s32.totalorder %v2697_v63, 0  ;;  %v982_v41 = vsub.s32 4, %v6132_v45  ;;  %v2638_v34 = vmul.u32 %v2631_v7, %v2622_v26 }
 0x1d3   :  { %v2699_v53 = vsel %vm2698_vm4, %v2697_v63, 0  ;;  %v1056_v52 = vadd.s32 %v6197_v32, %v6206_v60  ;;  %v1072_v12 = vsub.s32 32, %v1071_v24  ;;  %v2687_v5 = vand.u32 2147483647, %v6243_v48 }
 0x1d4   :  { %v1077_v51 = vadd.s32 127, %v1076_v18  ;;  %vm2640_vm5 = vc.u32 %v6286_v3, %v6279_v0  ;;  %v2701_v25 = vand.u32 31, %v2699_v53  ;;  %vm6298_vm6 = vcmp.le.f32.partialorder %v896_v33, 0.7853982 }
 0x1d5   :  { %v2642_v46 = vsel %vm2640_vm5, %v2641_v15, %v6280_v11  ;;  %v981_v59 = vsel %vm898_vm3, %v980_v36, %v979_v29  ;;  %v6308_v32 = vsel %vm898_vm3, %v982_v41, %v6132_v45  ;;  %v1073_v7 = vshll.u32 %v6258_v9, %v1071_v24 }
 0x1d6   :  { %v2643_v60 = vadd.s32 %v2642_v46, %v2638_v34  ;;  %v2702_v58 = vsub.s32 32, %v2701_v25  ;;  %v1074_v30 = vshrl.u32 %v1056_v52, %v1072_v12  ;;  %v1078_v2 = vshll.u32 %v1077_v51, 23  ;;  %v6335_v34 = vld [vmem:[%s7716_s0 + $0x50] sm:$0xff] }
 0x1d7   :  { %v2694_v33 = vand.u32 8388607, %v2687_v5  ;;  %v2704_v38 = vshll.u32 %v4457_v40, %v2701_v25  ;;  %v2707_v17 = vshll.u32 %v7733_v42, %v2701_v25  ;;  %v2710_v31 = vshll.u32 %v7731_v44, %v2701_v25 }
 0x1d8   :  { %v2644_v61 = vadd.s32 536870912, %v2643_v60  ;;  %v2705_v62 = vshrl.u32 %v7733_v42, %v2702_v58  ;;  %v2708_v45 = vshrl.u32 %v7731_v44, %v2702_v58  ;;  %v2711_v43 = vshrl.u32 %v7727_v47, %v2702_v58 }
 0x1d9   :  { %v2713_v9 = vshll.u32 %v7727_v47, %v2701_v25  ;;  %v2700_v13 = vshrl.u32 %v2699_v53, 5  ;;  %v2714_v1 = vshrl.u32 %v4461_v49, %v2702_v58  ;;  %v2716_v37 = vshll.u32 %v4461_v49, %v2701_v25 }
 0x1da   :  { %v6320_v39 = vshrl.u32 %v2644_v61, 30  ;;  %vm1002_vm7 = vcmp.lt.s32.totalorder %v6012_v22, 0  ;;  %v1075_v14 = vor.u32 %v1074_v30, %v1073_v7  ;;  %v1079_v11 = vor.u32 4788187, %v1078_v2 }
 0x1db   :  { %v1086_v29 = vsub.s32 4, %v6239_v56  ;;  %v2717_v24 = vshrl.u32 %v4462_v57, %v2702_v58  ;;  %v984_v8 = vsel %vm6298_vm6, %v5946_v20, %v981_v59  ;;  %v2695_v26 = vor.u32 8388608, %v2694_v33 }
 0x1dc   :  { %v2646_v18 = vshll.u32 %v6320_v39, 30  ;;  %v2703_v63 = vshrl.u32 %v4457_v40, %v2702_v58  ;;  %v2706_v27 = vor.u32 %v2705_v62, %v2704_v38  ;;  %v2709_v15 = vor.u32 %v2708_v45, %v2707_v17 }
 0x1dd   :  { %v2712_v36 = vor.u32 %v2711_v43, %v2710_v31  ;;  %v2715_v41 = vor.u32 %v2714_v1, %v2713_v9  ;;  %v2718_v52 = vor.u32 %v2717_v24, %v2716_v37  ;;  %vm2719_vm8 = vcmp.lt.s32.totalorder %v2700_v13, 1 }
 0x1de   :  { %v6337_v53 = vsub.s32 %v2643_v60, %v2646_v18  ;;  %vm2722_vm9 = vcmp.lt.s32.totalorder %v2700_v13, 4  ;;  %vm6341_vm10 = vcmp.le.f32.partialorder %v1000_v28, 0.7853982  ;;  %v1080_v51 = vand.u32 2147483647, %v1079_v11 }
 0x1df   :  { %v1082_v25 = vcvt.s32.f32 %v1075_v14  ;;  %vm2721_vm11 = vcmp.lt.s32.totalorder %v2700_v13, 3  ;;  %v2724_v46 = vsel %vm2722_vm9, %v2712_v36, 2102212464  ;;  %vm2720_vm12 = vcmp.lt.s32.totalorder %v2700_v13, 2  ;;  %v6350_v60 = vld [vmem:[%s7717_s1] ss:$0 sm:$0xff] }
 0x1e0   :  { %v2649_v59 = vsub.s32 0, %v6337_v53  ;;  %v2735_v58 = vshll.u32 %v2695_v26, 8  ;;  %v6354_v28 = vmul.f32 %v6350_v60, %v6335_v34  ;;  %v2723_v7 = vsel %vm2719_vm8, %v2703_v63, %v2706_v27 }
 0x1e1   :  { %v2725_v30 = vsel %vm2721_vm11, %v2709_v15, %v2724_v46  ;;  %v2727_v2 = vsel %vm2719_vm8, %v2706_v27, %v2709_v15  ;;  %v2728_v33 = vsel %vm2722_vm9, %v2715_v41, 920167782  ;;  %v2731_v17 = vsel %vm2719_vm8, %v2709_v15, %v2712_v36 }
 0x1e2   :  { %v3969_v61 = vmin.u32 %v2649_v59, %v6337_v53  ;;  %v2729_v38 = vsel %vm2721_vm11, %v2712_v36, %v2728_v33  ;;  %v2732_v31 = vsel %vm2722_vm9, %v2718_v52, 1326507024  ;;  %4361 = vcosq.f32 %v984_v8 }
 0x1e3   :  { %v1083_v62 = vmul.f32 %v1082_v25, %v1080_v51  ;;  %v2730_v45 = vsel %vm2720_vm12, %v2727_v2, %v2729_v38  ;;  %v2733_v43 = vsel %vm2721_vm11, %v2715_v41, %v2732_v31  ;;  %v985_v9 = vsel %vm6298_vm6, 0, %v6308_v32 }
 0x1e4   :  { %4363 = vsinq.f32 %v984_v8  ;;  %v1087_v1 = vsel %vm1002_vm7, %v1086_v29, %v6239_v56  ;;  %v2651_v37 = vclz %v3969_v61  ;;  %v2726_v14 = vsel %vm2720_vm12, %v2723_v7, %v2725_v30 }
 0x1e5   :  { %v2734_v11 = vsel %vm2720_vm12, %v2731_v17, %v2733_v43  ;;  %v6374_v24 = vmul.u32.u64.low %v2735_v58, %v2730_v45  ;;  %v6375_v18 = vmul.u32.u64.high %v2735_v58, %v2730_v45, %v6374_v24  ;;  %v1107_v32 = vand.u32 2139095040, %v6354_v28 }
 0x1e6   :  { %v3970_v26 = vadd.s32 4294967294, %v2651_v37  ;;  %v6377_v63 = vmul.u32.u64.low %v2735_v58, %v2734_v11  ;;  %v6378_v27 = vmul.u32.u64.high %v2735_v58, %v2734_v11, %v6377_v63  ;;  %v989_v56 = vadd.s32 3, %v985_v9 }
 0x1e7   :  { %v1084_v29 = vxor.u32 2147483648, %v1083_v62  ;;  %vm2585_vm14 = vcmp.lt.s32.totalorder %v6157_v19, 0  ;;  %v2669_v13 = vsub.s32 4, %v6320_v39  ;;  %v1089_v8 = vsel %vm6341_vm10, 0, %v1087_v1 }
 0x1e8   :  { %v2639_v15 = vadd.s32 %v6279_v0, %v6286_v3  ;;  %vm3971_vm13 = vcmp.lt.s32.totalorder %v3970_v26, 0  ;;  %v1108_v36 = vshrl.u32 %v1107_v32, 23  ;;  %v2742_v52 = vmul.u32 %v2735_v58, %v2726_v14 }
 0x1e9   :  { %v2654_v41 = vsel %vm3971_vm13, 0, %v3970_v26  ;;  %v2745_v51 = vadd.s32 1, %v6375_v18  ;;  %v6395_v25 = vmul.f32 %v6350_v60, %v6383_v55  ;;  %v7724_v30 = vand.u32 2147483647, %v6354_v28 }
 0x1ea   :  { %v2655_v46 = vsub.s32 32, %v2654_v41  ;;  %v2656_v59 = vshll.u32 %v6337_v53, %v2654_v41  ;;  %v2659_v7 = vsub.s32 4294967266, %v2654_v41  ;;  %v1085_v2 = vsel %vm1002_vm7, %v1084_v29, %v1083_v62 }
 0x1eb   :  { %v2670_v0 = vsel %vm2585_vm14, %v2669_v13, %v6320_v39  ;;  %vm2744_vm0 = vc.u32 %v6378_v27, %v6374_v24  ;;  %v3911_v3 = vadd.s32 4294967169, %v1108_v36  ;;  %v6405_v58 = vand.u32 3, %v989_v56 }
 0x1ec   :  { %v2657_v33 = vshrl.u32 %v2639_v15, %v2655_v46  ;;  %v2660_v61 = vadd.s32 127, %v2659_v7  ;;  %v2746_v38 = vsel %vm2744_vm0, %v2745_v51, %v6375_v18  ;;  %v6408_v53 = vpop.eup %4361  ;;  %v6410_v17 = vadd.s32 3, %v1089_v8 }
 0x1ed   :  { %vm6414_vm15 = vcmp.le.f32.partialorder %v2583_v4, 0.7853982  ;;  %v2747_v39 = vadd.s32 %v2746_v38, %v2742_v52  ;;  %v1114_v62 = vadd.s32 1, %v3911_v3  ;;  %v1088_v43 = vsel %vm6341_vm10, %v6012_v22, %v1085_v2 }
 0x1ee   :  { %v6418_v45 = vpop.eup %4363  ;;  %v2658_v9 = vor.u32 %v2657_v33, %v2656_v59  ;;  %v2661_v1 = vshll.u32 %v2660_v61, 23  ;;  %v2672_v37 = vsel %vm6414_vm15, 0, %v2670_v0  ;;  %v1111_v4 = vand.u32 8388607, %v7724_v30 }
 0x1ef   :  { %v2748_v14 = vadd.s32 536870912, %v2747_v39  ;;  %vm1115_vm1 = vcmp.gt.s32.totalorder %v1114_v62, 0  ;;  %v1211_v11 = vand.u32 2139095040, %v6395_v25  ;;  %v996_v18 = vxor.u32 2147483648, %v6408_v53 }
 0x1f0   :  { %v2662_v26 = vor.u32 4788187, %v2661_v1  ;;  %v2665_v63 = vcvt.s32.f32 %v2658_v9  ;;  %v1116_v32 = vsel %vm1115_vm1, %v1114_v62, 0  ;;  %v993_v12 = vxor.u32 2147483648, %v6418_v45 }
 0x1f1   :  { %4365 = vcosq.f32 %v1088_v43  ;;  %v6430_v56 = vshrl.u32 %v2748_v14, 30  ;;  %v1118_v29 = vand.u32 31, %v1116_v32  ;;  %v6432_v8 = vadd.s32 3, %v2672_v37 }
 0x1f2   :  { %4367 = vsinq.f32 %v1088_v43  ;;  %v2663_v13 = vand.u32 2147483647, %v2662_v26  ;;  %v7723_v15 = vand.u32 2147483647, %v6395_v25  ;;  %v1112_v41 = vor.u32 8388608, %v1111_v4 }
 0x1f3   :  { %v2750_v36 = vshll.u32 %v6430_v56, 30  ;;  %v1119_v52 = vsub.s32 32, %v1118_v29  ;;  %v1212_v51 = vshrl.u32 %v1211_v11, 23  ;;  %v6437_v59 = vadd.s32 %v6374_v24, %v6378_v27 }
 0x1f4   :  { %v2666_v46 = vmul.f32 %v2665_v63, %v2663_v13  ;;  %v1117_v7 = vshrl.u32 %v1116_v32, 5  ;;  %v1121_v2 = vshll.u32 %v4457_v40, %v1118_v29  ;;  %v1124_v33 = vshll.u32 %v7733_v42, %v1118_v29 }
 0x1f5   :  { %v6440_v0 = vsub.s32 %v2747_v39, %v2750_v36  ;;  %v1122_v3 = vshrl.u32 %v7733_v42, %v1119_v52  ;;  %v1127_v61 = vshll.u32 %v7731_v44, %v1118_v29  ;;  %v1125_v62 = vshrl.u32 %v7731_v44, %v1119_v52 }
 0x1f6   :  { %v2667_v38 = vxor.u32 2147483648, %v2666_v46  ;;  %v1128_v43 = vshrl.u32 %v7727_v47, %v1119_v52  ;;  %v1130_v9 = vshll.u32 %v7727_v47, %v1118_v29  ;;  %v1131_v27 = vshrl.u32 %v4461_v49, %v1119_v52 }
 0x1f7   :  { %v2753_v24 = vsub.s32 0, %v6440_v0  ;;  %v6450_v1 = vshll.u32 %v1112_v41, 8  ;;  %v3915_v39 = vadd.s32 4294967169, %v1212_v51  ;;  %v1120_v14 = vshrl.u32 %v4457_v40, %v1119_v52 }
 0x1f8   :  { %v2668_v37 = vsel %vm2585_vm14, %v2667_v38, %v2666_v46  ;;  %v1133_v4 = vshll.u32 %v4461_v49, %v1118_v29  ;;  %v6458_v11 = vand.u32 8388607, %v7723_v15  ;;  %vm992_vm2 = vcmp.eq.s32.totalorder %v6405_v58, 0 }
 0x1f9   :  { %vm995_vm3 = vcmp.eq.s32.totalorder %v6405_v58, 2  ;;  %v2671_v26 = vsel %vm6414_vm15, %v6157_v19, %v2668_v37  ;;  %v3973_v63 = vmin.u32 %v2753_v24, %v6440_v0  ;;  %v1123_v32 = vor.u32 %v1122_v3, %v1121_v2 }
 0x1fa   :  { %v1126_v13 = vor.u32 %v1125_v62, %v1124_v33  ;;  %vm2689_vm4 = vcmp.lt.s32.totalorder %v6243_v48, 0  ;;  %v1129_v36 = vor.u32 %v1128_v43, %v1127_v61  ;;  %v1132_v29 = vor.u32 %v1131_v27, %v1130_v9 }
 0x1fb   :  { %v1134_v41 = vshrl.u32 %v4462_v57, %v1119_v52  ;;  %vm1136_vm5 = vcmp.lt.s32.totalorder %v1117_v7, 1  ;;  %v6468_v51 = vpop.eup %4365  ;;  %4369 = vcosq.f32 %v2671_v26  ;;  %v2755_v46 = vclz %v3973_v63 }
 0x1fc   :  { %v2773_v38 = vsub.s32 4, %v6430_v56  ;;  %v1218_v15 = vadd.s32 1, %v3915_v39  ;;  %v6471_v31 = vpop.eup %4367  ;;  %vm991_vm6 = vcmp.lt.s32.totalorder %v6405_v58, 2  ;;  %vm1137_vm7 = vcmp.lt.s32.totalorder %v1117_v7, 2 }
 0x1fd   :  { %v1135_v2 = vor.u32 %v1134_v41, %v1133_v4  ;;  %vm1138_vm8 = vcmp.lt.s32.totalorder %v1117_v7, 3  ;;  %vm1139_vm9 = vcmp.lt.s32.totalorder %v1117_v7, 4  ;;  %vm6476_vm10 = vcmp.le.f32.partialorder %v2687_v5, 0.7853982 }
 0x1fe   :  { %v3974_v3 = vadd.s32 4294967294, %v2755_v46  ;;  %v1140_v33 = vsel %vm1136_vm5, %v1120_v14, %v1123_v32  ;;  %v1141_v61 = vsel %vm1139_vm9, %v1129_v36, 2102212464  ;;  %v1144_v62 = vsel %vm1136_vm5, %v1123_v32, %v1126_v13 }
 0x1ff   :  { %v1142_v43 = vsel %vm1138_vm8, %v1126_v13, %v1141_v61  ;;  %v1145_v9 = vsel %vm1139_vm9, %v1132_v29, 920167782  ;;  %v1148_v24 = vsel %vm1136_vm5, %v1126_v13, %v1129_v36  ;;  %v1149_v27 = vsel %vm1139_vm9, %v1135_v2, 1326507024 }
 0x200   :  { %4371 = vsinq.f32 %v2671_v26  ;;  %vm3975_vm11 = vcmp.lt.s32.totalorder %v3974_v3, 0  ;;  %v1146_v39 = vsel %vm1138_vm8, %v1129_v36, %v1145_v9  ;;  %v1150_v37 = vsel %vm1138_vm8, %v1132_v29, %v1149_v27 }
 0x201   :  { %v2758_v4 = vsel %vm3975_vm11, 0, %v3974_v3  ;;  %v1143_v5 = vsel %vm1137_vm7, %v1140_v33, %v1142_v43  ;;  %v1147_v63 = vsel %vm1137_vm7, %v1144_v62, %v1146_v39  ;;  %v1151_v41 = vsel %vm1137_vm7, %v1148_v24, %v1150_v37  ;;  %v6537_v39 = vld [vmem:[%s7718_s2] ss:$0 sm:$0xff] }
 0x202   :  { %v2759_v14 = vsub.s32 32, %v2758_v4  ;;  %v2760_v46 = vshll.u32 %v6440_v0, %v2758_v4  ;;  %v2763_v32 = vsub.s32 4294967266, %v2758_v4  ;;  %vm1219_vm12 = vcmp.gt.s32.totalorder %v1218_v15, 0 }
 0x203   :  { %v6488_v61 = vmul.u32.u64.low %v6450_v1, %v1151_v41  ;;  %v6489_v13 = vmul.u32.u64.high %v6450_v1, %v1151_v41, %v6488_v61  ;;  %v6492_v26 = vmul.u32.u64.low %v6450_v1, %v1147_v63  ;;  %v6493_v36 = vmul.u32.u64.high %v6450_v1, %v1147_v63, %v6492_v26 }
 0x204   :  { %v2761_v29 = vshrl.u32 %v6437_v59, %v2759_v14  ;;  %v2764_v2 = vadd.s32 127, %v2763_v32  ;;  %v2774_v7 = vsel %vm2689_vm4, %v2773_v38, %v6430_v56  ;;  %v1220_v3 = vsel %vm1219_vm12, %v1218_v15, 0 }
 0x205   :  { %v994_v0 = vsel %vm992_vm2, %v6408_v53, %v993_v12  ;;  %v997_v33 = vsel %vm995_vm3, %v996_v18, %v6418_v45  ;;  %v6511_v59 = vand.u32 3, %v6432_v8  ;;  %v1222_v62 = vand.u32 31, %v1220_v3  ;;  %v6513_v43 = vpop.eup %4369 }
 0x206   :  { %v2762_v56 = vor.u32 %v2761_v29, %v2760_v46  ;;  %v2765_v15 = vshll.u32 %v2764_v2, 23  ;;  %v1159_v38 = vmul.u32 %v6450_v1, %v1143_v5  ;;  %v1216_v9 = vor.u32 8388608, %v6458_v11 }
 0x207   :  { %v6518_v12 = vand.u32 3, %v6410_v17  ;;  %v2776_v53 = vsel %vm6476_vm10, 0, %v2774_v7  ;;  %vm1161_vm14 = vc.u32 %v6489_v13, %v6492_v26  ;;  %v1162_v45 = vadd.s32 1, %v6493_v36 }
 0x208   :  { %v6527_v18 = vsel %vm991_vm6, %v994_v0, %v997_v33  ;;  %v2766_v8 = vor.u32 4788187, %v2765_v15  ;;  %v2769_v24 = vcvt.s32.f32 %v2762_v56  ;;  %v1223_v1 = vsub.s32 32, %v1222_v62 }
 0x209   :  { %v1097_v11 = vxor.u32 2147483648, %v6471_v31  ;;  %v1100_v17 = vxor.u32 2147483648, %v6468_v51  ;;  %vm2679_vm13 = vcmp.eq.s32.totalorder %v6511_v59, 0  ;;  %vm2682_vm0 = vcmp.eq.s32.totalorder %v6511_v59, 2 }
 0x20a   :  { %v1163_v27 = vsel %vm1161_vm14, %v1162_v45, %v6493_v36  ;;  %v6541_v58 = vmul.f32 %v6537_v39, %v6335_v34  ;;  %v4372_v37 = vpop.eup %4371  ;;  %v2767_v4 = vand.u32 2147483647, %v2766_v8  ;;  %v6543_v5 = vadd.s32 3, %v2776_v53 }
 0x20b   :  { %v1164_v63 = vadd.s32 %v1163_v27, %v1159_v38  ;;  %v6545_v41 = vshll.u32 %v1216_v9, 8  ;;  %v1225_v14 = vshll.u32 %v4457_v40, %v1222_v62  ;;  %v1226_v46 = vshrl.u32 %v7733_v42, %v1223_v1 }
 0x20c   :  { %v1228_v32 = vshll.u32 %v7733_v42, %v1222_v62  ;;  %v1229_v61 = vshrl.u32 %v7731_v44, %v1223_v1  ;;  %vm1099_vm15 = vcmp.eq.s32.totalorder %v6518_v12, 2  ;;  %v2683_v34 = vxor.u32 2147483648, %v6513_v43 }
 0x20d   :  { %v2770_v36 = vmul.f32 %v2769_v24, %v2767_v4  ;;  %v1165_v29 = vadd.s32 536870912, %v1164_v63  ;;  %v1221_v2 = vshrl.u32 %v1220_v3, 5  ;;  %vm1096_vm1 = vcmp.eq.s32.totalorder %v6518_v12, 0 }
 0x20e   :  { %vm2678_vm2 = vcmp.lt.s32.totalorder %v6511_v59, 2  ;;  %v1231_v7 = vshll.u32 %v7731_v44, %v1222_v62  ;;  %v1232_v0 = vshrl.u32 %v7727_v47, %v1223_v1  ;;  %v1234_v33 = vshll.u32 %v7727_v47, %v1222_v62 }
 0x20f   :  { %v1235_v56 = vshrl.u32 %v4461_v49, %v1223_v1  ;;  %v2680_v15 = vxor.u32 2147483648, %v4372_v37  ;;  %v2771_v38 = vxor.u32 2147483648, %v2770_v36  ;;  %v6559_v9 = vshrl.u32 %v1165_v29, 30 }
 0x210   :  { %v1224_v53 = vshrl.u32 %v4457_v40, %v1223_v1  ;;  %v1227_v45 = vor.u32 %v1226_v46, %v1225_v14  ;;  %v1230_v3 = vor.u32 %v1229_v61, %v1228_v32  ;;  %v1237_v8 = vshll.u32 %v4461_v49, %v1222_v62 }
 0x211   :  { %v1238_v24 = vshrl.u32 %v4462_v57, %v1223_v1  ;;  %vm988_vm3 = vweird.f32 %v5946_v20  ;;  %vm2675_vm5 = vweird.f32 %v6157_v19  ;;  %v2772_v27 = vsel %vm2689_vm4, %v2771_v38, %v2770_v36 }
 0x212   :  { %v1167_v4 = vshll.u32 %v6559_v9, 30  ;;  %v1236_v30 = vor.u32 %v1235_v56, %v1234_v33  ;;  %vm1240_vm6 = vcmp.lt.s32.totalorder %v1221_v2, 1  ;;  %vm1095_vm7 = vcmp.lt.s32.totalorder %v6518_v12, 2 }
 0x213   :  { %v2775_v14 = vsel %vm6476_vm10, %v6243_v48, %v2772_v27  ;;  %v1233_v62 = vor.u32 %v1232_v0, %v1231_v7  ;;  %v1239_v46 = vor.u32 %v1238_v24, %v1237_v8  ;;  %vm1243_vm8 = vcmp.lt.s32.totalorder %v1221_v2, 4 }
 0x214   :  { %4373 = vcosq.f32 %v2775_v14  ;;  %v6573_v1 = vsub.s32 %v1164_v63, %v1167_v4  ;;  %vm1242_vm9 = vcmp.lt.s32.totalorder %v1221_v2, 3  ;;  %v2794_v32 = vand.u32 2139095040, %v6541_v58 }
 0x215   :  { %4375 = vsinq.f32 %v2775_v14  ;;  %vm1241_vm4 = vcmp.lt.s32.totalorder %v1221_v2, 2  ;;  %v1245_v61 = vsel %vm1243_vm8, %v1233_v62, 2102212464  ;;  %v1248_v36 = vsel %vm1240_vm6, %v1227_v45, %v1230_v3 }
 0x216   :  { %v2681_v52 = vsel %vm2679_vm13, %v6513_v43, %v2680_v15  ;;  %v2684_v29 = vsel %vm2682_vm0, %v2683_v34, %v4372_v37  ;;  %v1170_v7 = vsub.s32 0, %v6573_v1  ;;  %v1249_v63 = vsel %vm1243_vm8, %v1236_v30, 920167782 }
 0x217   :  { %v1244_v0 = vsel %vm1240_vm6, %v1224_v53, %v1227_v45  ;;  %v1250_v33 = vsel %vm1242_vm9, %v1233_v62, %v1249_v63  ;;  %v1252_v56 = vsel %vm1240_vm6, %v1230_v3, %v1233_v62  ;;  %v1253_v38 = vsel %vm1243_vm8, %v1239_v46, 1326507024 }
 0x218   :  { %v3912_v8 = vmin.u32 %v1170_v7, %v6573_v1  ;;  %v1246_v24 = vsel %vm1242_vm9, %v1230_v3, %v1245_v61  ;;  %v1251_v43 = vsel %vm1241_vm4, %v1248_v36, %v1250_v33  ;;  %v1254_v37 = vsel %vm1242_vm9, %v1236_v30, %v1253_v38  ;;  %v3439_v7 = vld [vmem:[%s7719_s3 + $0x40] sm:$0xff] }
 0x219   :  { %v1101_v34 = vsel %vm1099_vm15, %v1100_v17, %v6471_v31  ;;  %v1255_v15 = vsel %vm1241_vm4, %v1252_v56, %v1254_v37  ;;  %v6600_v53 = vmul.u32.u64.low %v6545_v41, %v1251_v43  ;;  %v6601_v45 = vmul.u32.u64.high %v6545_v41, %v1251_v43, %v6600_v53 }
 0x21a   :  { %v1098_v3 = vsel %vm1096_vm1, %v6468_v51, %v1097_v11  ;;  %v2685_v30 = vsel %vm2678_vm2, %v2681_v52, %v2684_v29  ;;  %v2781_v27 = vand.u32 3, %v6543_v5  ;;  %v1172_v4 = vclz %v3912_v8 }
 0x21b   :  { %v1247_v17 = vsel %vm1241_vm4, %v1244_v0, %v1246_v24  ;;  %v6614_v14 = vmul.u32.u64.low %v6545_v41, %v1255_v15  ;;  %v6615_v62 = vmul.u32.u64.high %v6545_v41, %v1255_v15, %v6614_v14  ;;  %v2795_v46 = vshrl.u32 %v2794_v32, 23 }
 0x21c   :  { %vm1092_vm10 = vweird.f32 %v6012_v22  ;;  %vm2779_vm11 = vweird.f32 %v6243_v48  ;;  %v3913_v31 = vadd.s32 4294967294, %v1172_v4  ;;  %v999_v51 = vsel %vm988_vm3, nan, %v6527_v18 }
 0x21d   :  { %v2686_v59 = vsel %vm2675_vm5, nan, %v2685_v30  ;;  %v1266_v11 = vadd.s32 1, %v6601_v45  ;;  %v3976_v5 = vadd.s32 4294967169, %v2795_v46  ;;  %v1102_v61 = vsel %vm1095_vm7, %v1098_v3, %v1101_v34  ;;  %v3440_v34 = vld [vmem:[%s7719_s3 + $0x48] sm:$0xff] }
 0x21e   :  { %v4374_v2 = vpop.eup %4373  ;;  %vm2786_vm12 = vcmp.eq.s32.totalorder %v2781_v27, 2  ;;  %vm3914_vm14 = vcmp.lt.s32.totalorder %v3913_v31, 0  ;;  %v1263_v32 = vmul.u32 %v6545_v41, %v1247_v17  ;;  %vm2783_vm13 = vcmp.eq.s32.totalorder %v2781_v27, 0 }
 0x21f   :  { %v4376_v36 = vpop.eup %4375  ;;  %v2787_v52 = vxor.u32 2147483648, %v4374_v2  ;;  %v1175_v29 = vsel %vm3914_vm14, 0, %v3913_v31  ;;  %vm1265_vm0 = vc.u32 %v6615_v62, %v6600_v53  ;;  %vm2782_vm15 = vcmp.lt.s32.totalorder %v2781_v27, 2 }
 0x220   :  { %v2784_v20 = vxor.u32 2147483648, %v4376_v36  ;;  %v3423_v19 = vsub.f32 %v999_v51, %v2686_v59  ;;  %v6632_v18 = vmul.f32 %v6537_v39, %v6383_v55  ;;  %v1180_v41 = vsub.s32 4294967266, %v1175_v29 }
 0x221   :  { %v2788_v12 = vsel %vm2786_vm12, %v2787_v52, %v4376_v36  ;;  %v1267_v63 = vsel %vm1265_vm0, %v1266_v11, %v6601_v45  ;;  %v2801_v0 = vadd.s32 1, %v3976_v5  ;;  %v1103_v33 = vsel %vm1092_vm10, nan, %v1102_v61 }
 0x222   :  { %v2785_v56 = vsel %vm2783_vm13, %v4374_v2, %v2784_v20  ;;  %v1268_v38 = vadd.s32 %v1267_v63, %v1263_v32  ;;  %v2791_v8 = vand.u32 2147483647, %v6541_v58  ;;  %v1160_v55 = vadd.s32 %v6492_v26, %v6489_v13 }
 0x223   :  { %v2789_v24 = vsel %vm2782_vm15, %v2785_v56, %v2788_v12  ;;  %v1190_v43 = vsub.s32 4, %v6559_v9  ;;  %vm2802_vm1 = vcmp.gt.s32.totalorder %v2801_v0, 0  ;;  %v6649_v22 = vmul.f32 %v3439_v7, %v3423_v19 }
 0x224   :  { %v2790_v37 = vsel %vm2779_vm11, nan, %v2789_v24  ;;  %v1176_v15 = vsub.s32 32, %v1175_v29  ;;  %v1269_v45 = vadd.s32 536870912, %v1268_v38  ;;  %v1181_v30 = vadd.s32 127, %v1180_v41 }
 0x225   :  { %v3424_v3 = vsub.f32 %v1103_v33, %v2790_v37  ;;  %v2803_v27 = vsel %vm2802_vm1, %v2801_v0, 0  ;;  %v2898_v4 = vand.u32 2139095040, %v6632_v18  ;;  %vm1106_vm2 = vcmp.lt.s32.totalorder %v6354_v28, 0 }
 0x226   :  { %v6653_v13 = vshrl.u32 %v1269_v45, 30  ;;  %v2798_v48 = vand.u32 8388607, %v2791_v8  ;;  %v6662_v17 = vsel %vm1106_vm2, %v1190_v43, %v6559_v9  ;;  %v2805_v14 = vand.u32 31, %v2803_v27 }
 0x227   :  { %v6657_v26 = vmul.f32 %v3440_v34, %v3424_v3  ;;  %v1177_v46 = vshll.u32 %v6573_v1, %v1175_v29  ;;  %v1178_v31 = vshrl.u32 %v1160_v55, %v1176_v15  ;;  %v2895_v59 = vand.u32 2147483647, %v6632_v18 }
 0x228   :  { %v1271_v51 = vshll.u32 %v6653_v13, 30  ;;  %v1182_v5 = vshll.u32 %v1181_v30, 23  ;;  %v2806_v2 = vsub.s32 32, %v2805_v14  ;;  %v2899_v61 = vshrl.u32 %v2898_v4, 23 }
 0x229   :  { %v3467_v11 = vpack.c.bf16 %v6657_v26, %v6649_v22  ;;  %v2799_v36 = vor.u32 8388608, %v2798_v48  ;;  %v2808_v9 = vshll.u32 %v4457_v40, %v2805_v14  ;;  %v2811_v52 = vshll.u32 %v7733_v42, %v2805_v14 }
 0x22a   :  { %v6669_v32 = vsub.s32 %v1268_v38, %v1271_v51  ;;  %v1264_v1 = vadd.s32 %v6600_v53, %v6615_v62  ;;  %v2809_v29 = vshrl.u32 %v7733_v42, %v2806_v2  ;;  %v2812_v20 = vshrl.u32 %v7731_v44, %v2806_v2 }
 0x22b   :  { %4059 = vmatprep.mubr.bf16.mxu0 %v3467_v11  ;;  %v2814_v19 = vshll.u32 %v7731_v44, %v2805_v14  ;;  %v1179_v12 = vor.u32 %v1178_v31, %v1177_v46  ;;  %v2804_v41 = vshrl.u32 %v2803_v27, 5  ;;  %v2815_v63 = vshrl.u32 %v7727_v47, %v2806_v2 }
 0x22c   :  { %v1274_v7 = vsub.s32 0, %v6669_v32  ;;  %v1183_v0 = vor.u32 4788187, %v1182_v5  ;;  %v2817_v33 = vshll.u32 %v7727_v47, %v2805_v14  ;;  %v2818_v56 = vshrl.u32 %v4461_v49, %v2806_v2 }
 0x22d   :  { %v3980_v38 = vadd.s32 4294967169, %v2899_v61  ;;  %v2807_v62 = vshrl.u32 %v4457_v40, %v2806_v2  ;;  %v2810_v24 = vor.u32 %v2809_v29, %v2808_v9  ;;  %v2813_v55 = vor.u32 %v2812_v20, %v2811_v52 }
 0x22e   :  { %v3916_v53 = vmin.u32 %v1274_v7, %v6669_v32  ;;  %v2816_v43 = vor.u32 %v2815_v63, %v2814_v19  ;;  %v2819_v37 = vor.u32 %v2818_v56, %v2817_v33  ;;  %v2820_v34 = vshll.u32 %v4461_v49, %v2805_v14 }
 0x22f   :  { %v2821_v15 = vshrl.u32 %v4462_v57, %v2806_v2  ;;  %v1186_v45 = vcvt.s32.f32 %v1179_v12  ;;  %vm2823_vm3 = vcmp.lt.s32.totalorder %v2804_v41, 1  ;;  %v2839_v30 = vshll.u32 %v2799_v36, 8 }
 0x230   :  { %v1276_v3 = vclz %v3916_v53  ;;  %v1184_v27 = vand.u32 2147483647, %v1183_v0  ;;  %vm2824_vm5 = vcmp.lt.s32.totalorder %v2804_v41, 2  ;;  %v2905_v48 = vadd.s32 1, %v3980_v38 }
 0x231   :  { %v2822_v4 = vor.u32 %v2821_v15, %v2820_v34  ;;  %vm2825_vm6 = vcmp.lt.s32.totalorder %v2804_v41, 3  ;;  %vm2826_vm7 = vcmp.lt.s32.totalorder %v2804_v41, 4  ;;  %v2827_v31 = vsel %vm2823_vm3, %v2807_v62, %v2810_v24 }
 0x232   :  { %v3917_v46 = vadd.s32 4294967294, %v1276_v3  ;;  %v2828_v51 = vsel %vm2826_vm7, %v2816_v43, 2102212464  ;;  %v2831_v11 = vsel %vm2823_vm3, %v2810_v24, %v2813_v55  ;;  %v2832_v5 = vsel %vm2826_vm7, %v2819_v37, 920167782 }
 0x233   :  { %v2835_v61 = vsel %vm2823_vm3, %v2813_v55, %v2816_v43  ;;  %v2829_v14 = vsel %vm2825_vm6, %v2813_v55, %v2828_v51  ;;  %v2833_v9 = vsel %vm2825_vm6, %v2816_v43, %v2832_v5  ;;  %v2836_v2 = vsel %vm2826_vm7, %v2822_v4, 1326507024 }
 0x234   :  { %vm3918_vm8 = vcmp.lt.s32.totalorder %v3917_v46, 0  ;;  %v1187_v52 = vmul.f32 %v1186_v45, %v1184_v27  ;;  %v2834_v36 = vsel %vm2824_vm5, %v2831_v11, %v2833_v9  ;;  %v2837_v20 = vsel %vm2825_vm6, %v2819_v37, %v2836_v2 }
 0x235   :  { %v1279_v29 = vsel %vm3918_vm8, 0, %v3917_v46  ;;  %v2830_v7 = vsel %vm2824_vm5, %v2827_v31, %v2829_v14  ;;  %v2838_v63 = vsel %vm2824_vm5, %v2835_v61, %v2837_v20  ;;  %v7775_v53 = vand.u32 2147483647, %v6354_v28 }
 0x236   :  { %v1280_v19 = vsub.s32 32, %v1279_v29  ;;  %v1284_v12 = vsub.s32 4294967266, %v1279_v29  ;;  %v6689_v0 = vmul.u32.u64.low %v2839_v30, %v2838_v63  ;;  %v6690_v33 = vmul.u32.u64.high %v2839_v30, %v2838_v63, %v6689_v0 }
 0x237   :  { %v6692_v56 = vmul.u32.u64.low %v2839_v30, %v2834_v36  ;;  %v6693_v38 = vmul.u32.u64.high %v2839_v30, %v2834_v36, %v6692_v56  ;;  %vm6698_vm9 = vcmp.le.f32.partialorder %v7775_v53, 0.7853982  ;;  %vm2906_vm4 = vcmp.gt.s32.totalorder %v2905_v48, 0 }
 0x238   :  { %v1285_v24 = vadd.s32 127, %v1284_v12  ;;  %v1188_v55 = vxor.u32 2147483648, %v1187_v52  ;;  %v1193_v41 = vsel %vm6698_vm9, 0, %v6662_v17  ;;  %v2902_v43 = vand.u32 8388607, %v2895_v59 }
 0x239   :  { %v2907_v37 = vsel %vm2906_vm4, %v2905_v48, 0  ;;  %v1281_v34 = vshll.u32 %v6669_v32, %v1279_v29  ;;  %v1282_v15 = vshrl.u32 %v1264_v1, %v1280_v19  ;;  %v2846_v45 = vmul.u32 %v2839_v30, %v2830_v7 }
 0x23a   :  { %v2909_v3 = vand.u32 31, %v2907_v37  ;;  %vm2848_vm10 = vc.u32 %v6690_v33, %v6692_v56  ;;  %v2849_v27 = vadd.s32 1, %v6693_v38  ;;  %v1197_v4 = vadd.s32 3, %v1193_v41 }
 0x23b   :  { %v1286_v46 = vshll.u32 %v1285_v24, 23  ;;  %v1189_v17 = vsel %vm1106_vm2, %v1188_v55, %v1187_v52  ;;  %v1283_v11 = vor.u32 %v1282_v15, %v1281_v34  ;;  %v2903_v5 = vor.u32 8388608, %v2902_v43 }
 0x23c   :  { %v2910_v31 = vsub.s32 32, %v2909_v3  ;;  %v2850_v51 = vsel %vm2848_vm10, %v2849_v27, %v6693_v38  ;;  %v2912_v32 = vshll.u32 %v4457_v40, %v2909_v3  ;;  %v2915_v30 = vshll.u32 %v7733_v42, %v2909_v3 }
 0x23d   :  { %v2851_v48 = vadd.s32 %v2850_v51, %v2846_v45  ;;  %v6718_v14 = vand.u32 3, %v1197_v4  ;;  %v1287_v9 = vor.u32 4788187, %v1286_v46  ;;  %v2908_v29 = vshrl.u32 %v2907_v37, 5  ;;  %v6739_v45 = vld [vmem:[%s7716_s0 + $0x60] sm:$0xff] }
 0x23e   :  { %v2913_v1 = vshrl.u32 %v7733_v42, %v2910_v31  ;;  %v2916_v61 = vshrl.u32 %v7731_v44, %v2910_v31  ;;  %v2918_v36 = vshll.u32 %v7731_v44, %v2909_v3  ;;  %v2919_v52 = vshrl.u32 %v7727_v47, %v2910_v31 }
 0x23f   :  { %v2852_v2 = vadd.s32 536870912, %v2851_v48  ;;  %v2921_v20 = vshll.u32 %v7727_v47, %v2909_v3  ;;  %v2922_v19 = vshrl.u32 %v4461_v49, %v2910_v31  ;;  %v1192_v12 = vsel %vm6698_vm9, %v6354_v28, %v1189_v17 }
 0x240   :  { %vm1210_vm11 = vcmp.lt.s32.totalorder %v6395_v25, 0  ;;  %v2924_v63 = vshll.u32 %v4461_v49, %v2909_v3  ;;  %v6731_v0 = vshll.u32 %v2903_v5, 8  ;;  %v1290_v38 = vcvt.s32.f32 %v1283_v11 }
 0x241   :  { %v6728_v7 = vshrl.u32 %v2852_v2, 30  ;;  %v2914_v53 = vor.u32 %v2913_v1, %v2912_v32  ;;  %v2917_v24 = vor.u32 %v2916_v61, %v2915_v30  ;;  %v2925_v55 = vshrl.u32 %v4462_v57, %v2910_v31 }
 0x242   :  { %v1288_v41 = vand.u32 2147483647, %v1287_v9  ;;  %v2923_v37 = vor.u32 %v2922_v19, %v2921_v20  ;;  %vm2927_vm12 = vcmp.lt.s32.totalorder %v2908_v29, 1  ;;  %v2911_v62 = vshrl.u32 %v4457_v40, %v2910_v31 }
 0x243   :  { %v2854_v43 = vshll.u32 %v6728_v7, 30  ;;  %v2920_v34 = vor.u32 %v2919_v52, %v2918_v36  ;;  %v2926_v15 = vor.u32 %v2925_v55, %v2924_v63  ;;  %vm2930_vm14 = vcmp.lt.s32.totalorder %v2908_v29, 4 }
 0x244   :  { %4377 = vcosq.f32 %v1192_v12  ;;  %v1294_v3 = vsub.s32 4, %v6653_v13  ;;  %vm2929_vm13 = vcmp.lt.s32.totalorder %v2908_v29, 3  ;;  %vm2928_vm0 = vcmp.lt.s32.totalorder %v2908_v29, 2 }
 0x245   :  { %v6742_v27 = vsub.s32 %v2851_v48, %v2854_v43  ;;  %4379 = vsinq.f32 %v1192_v12  ;;  %v2932_v4 = vsel %vm2930_vm14, %v2920_v34, 2102212464  ;;  %v2935_v46 = vsel %vm2927_vm12, %v2914_v53, %v2917_v24 }
 0x246   :  { %v1291_v31 = vmul.f32 %v1290_v38, %v1288_v41  ;;  %v2936_v17 = vsel %vm2930_vm14, %v2923_v37, 920167782  ;;  %v6750_v11 = vmul.f32 %v6350_v60, %v6739_v45  ;;  %v2931_v5 = vsel %vm2927_vm12, %v2911_v62, %v2914_v53  ;;  %v6778_v53 = vld [vmem:[%s7716_s0 + $0x68] sm:$0xff] }
 0x247   :  { %v2857_v51 = vsub.s32 0, %v6742_v27  ;;  %v2937_v48 = vsel %vm2929_vm13, %v2920_v34, %v2936_v17  ;;  %v2939_v32 = vsel %vm2927_vm12, %v2917_v24, %v2920_v34  ;;  %v2940_v1 = vsel %vm2930_vm14, %v2926_v15, 1326507024 }
 0x248   :  { %v2933_v61 = vsel %vm2929_vm13, %v2917_v24, %v2932_v4  ;;  %v2938_v9 = vsel %vm2928_vm0, %v2935_v46, %v2937_v48  ;;  %v2941_v2 = vsel %vm2929_vm13, %v2923_v37, %v2940_v1  ;;  %v1295_v36 = vsel %vm1210_vm11, %v1294_v3, %v6653_v13 }
 0x249   :  { %v3977_v30 = vmin.u32 %v2857_v51, %v6742_v27  ;;  %v2942_v52 = vsel %vm2928_vm0, %v2939_v32, %v2941_v2  ;;  %v6765_v20 = vmul.u32.u64.low %v6731_v0, %v2938_v9  ;;  %v6766_v19 = vmul.u32.u64.high %v6731_v0, %v2938_v9, %v6765_v20 }
 0x24a   :  { %v7778_v12 = vand.u32 2147483647, %v6395_v25  ;;  %vm2793_vm1 = vcmp.lt.s32.totalorder %v6541_v58, 0  ;;  %v2934_v13 = vsel %vm2928_vm0, %v2931_v5, %v2933_v61  ;;  %vm1200_vm2 = vcmp.eq.s32.totalorder %v6718_v14, 0 }
 0x24b   :  { %v2859_v38 = vclz %v3977_v30  ;;  %v6783_v24 = vmul.u32.u64.low %v6731_v0, %v2942_v52  ;;  %v6784_v55 = vmul.u32.u64.high %v6731_v0, %v2942_v52, %v6783_v24  ;;  %v1292_v41 = vxor.u32 2147483648, %v1291_v31 }
 0x24c   :  { %vm6771_vm15 = vcmp.le.f32.partialorder %v7778_v12, 0.7853982  ;;  %v1315_v62 = vand.u32 2139095040, %v6750_v11  ;;  %vm1203_vm3 = vcmp.eq.s32.totalorder %v6718_v14, 2  ;;  %v2847_v34 = vadd.s32 %v6692_v56, %v6690_v33 }
 0x24d   :  { %v1297_v43 = vsel %vm6771_vm15, 0, %v1295_v36  ;;  %v3978_v37 = vadd.s32 4294967294, %v2859_v38  ;;  %v2953_v29 = vadd.s32 1, %v6766_v19  ;;  %v6796_v15 = vmul.f32 %v6350_v60, %v6778_v53 }
 0x24e   :  { %v4378_v3 = vpop.eup %4377  ;;  %v2877_v4 = vsub.s32 4, %v6728_v7  ;;  %v2950_v46 = vmul.u32 %v6731_v0, %v2934_v13  ;;  %v1316_v51 = vshrl.u32 %v1315_v62, 23  ;;  %v1301_v5 = vadd.s32 3, %v1297_v43 }
 0x24f   :  { %vm3979_vm5 = vcmp.lt.s32.totalorder %v3978_v37, 0  ;;  %v4380_v17 = vpop.eup %4379  ;;  %vm6802_vm6 = vcmp.le.f32.partialorder %v2791_v8, 0.7853982  ;;  %vm2952_vm7 = vc.u32 %v6784_v55, %v6765_v20  ;;  %v1293_v60 = vsel %vm1210_vm11, %v1292_v41, %v1291_v31 }
 0x250   :  { %v2862_v33 = vsel %vm3979_vm5, 0, %v3978_v37  ;;  %v2954_v1 = vsel %vm2952_vm7, %v2953_v29, %v6766_v19  ;;  %v7726_v30 = vand.u32 2147483647, %v6750_v11  ;;  %v3919_v61 = vadd.s32 4294967169, %v1316_v51 }
 0x251   :  { %v2863_v56 = vsub.s32 32, %v2862_v33  ;;  %v2864_v32 = vshll.u32 %v6742_v27, %v2862_v33  ;;  %v2867_v0 = vsub.s32 4294967266, %v2862_v33  ;;  %v1419_v8 = vand.u32 2139095040, %v6796_v15 }
 0x252   :  { %v2878_v36 = vsel %vm2793_vm1, %v2877_v4, %v6728_v7  ;;  %v2955_v52 = vadd.s32 %v2954_v1, %v2950_v46  ;;  %v1201_v12 = vxor.u32 2147483648, %v4380_v17  ;;  %v1204_v31 = vxor.u32 2147483648, %v4378_v3 }
 0x253   :  { %v2865_v9 = vshrl.u32 %v2847_v34, %v2863_v56  ;;  %v2868_v2 = vadd.s32 127, %v2867_v0  ;;  %v6817_v38 = vand.u32 3, %v1301_v5  ;;  %v1322_v27 = vadd.s32 1, %v3919_v61 }
 0x254   :  { %v1296_v19 = vsel %vm6771_vm15, %v6395_v25, %v1293_v60  ;;  %v2956_v41 = vadd.s32 536870912, %v2955_v52  ;;  %v2880_v43 = vsel %vm6802_vm6, 0, %v2878_v36  ;;  %v1319_v37 = vand.u32 8388607, %v7726_v30 }
 0x255   :  { %v2866_v13 = vor.u32 %v2865_v9, %v2864_v32  ;;  %v2869_v24 = vshll.u32 %v2868_v2, 23  ;;  %vm1323_vm8 = vcmp.gt.s32.totalorder %v1322_v27, 0  ;;  %v1420_v7 = vshrl.u32 %v1419_v8, 23 }
 0x256   :  { %v6826_v29 = vshrl.u32 %v2956_v41, 30  ;;  %v1324_v4 = vsel %vm1323_vm8, %v1322_v27, 0  ;;  %v6830_v63 = vsel %vm1200_vm2, %v4378_v3, %v1201_v12  ;;  %v6834_v46 = vsel %vm1203_vm3, %v1204_v31, %v4380_v17 }
 0x257   :  { %v2870_v62 = vor.u32 4788187, %v2869_v24  ;;  %v2873_v34 = vcvt.s32.f32 %v2866_v13  ;;  %4381 = vcosq.f32 %v1296_v19  ;;  %v1326_v51 = vand.u32 31, %v1324_v4 }
 0x258   :  { %4383 = vsinq.f32 %v1296_v19  ;;  %v6836_v33 = vadd.s32 3, %v2880_v43  ;;  %v2958_v60 = vshll.u32 %v6826_v29, 30  ;;  %v6841_v56 = vadd.s32 %v6765_v20, %v6784_v55 }
 0x259   :  { %v2871_v5 = vand.u32 2147483647, %v2870_v62  ;;  %v1320_v32 = vor.u32 8388608, %v1319_v37  ;;  %v1327_v0 = vsub.s32 32, %v1326_v51  ;;  %v3923_v3 = vadd.s32 4294967169, %v1420_v7 }
 0x25a   :  { %v6843_v61 = vsub.s32 %v2955_v52, %v2958_v60  ;;  %v1329_v17 = vshll.u32 %v4457_v40, %v1326_v51  ;;  %v1332_v8 = vshll.u32 %v7733_v42, %v1326_v51  ;;  %v1335_v36 = vshll.u32 %v7731_v44, %v1326_v51 }
 0x25b   :  { %v2874_v1 = vmul.f32 %v2873_v34, %v2871_v5  ;;  %v1330_v9 = vshrl.u32 %v7733_v42, %v1327_v0  ;;  %v1333_v2 = vshrl.u32 %v7731_v44, %v1327_v0  ;;  %v1338_v12 = vshll.u32 %v7727_v47, %v1326_v51 }
 0x25c   :  { %v2961_v55 = vsub.s32 0, %v6843_v61  ;;  %v1325_v31 = vshrl.u32 %v1324_v4, 5  ;;  %v1336_v27 = vshrl.u32 %v7727_v47, %v1327_v0  ;;  %v1328_v52 = vshrl.u32 %v4457_v40, %v1327_v0 }
 0x25d   :  { %v2875_v20 = vxor.u32 2147483648, %v2874_v1  ;;  %v1339_v19 = vshrl.u32 %v4461_v49, %v1327_v0  ;;  %v1341_v13 = vshll.u32 %v4461_v49, %v1326_v51  ;;  %v6856_v24 = vshll.u32 %v1320_v32, 8 }
 0x25e   :  { %v3981_v43 = vmin.u32 %v2961_v55, %v6843_v61  ;;  %v1331_v37 = vor.u32 %v1330_v9, %v1329_v17  ;;  %v1334_v7 = vor.u32 %v1333_v2, %v1332_v8  ;;  %v1337_v34 = vor.u32 %v1336_v27, %v1335_v36 }
 0x25f   :  { %v2876_v41 = vsel %vm2793_vm1, %v2875_v20, %v2874_v1  ;;  %v1340_v4 = vor.u32 %v1339_v19, %v1338_v12  ;;  %v1342_v5 = vshrl.u32 %v4462_v57, %v1327_v0  ;;  %vm1199_vm9 = vcmp.lt.s32.totalorder %v6718_v14, 2 }
 0x260   :  { %v2879_v62 = vsel %vm6802_vm6, %v6541_v58, %v2876_v41  ;;  %v2963_v51 = vclz %v3981_v43  ;;  %vm1344_vm4 = vcmp.lt.s32.totalorder %v1325_v31, 1  ;;  %v1426_v60 = vadd.s32 1, %v3923_v3 }
 0x261   :  { %4385 = vcosq.f32 %v2879_v62  ;;  %v6866_v32 = vpop.eup %4381  ;;  %v2981_v1 = vsub.s32 4, %v6826_v29  ;;  %v1343_v17 = vor.u32 %v1342_v5, %v1341_v13  ;;  %vm1345_vm10 = vcmp.lt.s32.totalorder %v1325_v31, 2 }
 0x262   :  { %4387 = vsinq.f32 %v2879_v62  ;;  %v6869_v8 = vpop.eup %4383  ;;  %vm2897_vm11 = vcmp.lt.s32.totalorder %v6632_v18, 0  ;;  %v3982_v48 = vadd.s32 4294967294, %v2963_v51  ;;  %vm1346_vm12 = vcmp.lt.s32.totalorder %v1325_v31, 3 }
 0x263   :  { %vm1347_vm14 = vcmp.lt.s32.totalorder %v1325_v31, 4  ;;  %v1348_v0 = vsel %vm1344_vm4, %v1328_v52, %v1331_v37  ;;  %vm1307_vm13 = vcmp.eq.s32.totalorder %v6817_v38, 2  ;;  %v1352_v3 = vsel %vm1344_vm4, %v1331_v37, %v1334_v7 }
 0x264   :  { %v1349_v9 = vsel %vm1347_vm14, %v1337_v34, 2102212464  ;;  %v1353_v2 = vsel %vm1347_vm14, %v1340_v4, 920167782  ;;  %v1356_v36 = vsel %vm1344_vm4, %v1334_v7, %v1337_v34  ;;  %vm3983_vm0 = vcmp.lt.s32.totalorder %v3982_v48, 0 }
 0x265   :  { %v1350_v12 = vsel %vm1346_vm12, %v1334_v7, %v1349_v9  ;;  %v1354_v20 = vsel %vm1346_vm12, %v1337_v34, %v1353_v2  ;;  %v1357_v55 = vsel %vm1347_vm14, %v1343_v17, 1326507024  ;;  %vm6880_vm15 = vcmp.le.f32.partialorder %v2895_v59, 0.7853982 }
 0x266   :  { %v2966_v52 = vsel %vm3983_vm0, 0, %v3982_v48  ;;  %v1351_v19 = vsel %vm1345_vm10, %v1348_v0, %v1350_v12  ;;  %v1355_v13 = vsel %vm1345_vm10, %v1352_v3, %v1354_v20  ;;  %v1358_v41 = vsel %vm1346_vm12, %v1340_v4, %v1357_v55 }
 0x267   :  { %v2967_v43 = vsub.s32 32, %v2966_v52  ;;  %v2968_v37 = vshll.u32 %v6843_v61, %v2966_v52  ;;  %v2971_v7 = vsub.s32 4294967266, %v2966_v52  ;;  %v1359_v62 = vsel %vm1345_vm10, %v1356_v36, %v1358_v41 }
 0x268   :  { %v6890_v34 = vmul.u32.u64.low %v6856_v24, %v1359_v62  ;;  %v6891_v5 = vmul.u32.u64.high %v6856_v24, %v1359_v62, %v6890_v34  ;;  %v6894_v59 = vmul.u32.u64.low %v6856_v24, %v1355_v13  ;;  %v6895_v51 = vmul.u32.u64.high %v6856_v24, %v1355_v13, %v6894_v59 }
 0x269   :  { %v6899_v17 = vand.u32 3, %v6836_v33  ;;  %v2969_v4 = vshrl.u32 %v6841_v56, %v2967_v43  ;;  %v2972_v48 = vadd.s32 127, %v2971_v7  ;;  %vm1427_vm1 = vcmp.gt.s32.totalorder %v1426_v60, 0 }
 0x26a   :  { %v1308_v61 = vxor.u32 2147483648, %v6866_v32  ;;  %v7725_v31 = vand.u32 2147483647, %v6796_v15  ;;  %v1428_v0 = vsel %vm1427_vm1, %v1426_v60, 0  ;;  %v6906_v9 = vmul.f32 %v6537_v39, %v6739_v45 }
 0x26b   :  { %v4386_v3 = vpop.eup %4385  ;;  %v2970_v2 = vor.u32 %v2969_v4, %v2968_v37  ;;  %v2973_v36 = vshll.u32 %v2972_v48, 23  ;;  %v1367_v12 = vmul.u32 %v6856_v24, %v1351_v19  ;;  %v1430_v33 = vand.u32 31, %v1428_v0 }
 0x26c   :  { %v4388_v20 = vpop.eup %4387  ;;  %v6913_v56 = vsel %vm1199_vm9, %v6830_v63, %v6834_v46  ;;  %v2982_v60 = vsel %vm2897_vm11, %v2981_v1, %v6826_v29  ;;  %vm1369_vm2 = vc.u32 %v6891_v5, %v6894_v59  ;;  %v1370_v45 = vadd.s32 1, %v6895_v51 }
 0x26d   :  { %vm2887_vm3 = vcmp.eq.s32.totalorder %v6899_v17, 0  ;;  %v2974_v24 = vor.u32 4788187, %v2973_v36  ;;  %v2977_v55 = vcvt.s32.f32 %v2970_v2  ;;  %v1431_v52 = vsub.s32 32, %v1430_v33 }
 0x26e   :  { %v1305_v19 = vxor.u32 2147483648, %v6869_v8  ;;  %vm2890_vm5 = vcmp.eq.s32.totalorder %v6899_v17, 2  ;;  %v1371_v14 = vsel %vm1369_vm2, %v1370_v45, %v6895_v51  ;;  %v1423_v63 = vand.u32 8388607, %v7725_v31 }
 0x26f   :  { %v6930_v29 = vsel %vm1307_vm13, %v1308_v61, %v6869_v8  ;;  %v2975_v46 = vand.u32 2147483647, %v2974_v24  ;;  %v2984_v1 = vsel %vm6880_vm15, 0, %v2982_v60  ;;  %v1372_v13 = vadd.s32 %v1371_v14, %v1367_v12 }
 0x270   :  { %vm1304_vm6 = vcmp.eq.s32.totalorder %v6817_v38, 0  ;;  %v1433_v41 = vshll.u32 %v4457_v40, %v1430_v33  ;;  %v1434_v43 = vshrl.u32 %v7733_v42, %v1431_v52  ;;  %v1436_v37 = vshll.u32 %v7733_v42, %v1430_v33 }
 0x271   :  { %v1437_v7 = vshrl.u32 %v7731_v44, %v1431_v52  ;;  %vm2886_vm7 = vcmp.lt.s32.totalorder %v6899_v17, 2  ;;  %v2978_v62 = vmul.f32 %v2977_v55, %v2975_v46  ;;  %v1373_v8 = vadd.s32 536870912, %v1372_v13 }
 0x272   :  { %v1439_v34 = vshll.u32 %v7731_v44, %v1430_v33  ;;  %v1440_v51 = vshrl.u32 %v7727_v47, %v1431_v52  ;;  %v2988_v4 = vadd.s32 3, %v2984_v1  ;;  %v1424_v48 = vor.u32 8388608, %v1423_v63 }
 0x273   :  { %v1429_v61 = vshrl.u32 %v1428_v0, 5  ;;  %v1442_v2 = vshll.u32 %v7727_v47, %v1430_v33  ;;  %v2891_v36 = vxor.u32 2147483648, %v4386_v3  ;;  %v2979_v12 = vxor.u32 2147483648, %v2978_v62 }
 0x274   :  { %v6943_v60 = vshrl.u32 %v1373_v8, 30  ;;  %v1443_v45 = vshrl.u32 %v4461_v49, %v1431_v52  ;;  %vm1196_vm8 = vweird.f32 %v6354_v28  ;;  %vm2883_vm9 = vweird.f32 %v6541_v58 }
 0x275   :  { %v2888_v24 = vxor.u32 2147483648, %v4388_v20  ;;  %v1435_v55 = vor.u32 %v1434_v43, %v1433_v41  ;;  %v1445_v14 = vshll.u32 %v4461_v49, %v1430_v33  ;;  %v1446_v46 = vshrl.u32 %v4462_v57, %v1431_v52 }
 0x276   :  { %vm1303_vm4 = vcmp.lt.s32.totalorder %v6817_v38, 2  ;;  %v2980_v0 = vsel %vm2897_vm11, %v2979_v12, %v2978_v62  ;;  %v1375_v63 = vshll.u32 %v6943_v60, 30  ;;  %v1438_v1 = vor.u32 %v1437_v7, %v1436_v37 }
 0x277   :  { %v1441_v8 = vor.u32 %v1440_v51, %v1439_v34  ;;  %v2983_v31 = vsel %vm6880_vm15, %v6632_v18, %v2980_v0  ;;  %v1444_v30 = vor.u32 %v1443_v45, %v1442_v2  ;;  %v1447_v47 = vor.u32 %v1446_v46, %v1445_v14 }
 0x278   :  { %vm1448_vm10 = vcmp.lt.s32.totalorder %v1429_v61, 1  ;;  %4389 = vcosq.f32 %v2983_v31  ;;  %v6957_v33 = vsub.s32 %v1372_v13, %v1375_v63  ;;  %vm1451_vm12 = vcmp.lt.s32.totalorder %v1429_v61, 4 }
 0x279   :  { %v6959_v41 = vshll.u32 %v1424_v48, 8  ;;  %v2889_v43 = vsel %vm2887_vm3, %v4386_v3, %v2888_v24  ;;  %v2892_v37 = vsel %vm2890_vm5, %v2891_v36, %v4388_v20  ;;  %4391 = vsinq.f32 %v2983_v31 }
 0x27a   :  { %vm1450_vm11 = vcmp.lt.s32.totalorder %v1429_v61, 3  ;;  %v1378_v27 = vsub.s32 0, %v6957_v33  ;;  %v1432_v7 = vshrl.u32 %v4457_v40, %v1431_v52  ;;  %vm1449_vm14 = vcmp.lt.s32.totalorder %v1429_v61, 2 }
 0x27b   :  { %v1456_v62 = vsel %vm1448_vm10, %v1435_v55, %v1438_v1  ;;  %v1453_v13 = vsel %vm1451_vm12, %v1441_v8, 2102212464  ;;  %v1457_v34 = vsel %vm1451_vm12, %v1444_v30, 920167782  ;;  %v1460_v51 = vsel %vm1448_vm10, %v1438_v1, %v1441_v8 }
 0x27c   :  { %v1461_v48 = vsel %vm1451_vm12, %v1447_v47, 1326507024  ;;  %v1306_v3 = vsel %vm1304_vm6, %v6866_v32, %v1305_v19  ;;  %v3920_v20 = vmin.u32 %v1378_v27, %v6957_v33  ;;  %v1458_v31 = vsel %vm1450_vm11, %v1441_v8, %v1457_v34 }
 0x27d   :  { %v1462_v2 = vsel %vm1450_vm11, %v1444_v30, %v1461_v48  ;;  %v2893_v52 = vsel %vm2886_vm7, %v2889_v43, %v2892_v37  ;;  %v1459_v36 = vsel %vm1449_vm14, %v1456_v62, %v1458_v31  ;;  %v3002_v45 = vand.u32 2139095040, %v6906_v9 }
 0x27e   :  { %v1463_v12 = vsel %vm1449_vm14, %v1460_v51, %v1462_v2  ;;  %v2989_v47 = vand.u32 3, %v2988_v4  ;;  %v1380_v24 = vclz %v3920_v20  ;;  %v1452_v14 = vsel %vm1448_vm10, %v1432_v7, %v1435_v55  ;;  %v3442_v2 = vld [vmem:[%s7719_s3 + $0x58] sm:$0xff] }
 0x27f   :  { %v1454_v32 = vsel %vm1450_vm11, %v1438_v1, %v1453_v13  ;;  %v6983_v19 = vmul.u32.u64.low %v6959_v41, %v1463_v12  ;;  %v6984_v46 = vmul.u32.u64.high %v6959_v41, %v1463_v12, %v6983_v19  ;;  %v1207_v0 = vsel %vm1196_vm8, nan, %v6913_v56 }
 0x280   :  { %v6987_v30 = vmul.u32.u64.low %v6959_v41, %v1459_v36  ;;  %v6988_v17 = vmul.u32.u64.high %v6959_v41, %v1459_v36, %v6987_v30  ;;  %v2894_v4 = vsel %vm2883_vm9, nan, %v2893_v52  ;;  %v3921_v63 = vadd.s32 4294967294, %v1380_v24 }
 0x281   :  { %v3003_v55 = vshrl.u32 %v3002_v45, 23  ;;  %vm1300_vm13 = vweird.f32 %v6395_v25  ;;  %v1310_v1 = vsel %vm1303_vm4, %v1306_v3, %v6930_v29  ;;  %vm2987_vm0 = vweird.f32 %v6632_v18  ;;  %v3441_v29 = vld [vmem:[%s7719_s3 + $0x50] sm:$0xff] }
 0x282   :  { %v1455_v8 = vsel %vm1449_vm14, %v1452_v14, %v1454_v32  ;;  %v4390_v43 = vpop.eup %4389  ;;  %vm2994_vm15 = vcmp.eq.s32.totalorder %v2989_v47, 2  ;;  %vm3922_vm1 = vcmp.lt.s32.totalorder %v3921_v63, 0  ;;  %v7004_v28 = vmul.f32 %v6537_v39, %v6778_v53 }
 0x283   :  { %v3984_v58 = vadd.s32 4294967169, %v3003_v55  ;;  %v4392_v56 = vpop.eup %4391  ;;  %vm2991_vm2 = vcmp.eq.s32.totalorder %v2989_v47, 0  ;;  %v2995_v37 = vxor.u32 2147483648, %v4390_v43  ;;  %v3425_v27 = vsub.f32 %v1207_v0, %v2894_v4 }
 0x284   :  { %v2999_v7 = vand.u32 2147483647, %v6906_v9  ;;  %vm2990_vm3 = vcmp.lt.s32.totalorder %v2989_v47, 2  ;;  %v2992_v38 = vxor.u32 2147483648, %v4392_v56  ;;  %v1471_v61 = vmul.u32 %v6959_v41, %v1455_v8 }
 0x285   :  { %vm1473_vm5 = vc.u32 %v6984_v46, %v6987_v30  ;;  %v2996_v39 = vsel %vm2994_vm15, %v2995_v37, %v4392_v56  ;;  %v1383_v53 = vsel %vm3922_vm1, 0, %v3921_v63  ;;  %v1474_v62 = vadd.s32 1, %v6988_v17 }
 0x286   :  { %v3009_v13 = vadd.s32 1, %v3984_v58  ;;  %v1311_v34 = vsel %vm1300_vm13, nan, %v1310_v1  ;;  %v2993_v51 = vsel %vm2991_vm2, %v4390_v43, %v2992_v38  ;;  %v1368_v48 = vadd.s32 %v6894_v59, %v6891_v5 }
 0x287   :  { %v2997_v3 = vsel %vm2990_vm3, %v2993_v51, %v2996_v39  ;;  %v7018_v20 = vmul.f32 %v3441_v29, %v3425_v27  ;;  %v1475_v41 = vsel %vm1473_vm5, %v1474_v62, %v6988_v17  ;;  %v1388_v52 = vsub.s32 4294967266, %v1383_v53 }
 0x288   :  { %vm3010_vm6 = vcmp.gt.s32.totalorder %v3009_v13, 0  ;;  %v2998_v31 = vsel %vm2987_vm0, nan, %v2997_v3  ;;  %v1476_v25 = vadd.s32 %v1475_v41, %v1471_v61  ;;  %v3006_v36 = vand.u32 8388607, %v2999_v7 }
 0x289   :  { %v3426_v12 = vsub.f32 %v1311_v34, %v2998_v31  ;;  %v1384_v5 = vsub.s32 32, %v1383_v53  ;;  %v3011_v59 = vsel %vm3010_vm6, %v3009_v13, 0  ;;  %v3106_v45 = vand.u32 2139095040, %v7004_v28 }
 0x28a   :  { %v1477_v47 = vadd.s32 536870912, %v1476_v25  ;;  %v3013_v14 = vand.u32 31, %v3011_v59  ;;  %v1385_v18 = vshll.u32 %v6957_v33, %v1383_v53  ;;  %v1389_v32 = vadd.s32 127, %v1388_v52 }
 0x28b   :  { %v7029_v24 = vmul.f32 %v3442_v2, %v3426_v12  ;;  %v3007_v17 = vor.u32 8388608, %v3006_v36  ;;  %v1386_v4 = vshrl.u32 %v1368_v48, %v1384_v5  ;;  %v3107_v55 = vshrl.u32 %v3106_v45, 23 }
 0x28c   :  { %v7032_v19 = vshrl.u32 %v1477_v47, 30  ;;  %v3014_v63 = vsub.s32 32, %v3013_v14  ;;  %v3016_v8 = vshll.u32 %v4457_v40, %v3013_v14  ;;  %v3019_v43 = vshll.u32 %v7733_v42, %v3013_v14 }
 0x28d   :  { %v3468_v0 = vpack.c.bf16 %v7029_v24, %v7018_v20  ;;  %v3022_v56 = vshll.u32 %v7731_v44, %v3013_v14  ;;  %v7785_v37 = vmov 2102212464   ;;  %v1390_v38 = vshll.u32 %v1389_v32, 23 }
 0x28e   :  { %v1479_v1 = vshll.u32 %v7032_v19, 30  ;;  %v3017_v58 = vshrl.u32 %v7733_v42, %v3014_v63  ;;  %v3020_v33 = vshrl.u32 %v7731_v44, %v3014_v63  ;;  %v3023_v27 = vshrl.u32 %v7785_v37, %v3014_v63 }
 0x28f   :  { %4060 = vmatmul.mubr.bf16.gmra.mrb[8].mxu0 %v3468_v0  ;;  %v3012_v61 = vshrl.u32 %v3011_v59, 5  ;;  %v3025_v39 = vshll.u32 %v7785_v37, %v3013_v14  ;;  %v1387_v53 = vor.u32 %v1386_v4, %v1385_v18  ;;  %v3047_v62 = vshll.u32 %v3007_v17, 8 }
 0x290   :  { %v7043_v29 = vsub.s32 %v1476_v25, %v1479_v1  ;;  %v3988_v13 = vadd.s32 4294967169, %v3107_v55  ;;  %v3015_v51 = vshrl.u32 %v4457_v40, %v3014_v63  ;;  %v3018_v48 = vor.u32 %v3017_v58, %v3016_v8 }
 0x291   :  { %v3026_v3 = vshrl.u32 %v4461_v49, %v3014_v63  ;;  %v3021_v41 = vor.u32 %v3020_v33, %v3019_v43  ;;  %v3024_v31 = vor.u32 %v3023_v27, %v3022_v56  ;;  %v3028_v2 = vshll.u32 %v4461_v49, %v3013_v14 }
 0x292   :  { %v1482_v34 = vsub.s32 0, %v7043_v29  ;;  %v3029_v52 = vshrl.u32 %v4462_v57, %v3014_v63  ;;  %v1391_v25 = vor.u32 4788187, %v1390_v38  ;;  %vm3031_vm7 = vcmp.lt.s32.totalorder %v3012_v61, 1 }
 0x293   :  { %v3027_v12 = vor.u32 %v3026_v3, %v3025_v39  ;;  %vm3033_vm8 = vcmp.lt.s32.totalorder %v3012_v61, 3  ;;  %vm3034_vm9 = vcmp.lt.s32.totalorder %v3012_v61, 4  ;;  %v3113_v59 = vadd.s32 1, %v3988_v13 }
 0x294   :  { %v3924_v36 = vmin.u32 %v1482_v34, %v7043_v29  ;;  %v3030_v5 = vor.u32 %v3029_v52, %v3028_v2  ;;  %v1394_v45 = vcvt.s32.f32 %v1387_v53  ;;  %vm3032_vm4 = vcmp.lt.s32.totalorder %v3012_v61, 2 }
 0x295   :  { %v3035_v18 = vsel %vm3031_vm7, %v3015_v51, %v3018_v48  ;;  %v3036_v32 = vsel %vm3034_vm9, %v3024_v31, 2102212464  ;;  %v3039_v17 = vsel %vm3031_vm7, %v3018_v48, %v3021_v41  ;;  %v3040_v0 = vsel %vm3034_vm9, %v3027_v12, 920167782 }
 0x296   :  { %v1484_v47 = vclz %v3924_v36  ;;  %v3043_v4 = vsel %vm3031_vm7, %v3021_v41, %v3024_v31  ;;  %v3037_v63 = vsel %vm3033_vm8, %v3021_v41, %v3036_v32  ;;  %v3041_v55 = vsel %vm3033_vm8, %v3024_v31, %v3040_v0 }
 0x297   :  { %v3044_v1 = vsel %vm3034_vm9, %v3030_v5, 1326507024  ;;  %v3038_v8 = vsel %vm3032_vm4, %v3035_v18, %v3037_v63  ;;  %v3042_v43 = vsel %vm3032_vm4, %v3039_v17, %v3041_v55  ;;  %vm3114_vm10 = vcmp.gt.s32.totalorder %v3113_v59, 0 }
 0x298   :  { %v3925_v14 = vadd.s32 4294967294, %v1484_v47  ;;  %v3045_v58 = vsel %vm3033_vm8, %v3027_v12, %v3044_v1  ;;  %v7055_v56 = vmul.u32.u64.low %v3047_v62, %v3042_v43  ;;  %v7056_v27 = vmul.u32.u64.high %v3047_v62, %v3042_v43, %v7055_v56 }
 0x299   :  { %v3046_v33 = vsel %vm3032_vm4, %v3043_v4, %v3045_v58  ;;  %v1392_v38 = vand.u32 2147483647, %v1391_v25  ;;  %v3115_v51 = vsel %vm3114_vm10, %v3113_v59, 0  ;;  %v3054_v48 = vmul.u32 %v3047_v62, %v3038_v8 }
 0x29a   :  { %vm3926_vm12 = vcmp.lt.s32.totalorder %v3925_v14, 0  ;;  %v7059_v53 = vmul.u32.u64.low %v3047_v62, %v3046_v33  ;;  %v7060_v13 = vmul.u32.u64.high %v3047_v62, %v3046_v33, %v7059_v53  ;;  %v3117_v3 = vand.u32 31, %v3115_v51 }
 0x29b   :  { %v1487_v39 = vsel %vm3926_vm12, 0, %v3925_v14  ;;  %v1472_v61 = vadd.s32 %v6987_v30, %v6984_v46  ;;  %v3057_v31 = vadd.s32 1, %v7056_v27  ;;  %v3103_v2 = vand.u32 2147483647, %v7004_v28 }
 0x29c   :  { %v1492_v34 = vsub.s32 4294967266, %v1487_v39  ;;  %v1488_v41 = vsub.s32 32, %v1487_v39  ;;  %v1395_v52 = vmul.f32 %v1394_v45, %v1392_v38  ;;  %vm3056_vm11 = vc.u32 %v7060_v13, %v7055_v56 }
 0x29d   :  { %v3058_v25 = vsel %vm3056_vm11, %v3057_v31, %v7056_v27  ;;  %v3118_v12 = vsub.s32 32, %v3117_v3  ;;  %v7786_v62 = vand.u32 2147483647, %v6750_v11  ;;  %vm1314_vm13 = vcmp.lt.s32.totalorder %v6750_v11, 0 }
 0x29e   :  { %v1493_v36 = vadd.s32 127, %v1492_v34  ;;  %v3059_v5 = vadd.s32 %v3058_v25, %v3054_v48  ;;  %v1489_v46 = vshll.u32 %v7043_v29, %v1487_v39  ;;  %v1490_v30 = vshrl.u32 %v1472_v61, %v1488_v41 }
 0x29f   :  { %vm7071_vm14 = vcmp.le.f32.partialorder %v7786_v62, 0.7853982  ;;  %v3110_v45 = vand.u32 8388607, %v3103_v2  ;;  %v1396_v47 = vxor.u32 2147483648, %v1395_v52  ;;  %v3116_v17 = vshrl.u32 %v3115_v51, 5 }
 0x2a0   :  { %v1494_v18 = vshll.u32 %v1493_v36, 23  ;;  %v3060_v32 = vadd.s32 536870912, %v3059_v5  ;;  %v3120_v0 = vshll.u32 %v4457_v40, %v3117_v3  ;;  %v3121_v4 = vshrl.u32 %v7733_v42, %v3118_v12 }
 0x2a1   :  { %v3123_v14 = vshll.u32 %v7733_v42, %v3117_v3  ;;  %v3124_v63 = vshrl.u32 %v7731_v44, %v3118_v12  ;;  %v3126_v29 = vshll.u32 %v7731_v44, %v3117_v3  ;;  %v3127_v1 = vshrl.u32 %v7785_v37, %v3118_v12 }
 0x2a2   :  { %v7083_v55 = vshrl.u32 %v3060_v32, 30  ;;  %v3129_v8 = vshll.u32 %v7785_v37, %v3117_v3  ;;  %v1491_v43 = vor.u32 %v1490_v30, %v1489_v46  ;;  %v3130_v58 = vshrl.u32 %v4461_v49, %v3118_v12 }
 0x2a3   :  { %v3132_v33 = vshll.u32 %v4461_v49, %v3117_v3  ;;  %v3133_v27 = vshrl.u32 %v4462_v57, %v3118_v12  ;;  %v1398_v38 = vsub.s32 4, %v6943_v60  ;;  %v1495_v39 = vor.u32 4788187, %v1494_v18  ;;  %v7099_v3 = vld [vmem:[%s7716_s0 + $0x70] sm:$0xff] }
 0x2a4   :  { %v3062_v53 = vshll.u32 %v7083_v55, 30  ;;  %v3111_v34 = vor.u32 8388608, %v3110_v45  ;;  %v3119_v51 = vshrl.u32 %v4457_v40, %v3118_v12  ;;  %v3122_v48 = vor.u32 %v3121_v4, %v3120_v0 }
 0x2a5   :  { %v3125_v61 = vor.u32 %v3124_v63, %v3123_v14  ;;  %v3131_v41 = vor.u32 %v3130_v58, %v3129_v8  ;;  %v3128_v36 = vor.u32 %v3127_v1, %v3126_v29  ;;  %vm3135_vm0 = vcmp.lt.s32.totalorder %v3116_v17, 1 }
 0x2a6   :  { %v7094_v31 = vsub.s32 %v3059_v5, %v3062_v53  ;;  %vm3138_vm15 = vcmp.lt.s32.totalorder %v3116_v17, 4  ;;  %v1397_v25 = vsel %vm1314_vm13, %v1396_v47, %v1395_v52  ;;  %v1498_v62 = vcvt.s32.f32 %v1491_v43  ;;  %v4431_v52 = vld [vmem:[%s7717_s1] ss:$0 sm:$0xff] }
 0x2a7   :  { %v3134_v46 = vor.u32 %v3133_v27, %v3132_v33  ;;  %vm3137_vm1 = vcmp.lt.s32.totalorder %v3116_v17, 3  ;;  %v1496_v12 = vand.u32 2147483647, %v1495_v39  ;;  %vm3136_vm2 = vcmp.lt.s32.totalorder %v3116_v17, 2 }
 0x2a8   :  { %v3065_v30 = vsub.s32 0, %v7094_v31  ;;  %v3140_v5 = vsel %vm3138_vm15, %v3128_v36, 2102212464  ;;  %vm1418_vm3 = vcmp.lt.s32.totalorder %v6796_v15, 0  ;;  %v3143_v45 = vsel %vm3135_vm0, %v3122_v48, %v3125_v61 }
 0x2a9   :  { %v3144_v18 = vsel %vm3138_vm15, %v3131_v41, 920167782  ;;  %v3151_v32 = vshll.u32 %v3111_v34, 8  ;;  %v7112_v47 = vmul.f32 %v4431_v52, %v7099_v3  ;;  %v7117_v0 = vsel %vm7071_vm14, %v6750_v11, %v1397_v25 }
 0x2aa   :  { %v3985_v4 = vmin.u32 %v3065_v30, %v7094_v31  ;;  %v3139_v14 = vsel %vm3135_vm0, %v3119_v51, %v3122_v48  ;;  %v3145_v63 = vsel %vm3137_vm1, %v3128_v36, %v3144_v18  ;;  %v3141_v29 = vsel %vm3137_vm1, %v3125_v61, %v3140_v5  ;;  %v7155_v5 = vld [vmem:[%s7716_s0 + $0x78] sm:$0xff] }
 0x2ab   :  { %v3146_v1 = vsel %vm3136_vm2, %v3143_v45, %v3145_v63  ;;  %v3147_v8 = vsel %vm3135_vm0, %v3125_v61, %v3128_v36  ;;  %v3148_v43 = vsel %vm3138_vm15, %v3134_v46, 1326507024  ;;  %v1399_v58 = vsel %vm1314_vm13, %v1398_v38, %v6943_v60 }
 0x2ac   :  { %v7789_v33 = vand.u32 2147483647, %v6796_v15  ;;  %v1499_v39 = vmul.f32 %v1498_v62, %v1496_v12  ;;  %vm3001_vm6 = vcmp.lt.s32.totalorder %v6906_v9, 0  ;;  %v3067_v53 = vclz %v3985_v4 }
 0x2ad   :  { %4393 = vcosq.f32 %v7117_v0  ;;  %v3149_v34 = vsel %vm3137_vm1, %v3131_v41, %v3148_v43  ;;  %v7138_v51 = vmul.u32.u64.low %v3151_v32, %v3146_v1  ;;  %v7139_v48 = vmul.u32.u64.high %v3151_v32, %v3146_v1, %v7138_v51 }
 0x2ae   :  { %vm7131_vm5 = vcmp.le.f32.partialorder %v7789_v33, 0.7853982  ;;  %v3986_v61 = vadd.s32 4294967294, %v3067_v53  ;;  %v3142_v60 = vsel %vm3136_vm2, %v3139_v14, %v3141_v29  ;;  %v3150_v38 = vsel %vm3136_vm2, %v3147_v8, %v3149_v34 }
 0x2af   :  { %v1523_v36 = vand.u32 2139095040, %v7112_v47  ;;  %v1502_v25 = vsub.s32 4, %v7032_v19  ;;  %v3085_v62 = vsub.s32 4, %v7083_v55  ;;  %v1500_v30 = vxor.u32 2147483648, %v1499_v39 }
 0x2b0   :  { %v7147_v46 = vmul.u32.u64.low %v3151_v32, %v3150_v38  ;;  %v7148_v12 = vmul.u32.u64.high %v3151_v32, %v3150_v38, %v7147_v46  ;;  %v3055_v41 = vadd.s32 %v7055_v56, %v7060_v13  ;;  %vm3987_vm7 = vcmp.lt.s32.totalorder %v3986_v61, 0 }
 0x2b1   :  { %v1524_v17 = vshrl.u32 %v1523_v36, 23  ;;  %v1401_v45 = vsel %vm7071_vm14, 0, %v1399_v58  ;;  %v3070_v18 = vsel %vm3987_vm7, 0, %v3986_v61  ;;  %v3158_v4 = vmul.u32 %v3151_v32, %v3142_v60 }
 0x2b2   :  { %v3161_v14 = vadd.s32 1, %v7139_v48  ;;  %v3071_v63 = vsub.s32 32, %v3070_v18  ;;  %v3072_v29 = vshll.u32 %v7094_v31, %v3070_v18  ;;  %v3075_v1 = vsub.s32 4294967266, %v3070_v18 }
 0x2b3   :  { %v3927_v8 = vadd.s32 4294967169, %v1524_v17  ;;  %v1503_v56 = vsel %vm1418_vm3, %v1502_v25, %v7032_v19  ;;  %v3086_v13 = vsel %vm3001_vm6, %v3085_v62, %v7083_v55  ;;  %vm3160_vm8 = vc.u32 %v7148_v12, %v7138_v51 }
 0x2b4   :  { %v7170_v59 = vmul.f32 %v4431_v52, %v7155_v5  ;;  %v1501_v32 = vsel %vm1418_vm3, %v1500_v30, %v1499_v39  ;;  %v3073_v31 = vshrl.u32 %v3055_v41, %v3071_v63  ;;  %v3076_v43 = vadd.s32 127, %v3075_v1 }
 0x2b5   :  { %v3162_v58 = vsel %vm3160_vm8, %v3161_v14, %v7139_v48  ;;  %v1405_v33 = vadd.s32 3, %v1401_v45  ;;  %vm7177_vm9 = vcmp.le.f32.partialorder %v2999_v7, 0.7853982  ;;  %v1530_v53 = vadd.s32 1, %v3927_v8 }
 0x2b6   :  { %v3163_v55 = vadd.s32 %v3162_v58, %v3158_v4  ;;  %v1505_v52 = vsel %vm7131_vm5, 0, %v1503_v56  ;;  %v3074_v34 = vor.u32 %v3073_v31, %v3072_v29  ;;  %v3077_v61 = vshll.u32 %v3076_v43, 23 }
 0x2b7   :  { %v7729_v39 = vand.u32 2147483647, %v7112_v47  ;;  %v7184_v60 = vpop.eup %4393  ;;  %v1504_v48 = vsel %vm7131_vm5, %v6796_v15, %v1501_v32  ;;  %v3088_v7 = vsel %vm7177_vm9, 0, %v3086_v13  ;;  %vm1531_vm4 = vcmp.gt.s32.totalorder %v1530_v53, 0 }
 0x2b8   :  { %v3164_v38 = vadd.s32 536870912, %v3163_v55  ;;  %v3078_v36 = vor.u32 4788187, %v3077_v61  ;;  %v3081_v25 = vcvt.s32.f32 %v3074_v34  ;;  %v1532_v62 = vsel %vm1531_vm4, %v1530_v53, 0 }
 0x2b9   :  { %v1627_v46 = vand.u32 2139095040, %v7170_v59  ;;  %v7192_v30 = vand.u32 3, %v1405_v33  ;;  %v7194_v41 = vadd.s32 3, %v1505_v52  ;;  %v1534_v45 = vand.u32 31, %v1532_v62 }
 0x2ba   :  { %v7196_v17 = vshrl.u32 %v3164_v38, 30  ;;  %4395 = vsinq.f32 %v7117_v0  ;;  %v1412_v27 = vxor.u32 2147483648, %v7184_v60  ;;  %v3079_v18 = vand.u32 2147483647, %v3078_v36 }
 0x2bb   :  { %v7200_v4 = vadd.s32 3, %v3088_v7  ;;  %4397 = vcosq.f32 %v1504_v48  ;;  %v1527_v63 = vand.u32 8388607, %v7729_v39  ;;  %v1535_v29 = vsub.s32 32, %v1534_v45 }
 0x2bc   :  { %v3166_v14 = vshll.u32 %v7196_v17, 30  ;;  %v3082_v1 = vmul.f32 %v3081_v25, %v3079_v18  ;;  %v7205_v8 = vshrl.u32 %v1532_v62, 5  ;;  %v1537_v56 = vshll.u32 %v4457_v40, %v1534_v45 }
 0x2bd   :  { %v1628_v13 = vshrl.u32 %v1627_v46, 23  ;;  %v1538_v0 = vshrl.u32 %v7733_v42, %v1535_v29  ;;  %v1540_v31 = vshll.u32 %v7733_v42, %v1534_v45  ;;  %v1543_v43 = vshll.u32 %v7731_v44, %v1534_v45 }
 0x2be   :  { %v7208_v32 = vsub.s32 %v3163_v55, %v3166_v14  ;;  %v3083_v58 = vxor.u32 2147483648, %v3082_v1  ;;  %v1541_v33 = vshrl.u32 %v7731_v44, %v1535_v29  ;;  %v1544_v53 = vshrl.u32 %v7785_v37, %v1535_v29 }
 0x2bf   :  { %v1546_v52 = vshll.u32 %v7785_v37, %v1534_v45  ;;  %4399 = vsinq.f32 %v1504_v48  ;;  %v1528_v61 = vor.u32 8388608, %v1527_v63  ;;  %v1547_v55 = vshrl.u32 %v4461_v49, %v1535_v29 }
 0x2c0   :  { %v3169_v34 = vsub.s32 0, %v7208_v32  ;;  %v3084_v7 = vsel %vm3001_vm6, %v3083_v58, %v3082_v1  ;;  %v1549_v38 = vshll.u32 %v4461_v49, %v1534_v45  ;;  %v7730_v36 = vand.u32 2147483647, %v7170_v59 }
 0x2c1   :  { %v3931_v25 = vadd.s32 4294967169, %v1628_v13  ;;  %v1539_v46 = vor.u32 %v1538_v0, %v1537_v56  ;;  %v1542_v18 = vor.u32 %v1541_v33, %v1540_v31  ;;  %v1545_v14 = vor.u32 %v1544_v53, %v1543_v43 }
 0x2c2   :  { %v3989_v62 = vmin.u32 %v3169_v34, %v7208_v32  ;;  %v3087_v48 = vsel %vm7177_vm9, %v6906_v9, %v3084_v7  ;;  %v1548_v63 = vor.u32 %v1547_v55, %v1546_v52  ;;  %v1550_v39 = vshrl.u32 %v4462_v57, %v1535_v29 }
 0x2c3   :  { %vm1552_vm10 = vcmp.lt.s32.totalorder %v7205_v8, 1  ;;  %v3159_v45 = vadd.s32 %v7138_v51, %v7148_v12  ;;  %v1536_v13 = vshrl.u32 %v4457_v40, %v1535_v29  ;;  %v7231_v58 = vshll.u32 %v1528_v61, 8 }
 0x2c4   :  { %v3171_v1 = vclz %v3989_v62  ;;  %v4396_v56 = vpop.eup %4395  ;;  %vm1411_vm12 = vcmp.eq.s32.totalorder %v7192_v30, 2  ;;  %v1551_v0 = vor.u32 %v1550_v39, %v1549_v38  ;;  %vm1554_vm11 = vcmp.lt.s32.totalorder %v7205_v8, 3 }
 0x2c5   :  { %vm1555_vm14 = vcmp.lt.s32.totalorder %v7205_v8, 4  ;;  %v1634_v19 = vadd.s32 1, %v3931_v25  ;;  %v7236_v31 = vpop.eup %4397  ;;  %vm1408_vm13 = vcmp.eq.s32.totalorder %v7192_v30, 0  ;;  %4401 = vcosq.f32 %v3087_v48 }
 0x2c6   :  { %v3990_v51 = vadd.s32 4294967294, %v3171_v1  ;;  %vm1553_vm0 = vcmp.lt.s32.totalorder %v7205_v8, 2  ;;  %v1560_v12 = vsel %vm1552_vm10, %v1539_v46, %v1542_v18  ;;  %4403 = vsinq.f32 %v3087_v48 }
 0x2c7   :  { %v1561_v39 = vsel %vm1555_vm14, %v1548_v63, 920167782  ;;  %v1564_v29 = vsel %vm1552_vm10, %v1542_v18, %v1545_v14  ;;  %v1565_v43 = vsel %vm1555_vm14, %v1551_v0, 1326507024  ;;  %vm3105_vm15 = vcmp.lt.s32.totalorder %v7004_v28, 0 }
 0x2c8   :  { %vm3991_vm1 = vcmp.lt.s32.totalorder %v3990_v51, 0  ;;  %v1556_v33 = vsel %vm1552_vm10, %v1536_v13, %v1539_v46  ;;  %v1562_v53 = vsel %vm1554_vm11, %v1545_v14, %v1561_v39  ;;  %v1566_v52 = vsel %vm1554_vm11, %v1548_v63, %v1565_v43 }
 0x2c9   :  { %v3174_v34 = vsel %vm3991_vm1, 0, %v3990_v51  ;;  %v1557_v61 = vsel %vm1555_vm14, %v1545_v14, 2102212464  ;;  %v1563_v55 = vsel %vm1553_vm0, %v1560_v12, %v1562_v53  ;;  %v1567_v7 = vsel %vm1553_vm0, %v1564_v29, %v1566_v52  ;;  %v7261_v38 = vpop.eup %4399 }
 0x2ca   :  { %v3175_v25 = vsub.s32 32, %v3174_v34  ;;  %v3176_v62 = vshll.u32 %v7208_v32, %v3174_v34  ;;  %v3179_v46 = vsub.s32 4294967266, %v3174_v34  ;;  %vm1635_vm2 = vcmp.gt.s32.totalorder %v1634_v19, 0 }
 0x2cb   :  { %v7265_v48 = vmul.u32.u64.low %v7231_v58, %v1567_v7  ;;  %v7266_v63 = vmul.u32.u64.high %v7231_v58, %v1567_v7, %v7265_v48  ;;  %v7269_v1 = vmul.u32.u64.low %v7231_v58, %v1563_v55  ;;  %v7270_v14 = vmul.u32.u64.high %v7231_v58, %v1563_v55, %v7269_v1 }
 0x2cc   :  { %v3177_v13 = vshrl.u32 %v3159_v45, %v3175_v25  ;;  %v3180_v0 = vadd.s32 127, %v3179_v46  ;;  %v1558_v51 = vsel %vm1554_vm11, %v1542_v18, %v1557_v61  ;;  %v1636_v12 = vsel %vm1635_vm2, %v1634_v19, 0 }
 0x2cd   :  { %v1409_v39 = vxor.u32 2147483648, %v4396_v56  ;;  %v7276_v32 = vand.u32 3, %v7200_v4  ;;  %v3189_v29 = vsub.s32 4, %v7196_v17  ;;  %v1638_v43 = vand.u32 31, %v1636_v12 }
 0x2ce   :  { %vm7281_vm3 = vcmp.le.f32.partialorder %v3103_v2, 0.7853982  ;;  %v3178_v52 = vor.u32 %v3177_v13, %v3176_v62  ;;  %v3181_v45 = vshll.u32 %v3180_v0, 23  ;;  %v1631_v34 = vand.u32 8388607, %v7730_v36 }
 0x2cf   :  { %v7288_v18 = vand.u32 3, %v7194_v41  ;;  %v1559_v4 = vsel %vm1553_vm0, %v1556_v33, %v1558_v51  ;;  %vm1577_vm5 = vc.u32 %v7266_v63, %v7269_v1  ;;  %v1578_v19 = vadd.s32 1, %v7270_v14  ;;  %v4402_v2 = vpop.eup %4401 }
 0x2d0   :  { %v7299_v61 = vsel %vm1411_vm12, %v1412_v27, %v4396_v56  ;;  %v3182_v55 = vor.u32 4788187, %v3181_v45  ;;  %v3185_v7 = vcvt.s32.f32 %v3178_v52  ;;  %v1639_v25 = vsub.s32 32, %v1638_v43  ;;  %v4404_v41 = vpop.eup %4403 }
 0x2d1   :  { %v7304_v8 = vsel %vm1408_vm13, %v7184_v60, %v1409_v39  ;;  %vm3098_vm6 = vcmp.eq.s32.totalorder %v7276_v32, 2  ;;  %v3190_v62 = vsel %vm3105_vm15, %v3189_v29, %v7196_v17  ;;  %vm3095_vm7 = vcmp.eq.s32.totalorder %v7276_v32, 0 }
 0x2d2   :  { %v3183_v27 = vand.u32 2147483647, %v3182_v55  ;;  %v1575_v56 = vmul.u32 %v7231_v58, %v1559_v4  ;;  %v1579_v46 = vsel %vm1577_vm5, %v1578_v19, %v7270_v14  ;;  %v1632_v48 = vor.u32 8388608, %v1631_v34 }
 0x2d3   :  { %v1641_v13 = vshll.u32 %v4457_v40, %v1638_v43  ;;  %v1642_v60 = vshrl.u32 %v7733_v42, %v1639_v25  ;;  %v1644_v0 = vshll.u32 %v7733_v42, %v1638_v43  ;;  %v1645_v51 = vshrl.u32 %v7731_v44, %v1639_v25 }
 0x2d4   :  { %v1513_v39 = vxor.u32 2147483648, %v7261_v38  ;;  %v3186_v52 = vmul.f32 %v3185_v7, %v3183_v27  ;;  %v3192_v17 = vsel %vm7281_vm3, 0, %v3190_v62  ;;  %v1637_v29 = vshrl.u32 %v1636_v12, 5 }
 0x2d5   :  { %vm1407_vm8 = vcmp.lt.s32.totalorder %v7192_v30, 2  ;;  %vm3094_vm9 = vcmp.lt.s32.totalorder %v7276_v32, 2  ;;  %v1647_v58 = vshll.u32 %v7731_v44, %v1638_v43  ;;  %v1648_v14 = vshrl.u32 %v7785_v37, %v1639_v25 }
 0x2d6   :  { %v1650_v45 = vshll.u32 %v7785_v37, %v1638_v43  ;;  %v1651_v34 = vshrl.u32 %v4461_v49, %v1639_v25  ;;  %v3099_v4 = vxor.u32 2147483648, %v4402_v2  ;;  %v3187_v19 = vxor.u32 2147483648, %v3186_v52 }
 0x2d7   :  { %v7327_v55 = vadd.s32 %v1579_v46, %v1575_v56  ;;  %v7329_v7 = vshll.u32 %v1632_v48, 8  ;;  %vm1512_vm4 = vcmp.eq.s32.totalorder %v7288_v18, 0  ;;  %vm1515_vm10 = vcmp.eq.s32.totalorder %v7288_v18, 2 }
 0x2d8   :  { %v1643_v12 = vor.u32 %v1642_v60, %v1641_v13  ;;  %v1646_v62 = vor.u32 %v1645_v51, %v1644_v0  ;;  %v1653_v27 = vshll.u32 %v4461_v49, %v1638_v43  ;;  %v1654_v36 = vshrl.u32 %v4462_v57, %v1639_v25 }
 0x2d9   :  { %vm1404_vm12 = vweird.f32 %v6750_v11  ;;  %v3096_v44 = vxor.u32 2147483648, %v4404_v41  ;;  %v3188_v42 = vsel %vm3105_vm15, %v3187_v19, %v3186_v52  ;;  %v1652_v56 = vor.u32 %v1651_v34, %v1650_v45 }
 0x2da   :  { %vm1656_vm11 = vcmp.lt.s32.totalorder %v1637_v29, 1  ;;  %v3191_v46 = vsel %vm7281_vm3, %v7004_v28, %v3188_v42  ;;  %v1649_v48 = vor.u32 %v1648_v14, %v1647_v58  ;;  %v1655_v33 = vor.u32 %v1654_v36, %v1653_v27  ;;  %v4432_v36 = vld [vmem:[%s7718_s2] ss:$0 sm:$0xff] }
 0x2db   :  { %vm1659_vm14 = vcmp.lt.s32.totalorder %v1637_v29, 4  ;;  %4405 = vcosq.f32 %v3191_v46  ;;  %v1581_v43 = vadd.s32 536870912, %v7327_v55  ;;  %v1640_v13 = vshrl.u32 %v4457_v40, %v1639_v25 }
 0x2dc   :  { %vm1658_vm13 = vcmp.lt.s32.totalorder %v1637_v29, 3  ;;  %4407 = vsinq.f32 %v3191_v46  ;;  %vm1657_vm0 = vcmp.lt.s32.totalorder %v1637_v29, 2  ;;  %v1661_v60 = vsel %vm1659_vm14, %v1649_v48, 2102212464 }
 0x2dd   :  { %v1664_v0 = vsel %vm1656_vm11, %v1643_v12, %v1646_v62  ;;  %v3100_v51 = vsel %vm3098_vm6, %v3099_v4, %v4404_v41  ;;  %v3196_v53 = vadd.s32 3, %v3192_v17  ;;  %v1665_v42 = vsel %vm1659_vm14, %v1652_v56, 920167782 }
 0x2de   :  { %v7352_v52 = vmul.f32 %v4432_v36, %v7099_v3  ;;  %v3097_v25 = vsel %vm3095_vm7, %v4402_v2, %v3096_v44  ;;  %v1666_v58 = vsel %vm1658_vm13, %v1649_v48, %v1665_v42  ;;  %v1668_v14 = vsel %vm1656_vm11, %v1646_v62, %v1649_v48 }
 0x2df   :  { %v1669_v45 = vsel %vm1659_vm14, %v1655_v33, 1326507024  ;;  %v1660_v41 = vsel %vm1656_vm11, %v1640_v13, %v1643_v12  ;;  %v1662_v17 = vsel %vm1658_vm13, %v1646_v62, %v1661_v60  ;;  %v1667_v34 = vsel %vm1657_vm0, %v1664_v0, %v1666_v58 }
 0x2e0   :  { %v1670_v4 = vsel %vm1658_vm13, %v1652_v56, %v1669_v45  ;;  %v7363_v19 = vshrl.u32 %v1581_v43, 30  ;;  %v7367_v44 = vmul.u32.u64.low %v7329_v7, %v1667_v34  ;;  %v7368_v2 = vmul.u32.u64.high %v7329_v7, %v1667_v34, %v7367_v44 }
 0x2e1   :  { %v1671_v3 = vsel %vm1657_vm0, %v1668_v14, %v1670_v4  ;;  %v1414_v33 = vsel %vm1407_vm8, %v7304_v8, %v7299_v61  ;;  %vm3091_vm15 = vweird.f32 %v6906_v9  ;;  %v3101_v12 = vsel %vm3094_vm9, %v3097_v25, %v3100_v51  ;;  %v3443_v14 = vld [vmem:[%s7719_s3 + $0x60] sm:$0xff] }
 0x2e2   :  { %v3197_v62 = vand.u32 3, %v3196_v53  ;;  %v1663_v27 = vsel %vm1657_vm0, %v1660_v41, %v1662_v17  ;;  %v7380_v56 = vmul.u32.u64.low %v7329_v7, %v1671_v3  ;;  %v7381_v46 = vmul.u32.u64.high %v7329_v7, %v1671_v3, %v7380_v56 }
 0x2e3   :  { %vm1511_vm1 = vcmp.lt.s32.totalorder %v7288_v18, 2  ;;  %v1514_v48 = vsel %vm1512_vm4, %v7236_v31, %v1513_v39  ;;  %v7796_v30 = vxor.u32 2147483648, %v7236_v31  ;;  %v3210_v32 = vand.u32 2139095040, %v7352_v52 }
 0x2e4   :  { %v1415_v61 = vsel %vm1404_vm12, nan, %v1414_v33  ;;  %v3102_v8 = vsel %vm3091_vm15, nan, %v3101_v12  ;;  %v1583_v29 = vshll.u32 %v7363_v19, 30  ;;  %v1682_v43 = vadd.s32 1, %v7368_v2 }
 0x2e5   :  { %v1517_v9 = vsel %vm1515_vm10, %v7796_v30, %v7261_v38  ;;  %v4406_v13 = vpop.eup %4405  ;;  %vm1508_vm2 = vweird.f32 %v6796_v15  ;;  %vm3202_vm3 = vcmp.eq.s32.totalorder %v3197_v62, 2  ;;  %v1679_v39 = vmul.u32 %v7329_v7, %v1663_v27 }
 0x2e6   :  { %v3211_v31 = vshrl.u32 %v3210_v32, 23  ;;  %v4408_v60 = vpop.eup %4407  ;;  %v1518_v18 = vsel %vm1511_vm1, %v1514_v48, %v1517_v9  ;;  %vm3199_vm5 = vcmp.eq.s32.totalorder %v3197_v62, 0  ;;  %v3203_v38 = vxor.u32 2147483648, %v4406_v13 }
 0x2e7   :  { %vm1681_vm6 = vc.u32 %v7381_v46, %v7367_v44  ;;  %vm3195_vm7 = vweird.f32 %v7004_v28  ;;  %vm3198_vm8 = vcmp.lt.s32.totalorder %v3197_v62, 2  ;;  %v3200_v11 = vxor.u32 2147483648, %v4408_v60 }
 0x2e8   :  { %v3427_v0 = vsub.f32 %v1415_v61, %v3102_v8  ;;  %v3204_v51 = vsel %vm3202_vm3, %v3203_v38, %v4408_v60  ;;  %v7403_v53 = vsub.s32 %v7327_v55, %v1583_v29  ;;  %v1683_v42 = vsel %vm1681_vm6, %v1682_v43, %v7368_v2  ;;  %v3444_v55 = vld [vmem:[%s7719_s3 + $0x68] sm:$0xff] }
 0x2e9   :  { %v3992_v7 = vadd.s32 4294967169, %v3211_v31  ;;  %v1519_v25 = vsel %vm1508_vm2, nan, %v1518_v18  ;;  %v3201_v58 = vsel %vm3199_vm5, %v4406_v13, %v3200_v11  ;;  %v1684_v45 = vadd.s32 %v1683_v42, %v1679_v39 }
 0x2ea   :  { %v3205_v28 = vsel %vm3198_vm8, %v3201_v58, %v3204_v51  ;;  %v7415_v4 = vmul.f32 %v4432_v36, %v7155_v5  ;;  %v7417_v15 = vmul.f32 %v3443_v14, %v3427_v0  ;;  %v1586_v2 = vsub.s32 0, %v7403_v53 }
 0x2eb   :  { %v3217_v41 = vadd.s32 1, %v3992_v7  ;;  %v3206_v17 = vsel %vm3195_vm7, nan, %v3205_v28  ;;  %v1685_v34 = vadd.s32 536870912, %v1684_v45  ;;  %v3207_v12 = vand.u32 2147483647, %v7352_v52 }
 0x2ec   :  { %v3428_v3 = vsub.f32 %v1519_v25, %v3206_v17  ;;  %v3314_v48 = vand.u32 2139095040, %v7415_v4  ;;  %v3928_v36 = vmin.u32 %v1586_v2, %v7403_v53  ;;  %v7797_v8 = vmov 2475754826  }
 0x2ed   :  { %vm3218_vm9 = vcmp.gt.s32.totalorder %v3217_v41, 0  ;;  %v7420_v33 = vshrl.u32 %v1685_v34, 30  ;;  %v3214_v32 = vand.u32 8388607, %v3207_v12  ;;  %v7798_v13 = vmov 2131351028  }
 0x2ee   :  { %v3219_v62 = vsel %vm3218_vm9, %v3217_v41, 0  ;;  %v7423_v27 = vmul.f32 %v3444_v55, %v3428_v3  ;;  %v3315_v18 = vshrl.u32 %v3314_v48, 23  ;;  %v1588_v38 = vclz %v3928_v36 }
 0x2ef   :  { %v3221_v56 = vand.u32 31, %v3219_v62  ;;  %v1687_v9 = vshll.u32 %v7420_v33, 30  ;;  %v3220_v11 = vshrl.u32 %v3219_v62, 5  ;;  %v3215_v7 = vor.u32 8388608, %v3214_v32 }
 0x2f0   :  { %v3469_v5 = vpack.c.bf16 %v7423_v27, %v7417_v15  ;;  %v3996_v55 = vadd.s32 4294967169, %v3315_v18  ;;  %v3929_v34 = vadd.s32 4294967294, %v1588_v38  ;;  %vm1522_vm8 = vcmp.lt.s32.totalorder %v7112_v47, 0 }
 0x2f1   :  { %v3222_v30 = vsub.s32 32, %v3221_v56  ;;  %v3224_v61 = vshll.u32 %v4457_v40, %v3221_v56  ;;  %v3227_v43 = vshll.u32 %v7797_v8, %v3221_v56  ;;  %v3230_v31 = vshll.u32 %v7798_v13, %v3221_v56 }
 0x2f2   :  { %4063 = vmatprep.mubr.bf16.mxu0 %v3469_v5  ;;  %v3233_v0 = vshll.u32 %v7785_v37, %v3221_v56  ;;  %v7440_v42 = vsub.s32 %v1684_v45, %v1687_v9  ;;  %v3236_v28 = vshll.u32 %v4461_v49, %v3221_v56  ;;  %vm3239_vm4 = vcmp.lt.s32.totalorder %v3220_v11, 1 }
 0x2f3   :  { %v3225_v29 = vshrl.u32 %v7797_v8, %v3222_v30  ;;  %v3228_v39 = vshrl.u32 %v7798_v13, %v3222_v30  ;;  %v3231_v60 = vshrl.u32 %v7785_v37, %v3222_v30  ;;  %v3234_v51 = vshrl.u32 %v4461_v49, %v3222_v30 }
 0x2f4   :  { %v3237_v41 = vshrl.u32 %v4462_v57, %v3222_v30  ;;  %v3223_v3 = vshrl.u32 %v4457_v40, %v3222_v30  ;;  %v1690_v62 = vsub.s32 0, %v7440_v42  ;;  %vm3240_vm10 = vcmp.lt.s32.totalorder %v3220_v11, 2 }
 0x2f5   :  { %v3226_v25 = vor.u32 %v3225_v29, %v3224_v61  ;;  %v3229_v58 = vor.u32 %v3228_v39, %v3227_v43  ;;  %v3235_v14 = vor.u32 %v3234_v51, %v3233_v0  ;;  %v3232_v17 = vor.u32 %v3231_v60, %v3230_v31 }
 0x2f6   :  { %v3238_v2 = vor.u32 %v3237_v41, %v3236_v28  ;;  %vm3241_vm12 = vcmp.lt.s32.totalorder %v3220_v11, 3  ;;  %vm3242_vm11 = vcmp.lt.s32.totalorder %v3220_v11, 4  ;;  %v3255_v36 = vshll.u32 %v3215_v7, 8 }
 0x2f7   :  { %v3244_v45 = vsel %vm3242_vm11, %v3232_v17, 2102212464  ;;  %v3247_v48 = vsel %vm3239_vm4, %v3226_v25, %v3229_v58  ;;  %v3248_v5 = vsel %vm3242_vm11, %v3235_v14, 920167782  ;;  %v3251_v56 = vsel %vm3239_vm4, %v3229_v58, %v3232_v17 }
 0x2f8   :  { %v3249_v9 = vsel %vm3241_vm12, %v3232_v17, %v3248_v5  ;;  %v3321_v32 = vadd.s32 1, %v3996_v55  ;;  %v3243_v61 = vsel %vm3239_vm4, %v3223_v3, %v3226_v25  ;;  %v3245_v29 = vsel %vm3241_vm12, %v3229_v58, %v3244_v45 }
 0x2f9   :  { %v3250_v43 = vsel %vm3240_vm10, %v3247_v48, %v3249_v9  ;;  %v3252_v39 = vsel %vm3242_vm11, %v3238_v2, 1326507024  ;;  %vm3930_vm14 = vcmp.lt.s32.totalorder %v3929_v34, 0  ;;  %v3932_v30 = vmin.u32 %v1690_v62, %v7440_v42 }
 0x2fa   :  { %v3253_v31 = vsel %vm3241_vm12, %v3235_v14, %v3252_v39  ;;  %v7449_v18 = vmul.u32.u64.low %v3255_v36, %v3250_v43  ;;  %v7450_v38 = vmul.u32.u64.high %v3255_v36, %v3250_v43, %v7449_v18  ;;  %v3246_v0 = vsel %vm3240_vm10, %v3243_v61, %v3245_v29 }
 0x2fb   :  { %v3254_v60 = vsel %vm3240_vm10, %v3251_v56, %v3253_v31  ;;  %v1591_v25 = vsel %vm3930_vm14, 0, %v3929_v34  ;;  %vm3322_vm13 = vcmp.gt.s32.totalorder %v3321_v32, 0  ;;  %v1692_v58 = vclz %v3932_v30 }
 0x2fc   :  { %v7454_v51 = vmul.u32.u64.low %v3255_v36, %v3254_v60  ;;  %v7455_v7 = vmul.u32.u64.high %v3255_v36, %v3254_v60, %v7454_v51  ;;  %v3323_v28 = vsel %vm3322_vm13, %v3321_v32, 0  ;;  %v3262_v41 = vmul.u32 %v3255_v36, %v3246_v0 }
 0x2fd   :  { %v3265_v17 = vadd.s32 1, %v7450_v38  ;;  %v3325_v55 = vand.u32 31, %v3323_v28  ;;  %v1596_v14 = vsub.s32 4294967266, %v1591_v25  ;;  %v3311_v3 = vand.u32 2147483647, %v7415_v4 }
 0x2fe   :  { %vm3264_vm0 = vc.u32 %v7455_v7, %v7449_v18  ;;  %v1576_v11 = vadd.s32 %v7269_v1, %v7266_v63  ;;  %v1592_v62 = vsub.s32 32, %v1591_v25  ;;  %v3933_v45 = vadd.s32 4294967294, %v1692_v58 }
 0x2ff   :  { %v3326_v2 = vsub.s32 32, %v3325_v55  ;;  %v3266_v34 = vsel %vm3264_vm0, %v3265_v17, %v7450_v38  ;;  %v3328_v5 = vshll.u32 %v4457_v40, %v3325_v55  ;;  %v3331_v9 = vshll.u32 %v7797_v8, %v3325_v55 }
 0x300   :  { %v3267_v48 = vadd.s32 %v3266_v34, %v3262_v41  ;;  %v1597_v56 = vadd.s32 127, %v1596_v14  ;;  %v3318_v32 = vand.u32 8388607, %v3311_v3  ;;  %v3324_v61 = vshrl.u32 %v3323_v28, 5 }
 0x301   :  { %v3329_v36 = vshrl.u32 %v7797_v8, %v3326_v2  ;;  %v3332_v29 = vshrl.u32 %v7798_v13, %v3326_v2  ;;  %v3334_v63 = vshll.u32 %v7798_v13, %v3325_v55  ;;  %v3335_v1 = vshrl.u32 %v7785_v37, %v3326_v2 }
 0x302   :  { %v3268_v43 = vadd.s32 536870912, %v3267_v48  ;;  %v3337_v39 = vshll.u32 %v7785_v37, %v3325_v55  ;;  %v1593_v30 = vshll.u32 %v7403_v53, %v1591_v25  ;;  %vm3934_vm15 = vcmp.lt.s32.totalorder %v3933_v45, 0 }
 0x303   :  { %v3338_v31 = vshrl.u32 %v4461_v49, %v3326_v2  ;;  %v3340_v8 = vshll.u32 %v4461_v49, %v3325_v55  ;;  %v3330_v38 = vor.u32 %v3329_v36, %v3328_v5  ;;  %v3333_v0 = vor.u32 %v3332_v29, %v3331_v9 }
 0x304   :  { %v7476_v60 = vshrl.u32 %v3268_v43, 30  ;;  %v3341_v51 = vshrl.u32 %v4462_v57, %v3326_v2  ;;  %v1594_v58 = vshrl.u32 %v1576_v11, %v1592_v62  ;;  %v3319_v28 = vor.u32 8388608, %v3318_v32 }
 0x305   :  { %v3339_v13 = vor.u32 %v3338_v31, %v3337_v39  ;;  %vm3343_vm1 = vcmp.lt.s32.totalorder %v3324_v61, 1  ;;  %v1598_v41 = vshll.u32 %v1597_v56, 23  ;;  %v7479_v17 = vsel %vm3934_vm15, 0, %v3933_v45 }
 0x306   :  { %v3270_v37 = vshll.u32 %v7476_v60, 30  ;;  %v3336_v53 = vor.u32 %v3335_v1, %v3334_v63  ;;  %v3342_v25 = vor.u32 %v3341_v51, %v3340_v8  ;;  %vm3345_vm2 = vcmp.lt.s32.totalorder %v3324_v61, 3  ;;  %v7505_v51 = vpop.f32.mrb[0].mxu0 }
 0x307   :  { %vm3346_vm3 = vcmp.lt.s32.totalorder %v3324_v61, 4  ;;  %v3480_v49 = vlaneseq  ;;  %v3327_v14 = vshrl.u32 %v4457_v40, %v3326_v2  ;;  %vm3344_vm5 = vcmp.lt.s32.totalorder %v3324_v61, 2 }
 0x308   :  { %v7482_v55 = vsub.s32 %v3267_v48, %v3270_v37  ;;  %v3351_v57 = vsel %vm3343_vm1, %v3330_v38, %v3333_v0  ;;  %v1595_v11 = vor.u32 %v1594_v58, %v1593_v30  ;;  %v3348_v62 = vsel %vm3346_vm3, %v3336_v53, 2102212464 }
 0x309   :  { %v3352_v45 = vsel %vm3346_vm3, %v3339_v13, 920167782  ;;  %v3359_v34 = vshll.u32 %v3319_v28, 8  ;;  %v1599_v5 = vor.u32 4788187, %v1598_v41  ;;  %v3355_v56 = vsel %vm3343_vm1, %v3333_v0, %v3336_v53 }
 0x30a   :  { %v3273_v36 = vsub.s32 0, %v7482_v55  ;;  %v3353_v9 = vsel %vm3345_vm2, %v3336_v53, %v3352_v45  ;;  %v1700_v48 = vsub.s32 4294967266, %v7479_v17  ;;  %v3356_v2 = vsel %vm3346_vm3, %v3342_v25, 1326507024  ;;  %v3722_v45 = vpop.f32.mrb[1].mxu0 }
 0x30b   :  { %v3354_v40 = vsel %vm3344_vm5, %v3351_v57, %v3353_v9  ;;  %v3481_v32 = vshrl.u32 %v3480_v49, 7  ;;  %v3347_v43 = vsel %vm3343_vm1, %v3327_v14, %v3330_v38  ;;  %v3349_v63 = vsel %vm3345_vm2, %v3333_v0, %v3348_v62  ;;  %v3472_v38 = vld [vmem:[%s7720_s4] sm:$0x5]  ;;  %v4054_v9 = vpop.f32.mrb[2].mxu0 }
 0x30c   :  { %v3993_v29 = vmin.u32 %v3273_v36, %v7482_v55  ;;  %v3357_v1 = vsel %vm3345_vm2, %v3339_v13, %v3356_v2  ;;  %v7499_v30 = vmul.u32.u64.low %v3359_v34, %v3354_v40  ;;  %v7500_v31 = vmul.u32.u64.high %v3359_v34, %v3354_v40, %v7499_v30  ;;  %v3725_v2 = vpop.f32.mrb[3].mxu0 }
 0x30d   :  { %v3358_v39 = vsel %vm3344_vm5, %v3355_v56, %v3357_v1  ;;  %v7503_v8 = vsub.s32 0, %v3481_v32  ;;  %v1680_v58 = vadd.s32 %v7367_v44, %v7381_v46  ;;  %v3350_v0 = vsel %vm3344_vm5, %v3347_v43, %v3349_v63  ;;  %v3476_v44 = vld [vmem:[%s7720_s4 + $0x1] sm:$0x5] }
 0x30e   :  { %v3275_v28 = vclz %v3993_v29  ;;  %v7513_v13 = vmul.u32.u64.low %v3359_v34, %v3358_v39  ;;  %v7514_v41 = vmul.u32.u64.high %v3359_v34, %v3358_v39, %v7513_v13  ;;  %v7516_v37 = vsub.s32 2, %v3481_v32  ;;  %v3478_v39 = vld [vmem:[%s7720_s4 + $0x3] sm:$0x5] }
 0x30f   :  { %v1600_v53 = vand.u32 2147483647, %v1599_v5  ;;  %v1602_v25 = vcvt.s32.f32 %v1595_v11  ;;  %v1696_v49 = vsub.s32 32, %v7479_v17  ;;  %v1701_v46 = vadd.s32 127, %v1700_v48 }
 0x310   :  { %v3994_v14 = vadd.s32 4294967294, %v3275_v28  ;;  %v3369_v57 = vadd.s32 1, %v7500_v31  ;;  %v3483_v61 = vrot.slane %v3472_v38, %v7503_v8  ;;  %v3487_v62 = vrot.slane %v3472_v38, %v7516_v37  ;;  %v3474_v28 = vld [vmem:[%s7720_s4 + $0x2] sm:$0x5] }
 0x311   :  { %v1697_v36 = vshll.u32 %v7440_v42, %v7479_v17  ;;  %v3263_v11 = vadd.s32 %v7449_v18, %v7455_v7  ;;  %v3366_v5 = vmul.u32 %v3359_v34, %v3350_v0  ;;  %vm3368_vm7 = vc.u32 %v7514_v41, %v7499_v30 }
 0x312   :  { %vm3995_vm6 = vcmp.lt.s32.totalorder %v3994_v14, 0  ;;  %v3546_v48 = vrot.slane %v3476_v44, %v7503_v8  ;;  %v3550_v40 = vrot.slane %v3476_v44, %v7516_v37  ;;  %v1698_v32 = vshrl.u32 %v1680_v58, %v1696_v49  ;;  %v4057_v58 = vpop.f32.mrb[4].mxu0 }
 0x313   :  { %v3278_v56 = vsel %vm3995_vm6, 0, %v3994_v14  ;;  %v1702_v17 = vshll.u32 %v1701_v46, 23  ;;  %v3370_v18 = vsel %vm3368_vm7, %v3369_v57, %v7500_v31  ;;  %v4239_v7 = vpack.i.bf16 %v3487_v62, %v3483_v61  ;;  %v3738_v62 = vpop.f32.mrb[5].mxu0 }
 0x314   :  { %v3279_v29 = vsub.s32 32, %v3278_v56  ;;  %v3280_v43 = vshll.u32 %v7482_v55, %v3278_v56  ;;  %v3283_v42 = vsub.s32 4294967266, %v3278_v56  ;;  %v3371_v1 = vadd.s32 %v3370_v18, %v3366_v5 }
 0x315   :  { %v1603_v38 = vmul.f32 %v1602_v25, %v1600_v53  ;;  %4240 = vrot.lane.b32.xlu1 %v4239_v7, %s4463_s22  ;;  %4230 = vrot.lane.b32.xlu0 %v4239_v7, %s4464_s23  ;;  %v4244_v55 = vpack.i.bf16 %v3550_v40, %v3546_v48  ;;  %v1699_v49 = vor.u32 %v1698_v32, %v1697_v36  ;;  %v1703_v14 = vor.u32 4788187, %v1702_v17  ;;  %v4058_v36 = vpop.f32.mrb[6].mxu0 }
 0x316   :  { %v3281_v34 = vshrl.u32 %v3263_v11, %v3279_v29  ;;  %v3284_v63 = vadd.s32 127, %v3283_v42  ;;  %v3372_v13 = vadd.s32 536870912, %v3371_v1  ;;  %v3579_v44 = vrot.slane %v3478_v39, %v7503_v8  ;;  %v3741_v32 = vpop.f32.mrb[7].mxu0 }
 0x317   :  { %v3519_v46 = vrot.slane %v3474_v28, %v7503_v8  ;;  %v3583_v61 = vrot.slane %v3478_v39, %v7516_v37  ;;  %v1604_v11 = vxor.u32 2147483648, %v1603_v38  ;;  %v3523_v5 = vrot.slane %v3474_v28, %v7516_v37 }
 0x318   :  { %v3282_v31 = vor.u32 %v3281_v34, %v3280_v43  ;;  %v3285_v0 = vshll.u32 %v3284_v63, 23  ;;  %v7546_v25 = vshrl.u32 %v3372_v13, 30  ;;  %v3787_v8 = vadd.f32 %v7505_v51, %v5432_v10 }
 0x319   :  { %4245 = vrot.lane.b32.xlu1 %v4244_v55, %s4463_s22  ;;  %4235 = vrot.lane.b32.xlu0 %v4244_v55, %s4464_s23  ;;  %v3788_v40 = vadd.f32 %v4054_v9, %v5447_v21  ;;  %v1706_v29 = vcvt.s32.f32 %v1699_v49  ;;  %v3785_v43 = vadd.f32 %v3722_v45, %v5069_v23  ;;  %v3786_v42 = vadd.f32 %v3725_v2, %v5074_v54 }
 0x31a   :  { %v3286_v57 = vor.u32 4788187, %v3285_v0  ;;  %v3289_v53 = vcvt.s32.f32 %v3282_v31  ;;  %v3374_v48 = vshll.u32 %v7546_v25, 30  ;;  %v1704_v17 = vand.u32 2147483647, %v1703_v14 }
 0x31b   :  { %v3802_v37 = vpack.c.bf16 %v3788_v40, %v3787_v8  ;;  %v4465_v63 = vmov 0.0   ;;  %v4264_v10 = vpack.i.bf16 %v3583_v61, %v3579_v44  ;;  %v4259_v21 = vpack.i.bf16 %v3523_v5, %v3519_v46 }
 0x31c   :  { %v3287_v56 = vand.u32 2147483647, %v3286_v57  ;;  %v7558_v34 = vsub.s32 %v3371_v1, %v3374_v48  ;;  %4067 = vmatprep.subr.bf16.mxu1 %v4465_v63  ;;  %v3801_v51 = vpack.c.bf16 %v3786_v42, %v3785_v43  ;;  %v7799_v23 = vand.u32 2147483647, %v7112_v47 }
 0x31d   :  { %4255 = vrot.lane.b32.xlu1 %v4244_v55, %s4466_s24  ;;  %4250 = vrot.lane.b32.xlu0 %v4239_v7, %s4466_s24  ;;  %v1605_v45 = vsel %vm1522_vm8, %v1604_v11, %v1603_v38  ;;  %v3791_v2 = vadd.f32 %v4057_v58, %v6237_v50  ;;  %v3789_v1 = vadd.f32 %v3738_v62, %v5841_v6  ;;  %vm3209_vm4 = vcmp.lt.s32.totalorder %v7352_v52, 0 }
 0x31e   :  { %v3290_v18 = vmul.f32 %v3289_v53, %v3287_v56  ;;  %vm7565_vm9 = vcmp.le.f32.partialorder %v7799_v23, 0.7853982  ;;  %v3377_v9 = vsub.s32 0, %v7558_v34  ;;  %4068 = vmatpush3.bf16.msra.mxu1 %v3801_v51  ;;  %v3792_v7 = vadd.f32 %v4058_v36, %v6247_v35 }
 0x31f   :  { %v3790_v39 = vadd.f32 %v3741_v32, %v5845_v16  ;;  %v1707_v28 = vmul.f32 %v1706_v29, %v1704_v17  ;;  %4069 = vmatprep.subr.bf16.mxu1 %v4465_v63  ;;  %v1606_v6 = vsub.s32 4, %v7363_v19  ;;  %vm7584_vm10 = vcmp.le.f32.partialorder %v3207_v12, 0.7853982 }
 0x320   :  { %v3291_v55 = vxor.u32 2147483648, %v3290_v18  ;;  %v3997_v31 = vmin.u32 %v3377_v9, %v7558_v34  ;;  %v3804_v50 = vpack.c.bf16 %v3792_v7, %v3791_v2  ;;  %v1608_v35 = vsel %vm7565_vm9, %v7112_v47, %v1605_v45 }
 0x321   :  { %4265 = vrot.lane.b32.xlu1 %v4264_v10, %s4464_s23  ;;  %4260 = vrot.lane.b32.xlu0 %v4259_v21, %s4464_s23  ;;  %v3803_v58 = vpack.c.bf16 %v3790_v39, %v3789_v1  ;;  %v1708_v0 = vxor.u32 2147483648, %v1707_v28  ;;  %vm1626_vm12 = vcmp.lt.s32.totalorder %v7170_v59, 0  ;;  %v1607_v12 = vsel %vm1522_vm8, %v1606_v6, %v7363_v19 }
 0x322   :  { %v3379_v38 = vclz %v3997_v31  ;;  %4070 = vmatpush3.bf16.msra.mxu1 %v3802_v37  ;;  %v3292_v13 = vsel %vm3209_vm4, %v3291_v55, %v3290_v18  ;;  %v7804_v14 = vand.u32 2147483647, %v7170_v59  ;;  %v3367_v46 = vadd.s32 %v7499_v30, %v7514_v41 }
 0x323   :  { %4071 = vmatprep.subr.bf16.mxu1 %v4465_v63  ;;  %4409 = vcosq.f32 %v1608_v35  ;;  %v3293_v57 = vsub.s32 4, %v7476_v60  ;;  %v3295_v53 = vsel %vm7584_vm10, %v7352_v52, %v3292_v13  ;;  %v1709_v19 = vsel %vm1626_vm12, %v1708_v0, %v1707_v28 }
 0x324   :  { %v3998_v49 = vadd.s32 4294967294, %v3379_v38  ;;  %vm7602_vm11 = vcmp.le.f32.partialorder %v7804_v14, 0.7853982  ;;  %4411 = vsinq.f32 %v1608_v35  ;;  %v1609_v30 = vsel %vm7565_vm9, 0, %v1607_v12 }
 0x325   :  { %4275 = vrot.lane.b32.xlu1 %v4264_v10, %s4463_s22  ;;  %4270 = vrot.lane.b32.xlu0 %v4259_v21, %s4463_s22  ;;  %4413 = vcosq.f32 %v3295_v53  ;;  %v1710_v56 = vsub.s32 4, %v7420_v33  ;;  %v1712_v48 = vsel %vm7602_vm11, %v7170_v59, %v1709_v19  ;;  %v3294_v8 = vsel %vm3209_vm4, %v3293_v57, %v7476_v60 }
 0x326   :  { %vm3999_vm14 = vcmp.lt.s32.totalorder %v3998_v49, 0  ;;  %4072 = vmatpush3.bf16.msra.mxu1 %v3803_v58  ;;  %4415 = vsinq.f32 %v3295_v53  ;;  %v1613_v29 = vadd.s32 3, %v1609_v30  ;;  %v3296_v43 = vsel %vm7584_vm10, 0, %v3294_v8 }
 0x327   :  { %v3382_v61 = vsel %vm3999_vm14, 0, %v3998_v49  ;;  %4073 = vmatprep.subr.bf16.mxu1 %v4465_v63  ;;  %4417 = vcosq.f32 %v1712_v48  ;;  %v1711_v18 = vsel %vm1626_vm12, %v1710_v56, %v7420_v33  ;;  %v3397_v60 = vsub.s32 4, %v7546_v25 }
 0x328   :  { %v3383_v62 = vsub.s32 32, %v3382_v61  ;;  %v3384_v11 = vshll.u32 %v7558_v34, %v3382_v61  ;;  %v3387_v5 = vsub.s32 4294967266, %v3382_v61  ;;  %4419 = vsinq.f32 %v1712_v48 }
 0x329   :  { %4285 = vrot.lane.b32.xlu1 %v4264_v10, %s4466_s24  ;;  %4280 = vrot.lane.b32.xlu0 %v4259_v21, %s4466_s24  ;;  %v3300_v10 = vadd.s32 3, %v3296_v43  ;;  %v1614_v21 = vand.u32 3, %v1613_v29  ;;  %v1713_v51 = vsel %vm7602_vm11, 0, %v1711_v18  ;;  %vm3313_vm13 = vcmp.lt.s32.totalorder %v7415_v4, 0 }
 0x32a   :  { %v3385_v41 = vshrl.u32 %v3367_v46, %v3383_v62  ;;  %v3388_v36 = vadd.s32 127, %v3387_v5  ;;  %4074 = vmatpush3.bf16.msra.mxu1 %v3804_v50  ;;  %vm7639_vm0 = vcmp.le.f32.partialorder %v3311_v3, 0.7853982  ;;  %v3398_v2 = vsel %vm3313_vm13, %v3397_v60, %v7546_v25 }
 0x32b   :  { %4075 = vmatprep.subr.bf16.mxu1 %v4465_v63  ;;  %v1717_v7 = vadd.s32 3, %v1713_v51  ;;  %v3301_v39 = vand.u32 3, %v3300_v10  ;;  %vm1616_vm15 = vcmp.eq.s32.totalorder %v1614_v21, 0  ;;  %v3400_v3 = vsel %vm7639_vm0, 0, %v3398_v2 }
 0x32c   :  { %v3386_v40 = vor.u32 %v3385_v41, %v3384_v11  ;;  %v3389_v32 = vshll.u32 %v3388_v36, 23  ;;  %vm1619_vm1 = vcmp.eq.s32.totalorder %v1614_v21, 2  ;;  %v3404_v35 = vadd.s32 3, %v3400_v3  ;;  %v3475_v3 = vld [vmem:[%s7720_s4 + $0x1] sm:$0x1] }
 0x32d   :  { %v4410_v37 = vpop.eup %4409  ;;  %v1718_v16 = vand.u32 3, %v1717_v7  ;;  %vm3303_vm2 = vcmp.eq.s32.totalorder %v3301_v39, 0  ;;  %vm3306_vm3 = vcmp.eq.s32.totalorder %v3301_v39, 2  ;;  %vm1615_vm5 = vcmp.lt.s32.totalorder %v1614_v21, 2 }
 0x32e   :  { %v3390_v42 = vor.u32 4788187, %v3389_v32  ;;  %v3393_v17 = vcvt.s32.f32 %v3386_v40  ;;  %v4412_v54 = vpop.eup %4411  ;;  %v1620_v31 = vxor.u32 2147483648, %v4410_v37  ;;  %vm3302_vm6 = vcmp.lt.s32.totalorder %v3301_v39, 2  ;;  %v3445_v40 = vld [vmem:[%s7719_s3 + $0x70] sm:$0xff] }
 0x32f   :  { %v4414_v45 = vpop.eup %4413  ;;  %v1617_v55 = vxor.u32 2147483648, %v4412_v54  ;;  %vm1720_vm7 = vcmp.eq.s32.totalorder %v1718_v16, 0  ;;  %vm1723_vm8 = vcmp.eq.s32.totalorder %v1718_v16, 2  ;;  %v3405_v46 = vand.u32 3, %v3404_v35 }
 0x330   :  { %v3391_v34 = vand.u32 2147483647, %v3390_v42  ;;  %v4416_v1 = vpop.eup %4415  ;;  %v3307_v38 = vxor.u32 2147483648, %v4414_v45  ;;  %v1621_v13 = vsel %vm1619_vm1, %v1620_v31, %v4412_v54  ;;  %vm1612_vm9 = vweird.f32 %v7112_v47 }
 0x331   :  { %v4418_v58 = vpop.eup %4417  ;;  %v3304_v6 = vxor.u32 2147483648, %v4416_v1  ;;  %v1618_v0 = vsel %vm1616_vm15, %v4410_v37, %v1617_v55  ;;  %vm3299_vm4 = vweird.f32 %v7352_v52  ;;  %vm1719_vm10 = vcmp.lt.s32.totalorder %v1718_v16, 2 }
 0x332   :  { %v3394_v23 = vmul.f32 %v3393_v17, %v3391_v34  ;;  %v4420_v25 = vpop.eup %4419  ;;  %v1724_v12 = vxor.u32 2147483648, %v4418_v58  ;;  %v3308_v44 = vsel %vm3306_vm3, %v3307_v38, %v4416_v1  ;;  %v1622_v57 = vsel %vm1615_vm5, %v1618_v0, %v1621_v13 }
 0x333   :  { %v1721_v49 = vxor.u32 2147483648, %v4420_v25  ;;  %v3305_v14 = vsel %vm3303_vm2, %v4414_v45, %v3304_v6  ;;  %v1623_v11 = vsel %vm1612_vm9, nan, %v1622_v57  ;;  %vm3410_vm12 = vcmp.eq.s32.totalorder %v3405_v46, 2  ;;  %v3471_v6 = vld [vmem:[%s7720_s4] sm:$0x1] }
 0x334   :  { %v3395_v33 = vxor.u32 2147483648, %v3394_v23  ;;  %v3309_v53 = vsel %vm3302_vm6, %v3305_v14, %v3308_v44  ;;  %v1725_v19 = vsel %vm1723_vm8, %v1724_v12, %v4420_v25  ;;  %vm1716_vm11 = vweird.f32 %v7170_v59  ;;  %v3446_v59 = vld [vmem:[%s7719_s3 + $0x78] sm:$0xff] }
 0x335   :  { %v1722_v61 = vsel %vm1720_vm7, %v4418_v58, %v1721_v49  ;;  %v3310_v5 = vsel %vm3299_vm4, nan, %v3309_v53  ;;  %vm3407_vm14 = vcmp.eq.s32.totalorder %v3405_v46, 0  ;;  %vm4467_vm15 = vmmov 0  }
 0x336   :  { %v3396_v28 = vsel %vm3313_vm13, %v3395_v33, %v3394_v23  ;;  %v1726_v41 = vsel %vm1719_vm10, %v1722_v61, %v1725_v19  ;;  %vm3406_vm13 = vcmp.lt.s32.totalorder %v3405_v46, 2  ;;  %v3429_v52 = vsub.f32 %v1623_v11, %v3310_v5  ;;  %4083 = vmatprep.mubr.msk.bf16.mxu1 %vm4467_vm15, %v4465_v63 }
 0x337   :  { %v3399_v50 = vsel %vm7639_vm0, %v7415_v4, %v3396_v28  ;;  %vm3403_vm0 = vweird.f32 %v7415_v4  ;;  %v1727_v48 = vsel %vm1716_vm11, nan, %v1726_v41  ;;  %vm3492_vm1 = vcmask 785408  }
 0x338   :  { %4421 = vcosq.f32 %v3399_v50  ;;  %v7660_v42 = vmul.f32 %v3445_v40, %v3429_v52  ;;  %vm3499_vm2 = vcmask 523264   ;;  %vm3602_vm3 = vcmask 1040384  }
 0x339   :  { %4423 = vsinq.f32 %v3399_v50  ;;  %vm3506_vm5 = vcmask 261120   ;;  %vm3604_vm6 = vcmask 1041408   ;;  %vm3606_vm7 = vcmask 1042432  }
 0x33a   :  { %vm3608_vm8 = vcmask 1043456   ;;  %vm3610_vm9 = vcmask 1044480   ;;  %vm3612_vm4 = vcmask 1045504   ;;  %vm3614_vm10 = vcmask 1046528  }
 0x342   :  { %v4422_v62 = vpop.eup %4421 }
 0x343   :  { %v4424_v30 = vpop.eup %4423  ;;  %v3411_v36 = vxor.u32 2147483648, %v4422_v62 }
 0x344   :  { %v3408_v56 = vxor.u32 2147483648, %v4424_v30 }
 0x345   :  { %v3412_v47 = vsel %vm3410_vm12, %v3411_v36, %v4424_v30  ;;  %v4001_v36 = vld [vmem:[%s7720_s4 + $0x3] ss:$0 sm:$0xff] }
 0x346   :  { %v3409_v8 = vsel %vm3407_vm14, %v4422_v62, %v3408_v56 }
 0x347   :  { %v3413_v32 = vsel %vm3406_vm13, %v3409_v8, %v3412_v47 }
 0x348   :  { %v3414_v29 = vsel %vm3403_vm0, nan, %v3413_v32 }
 0x349   :  { %v3430_v43 = vsub.f32 %v1727_v48, %v3414_v29  ;;  %v4000_v48 = vld [vmem:[%s7720_s4 + $0x2] ss:$0 sm:$0xff]  ;;  %s4468_s4 = smov [#allocation2]  }
 0x34a   :  { %s3859_s0 = sshll.u32 %s4468_s4, 4  ;;  %s3860_s0 = int_to_ptr.vmem [resolvable:$true] %s3859_s0 }
 0x34b   :  { %v7662_v17 = vmul.f32 %v3446_v59, %v3430_v43  ;;  %s4433_s11 = scalar_lea.vmem %s3860_s0, 256  ;;  %p4438_p1 = scmp.lt.s32.totalorder %s3860_s0, %s3860_s0 }
 0x34c   :  { %p4434_p0 = scmp.ne.s32.totalorder %s3860_s0, %s4433_s11  ;;  %p4439_p2 = scmp.lt.s32.totalorder %s4433_s11, %s4433_s11 }
 0x34d   :  { %v3470_v4 = vpack.c.bf16 %v7662_v17, %v7660_v42 }
 0x34e   :  { %p4440_p3 = por %p4439_p2, %p4438_p1 }
 0x34f   :  { %4064 = vmatmul.mubr.bf16.gmra.mrb[12].mxu0 %v3470_v4 }
 0x350   :  { %p4441_p4 = pnand %p4440_p3, %p4434_p0 }
 0x362   :  { %v4061_v18 = vpop.f32.mrb[8].mxu0 }
 0x363   :  { %v3754_v34 = vpop.f32.mrb[9].mxu0  ;;  %v3795_v37 = vadd.f32 %v4061_v18, %v7018_v20 }
 0x364   :  { %v4062_v60 = vpop.f32.mrb[10].mxu0  ;;  %v3793_v51 = vadd.f32 %v3754_v34, %v6649_v22 }
 0x365   :  { %v3796_v10 = vadd.f32 %v4062_v60, %v7029_v24  ;;  %v3757_v21 = vpop.f32.mrb[11].mxu0 }
 0x366   :  { %v3794_v23 = vadd.f32 %v3757_v21, %v6657_v26 }
 0x367   :  { %v3806_v54 = vpack.c.bf16 %v3796_v10, %v3795_v37 }
 0x368   :  { %v3805_v45 = vpack.c.bf16 %v3794_v23, %v3793_v51 }
 0x36a   :  { %4076 = vmatpush3.bf16.msra.mxu1 %v3805_v45 }
 0x36b   :  { %4077 = vmatprep.subr.bf16.mxu1 %v4465_v63 }
 0x36e   :  { %4078 = vmatpush3.bf16.msra.mxu1 %v3806_v54 }
 0x36f   :  { %4079 = vmatprep.subr.bf16.mxu1 %v4465_v63 }
 0x387   :  { %v4241_v9 = vpop.permute.xlu1 %4240  ;;  %v4231_v20 = vpop.permute.xlu0 %4230 }
 0x388   :  { %v4233_v26 = vunpack.i.h.bf16 %v4231_v20  ;;  %v4232_v39 = vunpack.i.l.bf16 %v4231_v20  ;;  %v4243_v31 = vunpack.i.h.bf16 %v4241_v9  ;;  %v4242_v50 = vunpack.i.l.bf16 %v4241_v9 }
 0x38a   :  { %v3493_v38 = vsel %vm3492_vm1, %v4232_v39, %v4233_v26  ;;  %v3500_v44 = vsel %vm3499_vm2, %v4242_v50, %v4243_v31 }
 0x38b   :  { %v4246_v33 = vpop.permute.xlu1 %4245  ;;  %v4236_v24 = vpop.permute.xlu0 %4235  ;;  %v3603_v46 = vsel %vm3602_vm3, %v3471_v6, %v3493_v38 }
 0x38c   :  { %v4238_v1 = vunpack.i.h.bf16 %v4236_v24  ;;  %v4237_v22 = vunpack.i.l.bf16 %v4236_v24  ;;  %v4248_v28 = vunpack.i.h.bf16 %v4246_v33  ;;  %v4247_v55 = vunpack.i.l.bf16 %v4246_v33 }
 0x38d   :  { %v3605_v19 = vsel %vm3604_vm6, %v3603_v46, %v3500_v44 }
 0x38e   :  { %v3555_v58 = vsel %vm3492_vm1, %v4237_v22, %v4238_v1  ;;  %v3561_v13 = vsel %vm3499_vm2, %v4247_v55, %v4248_v28 }
 0x38f   :  { %v4256_v2 = vpop.permute.xlu1 %4255  ;;  %v4251_v7 = vpop.permute.xlu0 %4250  ;;  %v3616_v49 = vsel %vm3602_vm3, %v3475_v3, %v3555_v58 }
 0x390   :  { %v4258_v16 = vunpack.i.h.bf16 %v4256_v2  ;;  %v4257_v35 = vunpack.i.l.bf16 %v4256_v2  ;;  %v4253_v12 = vunpack.i.h.bf16 %v4251_v7  ;;  %v4252_v14 = vunpack.i.l.bf16 %v4251_v7 }
 0x391   :  { %v3617_v53 = vsel %vm3604_vm6, %v3616_v49, %v3561_v13 }
 0x392   :  { %v3567_v57 = vsel %vm3506_vm5, %v4257_v35, %v4258_v16  ;;  %v3507_v61 = vsel %vm3506_vm5, %v4252_v14, %v4253_v12 }
 0x393   :  { %v4266_v25 = vpop.permute.xlu1 %4265  ;;  %v4261_v0 = vpop.permute.xlu0 %4260  ;;  %v3618_v41 = vsel %vm3606_vm7, %v3617_v53, %v3567_v57  ;;  %v3607_v52 = vsel %vm3606_vm7, %v3605_v19, %v3507_v61 }
 0x394   :  { %v4268_v11 = vunpack.i.h.bf16 %v4266_v25  ;;  %v4267_v5 = vunpack.i.l.bf16 %v4266_v25  ;;  %v4263_v56 = vunpack.i.h.bf16 %v4261_v0  ;;  %v4262_v47 = vunpack.i.l.bf16 %v4261_v0 }
 0x395   :  { %v3619_v40 = vsel %vm3608_vm8, %v3618_v41, %v4001_v36  ;;  %v3609_v43 = vsel %vm3608_vm8, %v3607_v52, %v4000_v48 }
 0x396   :  { %v3588_v8 = vsel %vm3492_vm1, %v4267_v5, %v4268_v11  ;;  %v3528_v59 = vsel %vm3492_vm1, %v4262_v47, %v4263_v56 }
 0x397   :  { %v4276_v62 = vpop.permute.xlu1 %4275  ;;  %v4271_v30 = vpop.permute.xlu0 %4270  ;;  %v3620_v10 = vsel %vm3610_vm9, %v3619_v40, %v3588_v8  ;;  %v3611_v51 = vsel %vm3610_vm9, %v3609_v43, %v3528_v59 }
 0x398   :  { %v4278_v32 = vunpack.i.h.bf16 %v4276_v62  ;;  %v4277_v29 = vunpack.i.l.bf16 %v4276_v62  ;;  %v4273_v18 = vunpack.i.h.bf16 %v4271_v30  ;;  %v4272_v34 = vunpack.i.l.bf16 %v4271_v30 }
 0x39a   :  { %v3594_v23 = vsel %vm3499_vm2, %v4277_v29, %v4278_v32  ;;  %v3534_v22 = vsel %vm3499_vm2, %v4272_v34, %v4273_v18 }
 0x39b   :  { %v4286_v4 = vpop.permute.xlu1 %4285  ;;  %v4281_v60 = vpop.permute.xlu0 %4280  ;;  %v3613_v50 = vsel %vm3612_vm4, %v3611_v51, %v3534_v22  ;;  %v3621_v3 = vsel %vm3612_vm4, %v3620_v10, %v3594_v23 }
 0x39c   :  { %v4288_v54 = vunpack.i.h.bf16 %v4286_v4  ;;  %v4287_v45 = vunpack.i.l.bf16 %v4286_v4  ;;  %v4283_v20 = vunpack.i.h.bf16 %v4281_v60  ;;  %v4282_v33 = vunpack.i.l.bf16 %v4281_v60 }
 0x39e   :  { %v3600_v28 = vsel %vm3506_vm5, %v4287_v45, %v4288_v54  ;;  %v3540_v31 = vsel %vm3506_vm5, %v4282_v33, %v4283_v20 }
 0x422   :  { %v4065_v37 = vpop.f32.mrb[12].mxu0 }
 0x423   :  { %v3770_v21 = vpop.f32.mrb[13].mxu0  ;;  %v3799_v24 = vadd.f32 %v4065_v37, %v7660_v42  ;;  %v3615_v42 = vsel %vm3614_vm10, %v3613_v50, %v3540_v31 }
 0x424   :  { %v4066_v9 = vpop.f32.mrb[14].mxu0  ;;  %v3797_v7 = vadd.f32 %v3770_v21, %v7417_v15 }
 0x425   :  { %v3800_v2 = vadd.f32 %v4066_v9, %v7662_v17  ;;  %v3773_v1 = vpop.f32.mrb[15].mxu0  ;;  %v3622_v17 = vsel %vm3614_vm10, %v3621_v3, %v3600_v28 }
 0x426   :  { %v3798_v26 = vadd.f32 %v3773_v1, %v7423_v27  ;;  %v3623_v58 = vpack.c.bf16 %v3622_v17, %v3615_v42 }
 0x427   :  { %v3808_v39 = vpack.c.bf16 %v3800_v2, %v3799_v24 }
 0x428   :  { %v3807_v55 = vpack.c.bf16 %v3798_v26, %v3797_v7 }
 0x42a   :  { %4080 = vmatpush3.bf16.msra.mxu1 %v3807_v55 }
 0x42b   :  { %4081 = vmatprep.subr.bf16.mxu1 %v4465_v63 }
 0x42e   :  { %4082 = vmatpush3.bf16.msra.mxu1 %v3808_v39 }
 0x431   :  { %4084 = vmatmul.mubr.bf16.vlgmr.msra.gmra.mrb[0].mxu1 %v3623_v58 }
 0x504   :  { %v3843_v15 = vpop.f32.mrb[0].mxu1 }
 0x505   :  { %v3850_v27 = vmax.f32 %v3843_v15, 0.0  ;;  %v4085_v6 = vpop.f32.mrb[1].mxu1 }
 0x506   :  { %v3846_v38 = vpop.f32.mrb[2].mxu1 }
 0x507   :  { %3852 = vst [vmem:[#allocation2] sm:$0xff] %v3850_v27  ;;  %v3851_v25 = vmax.f32 %v3846_v38, 0.0  ;;  %v4086_v16 = vpop.f32.mrb[3].mxu1 }
 0x509   :  { %3853 = vst [vmem:[#allocation2 + $0x8] sm:$0xff] %v3851_v25 }
 0x50a   :  { %4444 = shalt.err (!%p4441_p4)
}
 0x50b   :  { %s4445_s13 = scalar_lea.hbm %s7722_s6, 256 }
 0x50c   :  { %p4446_p5 = scmp.ne.s32.totalorder %s7722_s6, %s4445_s13  ;;  %p4449_p6 = scmp.lt.u32.totalorder %s4445_s13, %s7722_s6 }
 0x50e   :  { %p4451_p7 = pnand %p4449_p6, %p4446_p5 }
 0x510   :  { %4454 = shalt.err (!%p4451_p7)
}
 0x511   :  { %s4469_s18 = smov 128   ;;  %s4470_s19 = smov 8  }
 0x512   :  { %3865 = dma.vmem_to_hbm [thread:$0]  %s3860_s0, 256, %s7722_s6, [#allocation3], %s4469_s18, %s4469_s18, %s4470_s19  }
 0x513   :  { %4455 = dma.done.wait [#allocation3], 256  }
 0x514   :  { %4456 = vsyncadd [#allocation3], 4294967040 }
 0x515   :  { %3869 = vsyncpa [#allocation3], 1 }

</bundles_post_ra>
